<compile_context>
chip_gen: v7x
topology: tpu7x:2x2x1
jax: 0.10.0
libtpu: 0.0.40
codegen_flags: <defaults>
</compile_context>

<pallas_src>
import math
import functools

import jax
import jax.numpy as jnp
import numpy as np
from jax.experimental import pallas as pl
from jax.experimental.pallas import tpu as pltpu


# ----------------------------------------------------------------------------
# Static slab layouts (shared by wrapper packing and kernel slicing)
# ----------------------------------------------------------------------------
def _offsets(entries):
    offs, pos = {}, 0
    for name, width in entries:
        offs[name] = (pos, width)
        pos += width
    return offs, pos


def _slab_layouts(D, DFF, V):
    # Slab A: every weight matrix whose contraction (first) dim is D,
    # concatenated along the lane axis.  QKV fused per self-MHA, KV fused for
    # the cross-MHA (its Q uses a different input).
    a_entries = [
        ("e_wqkv", 3 * D), ("s_wqkv", 3 * D), ("c_wkv", 2 * D),
        ("e_fw1", DFF), ("d_fw1", DFF),
        ("e_wo", D), ("s_wo", D), ("c_wq", D), ("c_wo", D),
        ("fc_w", V),
    ]
    # Slab B: weight matrices whose first dim is DFF.
    b_entries = [("e_fw2", D), ("d_fw2", D)]
    # Slab C: every bias / LayerNorm gain+shift as one (1, total) lane row.
    c_entries = [
        ("e_bqkv", 3 * D), ("e_bo", D), ("e_ln1_g", D), ("e_ln1_b", D),
        ("e_fb1", DFF), ("e_fb2", D), ("e_ln2_g", D), ("e_ln2_b", D),
        ("s_bqkv", 3 * D), ("s_bo", D), ("d_ln1_g", D), ("d_ln1_b", D),
        ("c_bq", D), ("c_bkv", 2 * D), ("c_bo", D),
        ("d_ln2_g", D), ("d_ln2_b", D),
        ("d_fb1", DFF), ("d_fb2", D), ("d_ln3_g", D), ("d_ln3_b", D),
        ("fc_b", V),
    ]
    return _offsets(a_entries), _offsets(b_entries), _offsets(c_entries)


# ----------------------------------------------------------------------------
# In-kernel building blocks (operate on VMEM values, never touch HBM)
# ----------------------------------------------------------------------------
def _add_layernorm(x, y, g, b, eps):
    """LayerNorm(x + y) over the last axis; g/b are (1, D) rows."""
    z = x + y
    mean = jnp.mean(z, axis=-1, keepdims=True)
    var = jnp.mean(jnp.square(z - mean), axis=-1, keepdims=True)
    return (z - mean) * jax.lax.rsqrt(var + eps) * g + b


def _ffn(x, w1, b1, w2, b2):
    """PositionWiseFeedForward: linear2(relu(linear1(x)))."""
    h = jnp.maximum(
        jnp.dot(x, w1, preferred_element_type=jnp.float32) + b1, 0.0)
    return jnp.dot(h, w2, preferred_element_type=jnp.float32) + b2


def _attention_core(q, k, v, wo, bo, *, num_heads, d_k):
    """scale_dotproduct_attention with the torch `softmax(dim=1)` (over HEADS)
    quirk, with the output projection Wo folded into the per-head loop.

    q is already pre-scaled by 1/sqrt(d_k).  Heads are static lane slices of
    the (S, D) activations; all heads of one (q, k) stay in this invocation so
    the cross-head softmax reduction is exact.
    """
    scores = []
    for h in range(num_heads):
        sl = slice(h * d_k, (h + 1) * d_k)
        scores.append(jax.lax.dot_general(
            q[:, sl], k[:, sl],
            dimension_numbers=(((1,), (1,)), ((), ())),
            preferred_element_type=jnp.float32))               # (Sq, Sk)

    # softmax over the HEADS axis (torch dim=1 of (B,H,Sq,Sk)).
    m = scores[0]
    for s in scores[1:]:
        m = jnp.maximum(m, s)
    exps = [jnp.exp(s - m) for s in scores]
    den = exps[0]
    for e in exps[1:]:
        den = den + e
    inv = pl.reciprocal(den, approx=False)                     # EUP slot

    # Per-head context with Wo folded in: out = sum_h (p_h @ v_h) @ Wo_h + bo.
    out = None
    for h in range(num_heads):
        sl = slice(h * d_k, (h + 1) * d_k)
        head = jnp.dot(exps[h] * inv, v[:, sl],
                       preferred_element_type=jnp.float32)     # (Sq, dk)
        part = jnp.dot(head, wo[sl, :],
                       preferred_element_type=jnp.float32)     # (Sq, D)
        out = part if out is None else out + part
    return out + bo


def _mha_self(x, wqkv, bqkv, wo, bo, *, num_heads, d_k, D):
    """Self-attention: one fused (S,D)x(D,3D) projection, then attention."""
    qkv = jnp.dot(x, wqkv, preferred_element_type=jnp.float32) + bqkv  # (S,3D)
    q = qkv[:, :D] * (1.0 / math.sqrt(d_k))
    k = qkv[:, D:2 * D]
    v = qkv[:, 2 * D:]
    return _attention_core(q, k, v, wo, bo, num_heads=num_heads, d_k=d_k)


def _mha_cross(x_q, x_kv, wq, bq, wkv, bkv, wo, bo, *, num_heads, d_k, D):
    """Cross-attention: separate Q projection, fused (D,2D) KV projection."""
    q = (jnp.dot(x_q, wq, preferred_element_type=jnp.float32) + bq) \
        * (1.0 / math.sqrt(d_k))
    kv = jnp.dot(x_kv, wkv, preferred_element_type=jnp.float32) + bkv  # (Sk,2D)
    k = kv[:, :D]
    v = kv[:, D:]
    return _attention_core(q, k, v, wo, bo, num_heads=num_heads, d_k=d_k)


# ----------------------------------------------------------------------------
# Single fused kernel: encoder + decoder + final fc for a block of the batch
# ----------------------------------------------------------------------------
def _transformer_kernel(feat_ref, lab_ref, wa_ref, wb_ref, bias_ref, out_ref,
                        *, num_heads, d_k, D, eps, batch_block,
                        offs_a, offs_b, offs_c):
    def wa(name):
        s, w = offs_a[name]
        return wa_ref[:, s:s + w]

    def wb(name):
        s, w = offs_b[name]
        return wb_ref[:, s:s + w]

    def bias(name):
        s, w = offs_c[name]
        return bias_ref[:, s:s + w]

    # Hoist all weight/bias slices once (they stay live across the small
    # unrolled batch loop; JAX does not CSE repeated slices).
    e_wqkv, e_bqkv = wa("e_wqkv"), bias("e_bqkv")
    e_wo, e_bo = wa("e_wo"), bias("e_bo")
    e_ln1_g, e_ln1_b = bias("e_ln1_g"), bias("e_ln1_b")
    e_fw1, e_fb1 = wa("e_fw1"), bias("e_fb1")
    e_fw2, e_fb2 = wb("e_fw2"), bias("e_fb2")
    e_ln2_g, e_ln2_b = bias("e_ln2_g"), bias("e_ln2_b")

    s_wqkv, s_bqkv = wa("s_wqkv"), bias("s_bqkv")
    s_wo, s_bo = wa("s_wo"), bias("s_bo")
    d_ln1_g, d_ln1_b = bias("d_ln1_g"), bias("d_ln1_b")

    c_wq, c_bq = wa("c_wq"), bias("c_bq")
    c_wkv, c_bkv = wa("c_wkv"), bias("c_bkv")
    c_wo, c_bo = wa("c_wo"), bias("c_bo")
    d_ln2_g, d_ln2_b = bias("d_ln2_g"), bias("d_ln2_b")

    d_fw1, d_fb1 = wa("d_fw1"), bias("d_fb1")
    d_fw2, d_fb2 = wb("d_fw2"), bias("d_fb2")
    d_ln3_g, d_ln3_b = bias("d_ln3_g"), bias("d_ln3_b")

    fc_w, fc_b = wa("fc_w"), bias("fc_b")

    # Static unroll over the batch elements of this block:
    #   batch_block == 1 on dual-TC chips (grid over B), == B on single-TC.
    for b in range(batch_block):
        x = feat_ref[b]     # (S, D)
        y = lab_ref[b]      # (T, D)

        # -------- Encoder --------
        attn = _mha_self(x, e_wqkv, e_bqkv, e_wo, e_bo,
                         num_heads=num_heads, d_k=d_k, D=D)
        n1 = _add_layernorm(x, attn, e_ln1_g, e_ln1_b, eps)
        ff = _ffn(n1, e_fw1, e_fb1, e_fw2, e_fb2)
        enc = _add_layernorm(n1, ff, e_ln2_g, e_ln2_b, eps)

        # -------- Decoder --------
        attn = _mha_self(y, s_wqkv, s_bqkv, s_wo, s_bo,
                         num_heads=num_heads, d_k=d_k, D=D)
        m1 = _add_layernorm(y, attn, d_ln1_g, d_ln1_b, eps)
        cross = _mha_cross(m1, enc, c_wq, c_bq, c_wkv, c_bkv, c_wo, c_bo,
                           num_heads=num_heads, d_k=d_k, D=D)
        m2 = _add_layernorm(m1, cross, d_ln2_g, d_ln2_b, eps)
        ff = _ffn(m2, d_fw1, d_fb1, d_fw2, d_fb2)
        dec = _add_layernorm(m2, ff, d_ln3_g, d_ln3_b, eps)

        # -------- Final projection: the only HBM write of the forward -------
        out_ref[b] = (jnp.dot(dec, fc_w, preferred_element_type=jnp.float32)
                      + fc_b)


# ----------------------------------------------------------------------------
# Wrapper
# ----------------------------------------------------------------------------
def _tensorcores_per_chip():
    # v7x exposes 2 TensorCores per chip (worth the grid=(B,) megacore split);
    # v5e/v6e have 1, where a batch grid is just a sequential loop.
    # TODO(synk): use pltpu.get_tpu_info() once a core-count field is stable;
    # device_kind string matching is the portable fallback.
    try:
        kind = jax.devices()[0].device_kind.lower()
    except Exception:
        return 1
    return 2 if ("v7" in kind or "7x" in kind) else 1


def transformer_forward(params, features_embed, label_embed,
                        src_mask, tgt_mask, num_heads):
    # TODO(synk): only the mask=None path of scale_dotproduct_attention is
    # implemented (the example / default call passes None masks).
    del src_mask, tgt_mask

    B, S, D = features_embed.shape
    T = label_embed.shape[1]
    V = params["fc_w"].shape[1]
    DFF = params["enc"]["ffn"]["w1"].shape[1]
    d_k = D // num_heads

    (offs_a, len_a), (offs_b, len_b), (offs_c, len_c) = _slab_layouts(D, DFF, V)

    enc, dec = params["enc"], params["dec"]

    def f32(v):
        return jnp.asarray(v, jnp.float32)

    a_parts = {
        "e_wqkv": jnp.concatenate([f32(enc["mha"]["wq"]), f32(enc["mha"]["wk"]),
                                   f32(enc["mha"]["wv"])], axis=1),
        "s_wqkv": jnp.concatenate([f32(dec["self_mha"]["wq"]),
                                   f32(dec["self_mha"]["wk"]),
                                   f32(dec["self_mha"]["wv"])], axis=1),
        "c_wkv": jnp.concatenate([f32(dec["cross_mha"]["wk"]),
                                  f32(dec["cross_mha"]["wv"])], axis=1),
        "e_fw1": f32(enc["ffn"]["w1"]),
        "d_fw1": f32(dec["ffn"]["w1"]),
        "e_wo": f32(enc["mha"]["wo"]),
        "s_wo": f32(dec["self_mha"]["wo"]),
        "c_wq": f32(dec["cross_mha"]["wq"]),
        "c_wo": f32(dec["cross_mha"]["wo"]),
        "fc_w": f32(params["fc_w"]),
    }
    b_parts = {"e_fw2": f32(enc["ffn"]["w2"]), "d_fw2": f32(dec["ffn"]["w2"])}
    c_parts = {
        "e_bqkv": jnp.concatenate([f32(enc["mha"]["bq"]), f32(enc["mha"]["bk"]),
                                   f32(enc["mha"]["bv"])]),
        "e_bo": f32(enc["mha"]["bo"]),
        "e_ln1_g": f32(enc["ln1_g"]), "e_ln1_b": f32(enc["ln1_b"]),
        "e_fb1": f32(enc["ffn"]["b1"]), "e_fb2": f32(enc["ffn"]["b2"]),
        "e_ln2_g": f32(enc["ln2_g"]), "e_ln2_b": f32(enc["ln2_b"]),
        "s_bqkv": jnp.concatenate([f32(dec["self_mha"]["bq"]),
                                   f32(dec["self_mha"]["bk"]),
                                   f32(dec["self_mha"]["bv"])]),
        "s_bo": f32(dec["self_mha"]["bo"]),
        "d_ln1_g": f32(dec["ln1_g"]), "d_ln1_b": f32(dec["ln1_b"]),
        "c_bq": f32(dec["cross_mha"]["bq"]),
        "c_bkv": jnp.concatenate([f32(dec["cross_mha"]["bk"]),
                                  f32(dec["cross_mha"]["bv"])]),
        "c_bo": f32(dec["cross_mha"]["bo"]),
        "d_ln2_g": f32(dec["ln2_g"]), "d_ln2_b": f32(dec["ln2_b"]),
        "d_fb1": f32(dec["ffn"]["b1"]), "d_fb2": f32(dec["ffn"]["b2"]),
        "d_ln3_g": f32(dec["ln3_g"]), "d_ln3_b": f32(dec["ln3_b"]),
        "fc_b": f32(params["fc_b"]),
    }

    def build_slab(offs, total, parts, rows):
        ordered = sorted(offs.items(), key=lambda kv: kv[1][0])
        cols = []
        for name, (_, width) in ordered:
            p = parts[name]
            if p.ndim == 1:
                p = p.reshape(1, -1)
            assert p.shape == (rows, width), (name, p.shape, (rows, width))
            cols.append(p)
        slab = jnp.concatenate(cols, axis=1)
        assert slab.shape == (rows, total)
        return slab

    slab_a = build_slab(offs_a, len_a, a_parts, D)      # (D, 12D+2DFF+V)
    slab_b = build_slab(offs_b, len_b, b_parts, DFF)    # (DFF, 2D)
    slab_c = build_slab(offs_c, len_c, c_parts, 1)      # (1, all biases/LN)

    # Per-generation grid handling.
    if _tensorcores_per_chip() >= 2 and B > 1:
        batch_block = 1        # megacore: one batch element per TensorCore
    else:
        batch_block = B        # single TC: whole batch in one grid step
    num_blocks = B // batch_block

    kernel = functools.partial(
        _transformer_kernel, num_heads=num_heads, d_k=d_k, D=D, eps=1e-5,
        batch_block=batch_block, offs_a=offs_a, offs_b=offs_b, offs_c=offs_c)

    # Weight slabs: whole-array blocks, index_map constant across the grid,
    # so they are DMA'd once and stay resident in VMEM.
    weight_specs = [
        pl.BlockSpec(slab_a.shape, lambda i: (0, 0)),
        pl.BlockSpec(slab_b.shape, lambda i: (0, 0)),
        pl.BlockSpec(slab_c.shape, lambda i: (0, 0)),
    ]

    return pl.pallas_call(
        kernel,
        out_shape=jax.ShapeDtypeStruct((B, T, V), jnp.float32),
        grid=(num_blocks,),
        in_specs=[pl.BlockSpec((batch_block, S, D), lambda i: (i, 0, 0)),
                  pl.BlockSpec((batch_block, T, D), lambda i: (i, 0, 0))]
                 + weight_specs,
        out_specs=pl.BlockSpec((batch_block, T, V), lambda i: (i, 0, 0)),
        compiler_params=pltpu.CompilerParams(
            dimension_semantics=("parallel",)),
    )(features_embed.astype(jnp.float32), label_embed.astype(jnp.float32),
      slab_a, slab_b, slab_c)


# ----------------------------------------------------------------------------
# Deterministic parameter init (synthetic)
# ----------------------------------------------------------------------------
def init_linear(key, din, dout):
    kw, kb = jax.random.split(key)
    w = jax.random.normal(kw, (din, dout), jnp.float32) * 0.02
    b = jax.random.normal(kb, (dout,), jnp.float32) * 0.02
    return w, b


def init_mha_params(key, d):
    ks = jax.random.split(key, 4)
    p = {}
    for name, k in zip(("q", "k", "v", "o"), ks):
        w, b = init_linear(k, d, d)
        p["w" + name] = w
        p["b" + name] = b
    return p


def init_ffn_params(key, d, dff):
    k1, k2 = jax.random.split(key)
    w1, b1 = init_linear(k1, d, dff)
    w2, b2 = init_linear(k2, dff, d)
    return {"w1": w1, "b1": b1, "w2": w2, "b2": b2}


def init_transformer_params(key, d, dff, vocab):
    keys = jax.random.split(key, 6)
    enc = {
        "mha": init_mha_params(keys[0], d),
        "ffn": init_ffn_params(keys[1], d, dff),
        "ln1_g": jnp.ones((d,), jnp.float32), "ln1_b": jnp.zeros((d,), jnp.float32),
        "ln2_g": jnp.ones((d,), jnp.float32), "ln2_b": jnp.zeros((d,), jnp.float32),
    }
    dec = {
        "self_mha": init_mha_params(keys[2], d),
        "cross_mha": init_mha_params(keys[3], d),
        "ffn": init_ffn_params(keys[4], d, dff),
        "ln1_g": jnp.ones((d,), jnp.float32), "ln1_b": jnp.zeros((d,), jnp.float32),
        "ln2_g": jnp.ones((d,), jnp.float32), "ln2_b": jnp.zeros((d,), jnp.float32),
        "ln3_g": jnp.ones((d,), jnp.float32), "ln3_b": jnp.zeros((d,), jnp.float32),
    }
    fc_w, fc_b = init_linear(keys[5], d, vocab)
    return {"enc": enc, "dec": dec, "fc_w": fc_w, "fc_b": fc_b}


# ----------------------------------------------------------------------------
# Pure-JAX reference (for numeric sanity check)
# ----------------------------------------------------------------------------
def _ref_linear(x, w, b):
    return x @ w + b


def _ref_mha(q_in, k_in, v_in, p, H):
    B, Sq, D = q_in.shape
    Sk = k_in.shape[1]
    dk = D // H
    q = _ref_linear(q_in, p["wq"], p["bq"]).reshape(B, Sq, H, dk).transpose(0, 2, 1, 3)
    k = _ref_linear(k_in, p["wk"], p["bk"]).reshape(B, Sk, H, dk).transpose(0, 2, 1, 3)
    v = _ref_linear(v_in, p["wv"], p["bv"]).reshape(B, Sk, H, dk).transpose(0, 2, 1, 3)
    sc = jnp.einsum("bhqd,bhkd->bhqk", q, k) / math.sqrt(dk)
    pr = jax.nn.softmax(sc, axis=1)  # dim=1 (heads) — matches the PyTorch code
    out = jnp.einsum("bhqk,bhkd->bhqd", pr, v)
    return _ref_linear(out.transpose(0, 2, 1, 3).reshape(B, Sq, D), p["wo"], p["bo"])


def _ref_ln(z, g, b, eps=1e-5):
    m = z.mean(-1, keepdims=True)
    v = ((z - m) ** 2).mean(-1, keepdims=True)
    return (z - m) / jnp.sqrt(v + eps) * g + b


def _ref_ffn(x, p):
    return _ref_linear(jnp.maximum(_ref_linear(x, p["w1"], p["b1"]), 0.0),
                       p["w2"], p["b2"])


def transformer_reference(params, feat, lab, H):
    p = params["enc"]
    a = _ref_mha(feat, feat, feat, p["mha"], H)
    n1 = _ref_ln(feat + a, p["ln1_g"], p["ln1_b"])
    enc = _ref_ln(n1 + _ref_ffn(n1, p["ffn"]), p["ln2_g"], p["ln2_b"])
    p = params["dec"]
    a = _ref_mha(lab, lab, lab, p["self_mha"], H)
    n1 = _ref_ln(lab + a, p["ln1_g"], p["ln1_b"])
    c = _ref_mha(n1, enc, enc, p["cross_mha"], H)
    n2 = _ref_ln(n1 + c, p["ln2_g"], p["ln2_b"])
    dec = _ref_ln(n2 + _ref_ffn(n2, p["ffn"]), p["ln3_g"], p["ln3_b"])
    return _ref_linear(dec, params["fc_w"], params["fc_b"])


# ----------------------------------------------------------------------------
if __name__ == "__main__":
    B, S, T = 2, 8, 8          # batch, source seq, target seq
    D, H = 32, 4               # model_dimension, num_heads
    DFF = 64                   # d_ff
    VOCAB = 16                 # tgt_vocab_size

    key = jax.random.PRNGKey(0)
    k_feat, k_lab, k_par = jax.random.split(key, 3)
    features_embed = jax.random.normal(k_feat, (B, S, D), jnp.float32)
    label_embed = jax.random.normal(k_lab, (B, T, D), jnp.float32)
    params = init_transformer_params(k_par, D, DFF, VOCAB)

    out = transformer_forward(params, features_embed, label_embed,
                              None, None, H)
    out = jax.block_until_ready(out)
    assert out.shape == (B, T, VOCAB)

    ref = transformer_reference(params, features_embed, label_embed, H)
    np.testing.assert_allclose(np.asarray(out), np.asarray(ref),
                               rtol=2e-2, atol=2e-2)

    print("KERNEL_OK")
</pallas_src>

<mosaic_0001>
module attributes {stable_mosaic.version = 11 : i64} {
  func.func @_transformer_kernel(%arg0: i32, %arg1: memref<2x8x32xf32, #tpu.memory_space<vmem>>, %arg2: memref<2x8x32xf32, #tpu.memory_space<vmem>>, %arg3: memref<32x528xf32, #tpu.memory_space<vmem>>, %arg4: memref<64x64xf32, #tpu.memory_space<vmem>>, %arg5: memref<1x912xf32, #tpu.memory_space<vmem>>, %arg6: memref<2x8x16xf32, #tpu.memory_space<vmem>>) attributes {dimension_semantics = [#tpu.dimension_semantics<parallel>], iteration_bounds = array<i64: 1>, scalar_prefetch = 0 : i64, scratch_operands = 0 : i64, tpu.core_type = #tpu.core_type<tc>, window_params = [{transform_indices = @transform_0, window_bounds = array<i64: 2, 8, 32>}, {transform_indices = @transform_1, window_bounds = array<i64: 2, 8, 32>}, {pipeline_mode = #tpu.pipeline_mode<synchronous>, transform_indices = @transform_2, window_bounds = array<i64: 32, 528>}, {pipeline_mode = #tpu.pipeline_mode<synchronous>, transform_indices = @transform_3, window_bounds = array<i64: 64, 64>}, {pipeline_mode = #tpu.pipeline_mode<synchronous>, transform_indices = @transform_4, window_bounds = array<i64: 1, 912>}, {transform_indices = @transform_5, window_bounds = array<i64: 2, 8, 16>}]} {
    %c0 = arith.constant 0 : index
    %c0_0 = arith.constant 0 : index
    %0 = vector.load %arg3[%c0, %c0_0] : memref<32x528xf32, #tpu.memory_space<vmem>>, vector<32x96xf32>
    %c0_1 = arith.constant 0 : index
    %c0_2 = arith.constant 0 : index
    %1 = vector.load %arg5[%c0_1, %c0_2] : memref<1x912xf32, #tpu.memory_space<vmem>>, vector<1x96xf32>
    %c0_3 = arith.constant 0 : index
    %c384 = arith.constant 384 : index
    %2 = vector.load %arg3[%c0_3, %c384] : memref<32x528xf32, #tpu.memory_space<vmem>>, vector<32x32xf32>
    %c0_4 = arith.constant 0 : index
    %c96 = arith.constant 96 : index
    %3 = vector.load %arg5[%c0_4, %c96] : memref<1x912xf32, #tpu.memory_space<vmem>>, vector<1x32xf32>
    %c0_5 = arith.constant 0 : index
    %c128 = arith.constant 128 : index
    %4 = vector.load %arg5[%c0_5, %c128] : memref<1x912xf32, #tpu.memory_space<vmem>>, vector<1x32xf32>
    %c0_6 = arith.constant 0 : index
    %c160 = arith.constant 160 : index
    %5 = vector.load %arg5[%c0_6, %c160] : memref<1x912xf32, #tpu.memory_space<vmem>>, vector<1x32xf32>
    %c0_7 = arith.constant 0 : index
    %c256 = arith.constant 256 : index
    %6 = vector.load %arg3[%c0_7, %c256] : memref<32x528xf32, #tpu.memory_space<vmem>>, vector<32x64xf32>
    %c0_8 = arith.constant 0 : index
    %c192 = arith.constant 192 : index
    %7 = vector.load %arg5[%c0_8, %c192] : memref<1x912xf32, #tpu.memory_space<vmem>>, vector<1x64xf32>
    %c0_9 = arith.constant 0 : index
    %c0_10 = arith.constant 0 : index
    %8 = vector.load %arg4[%c0_9, %c0_10] : memref<64x64xf32, #tpu.memory_space<vmem>>, vector<64x32xf32>
    %c0_11 = arith.constant 0 : index
    %c256_12 = arith.constant 256 : index
    %9 = vector.load %arg5[%c0_11, %c256_12] : memref<1x912xf32, #tpu.memory_space<vmem>>, vector<1x32xf32>
    %c0_13 = arith.constant 0 : index
    %c288 = arith.constant 288 : index
    %10 = vector.load %arg5[%c0_13, %c288] : memref<1x912xf32, #tpu.memory_space<vmem>>, vector<1x32xf32>
    %c0_14 = arith.constant 0 : index
    %c320 = arith.constant 320 : index
    %11 = vector.load %arg5[%c0_14, %c320] : memref<1x912xf32, #tpu.memory_space<vmem>>, vector<1x32xf32>
    %c0_15 = arith.constant 0 : index
    %c96_16 = arith.constant 96 : index
    %12 = vector.load %arg3[%c0_15, %c96_16] : memref<32x528xf32, #tpu.memory_space<vmem>>, vector<32x96xf32>
    %c0_17 = arith.constant 0 : index
    %c352 = arith.constant 352 : index
    %13 = vector.load %arg5[%c0_17, %c352] : memref<1x912xf32, #tpu.memory_space<vmem>>, vector<1x96xf32>
    %c0_18 = arith.constant 0 : index
    %c416 = arith.constant 416 : index
    %14 = vector.load %arg3[%c0_18, %c416] : memref<32x528xf32, #tpu.memory_space<vmem>>, vector<32x32xf32>
    %c0_19 = arith.constant 0 : index
    %c448 = arith.constant 448 : index
    %15 = vector.load %arg5[%c0_19, %c448] : memref<1x912xf32, #tpu.memory_space<vmem>>, vector<1x32xf32>
    %c0_20 = arith.constant 0 : index
    %c480 = arith.constant 480 : index
    %16 = vector.load %arg5[%c0_20, %c480] : memref<1x912xf32, #tpu.memory_space<vmem>>, vector<1x32xf32>
    %c0_21 = arith.constant 0 : index
    %c512 = arith.constant 512 : index
    %17 = vector.load %arg5[%c0_21, %c512] : memref<1x912xf32, #tpu.memory_space<vmem>>, vector<1x32xf32>
    %c0_22 = arith.constant 0 : index
    %c448_23 = arith.constant 448 : index
    %18 = vector.load %arg3[%c0_22, %c448_23] : memref<32x528xf32, #tpu.memory_space<vmem>>, vector<32x32xf32>
    %c0_24 = arith.constant 0 : index
    %c544 = arith.constant 544 : index
    %19 = vector.load %arg5[%c0_24, %c544] : memref<1x912xf32, #tpu.memory_space<vmem>>, vector<1x32xf32>
    %c0_25 = arith.constant 0 : index
    %c192_26 = arith.constant 192 : index
    %20 = vector.load %arg3[%c0_25, %c192_26] : memref<32x528xf32, #tpu.memory_space<vmem>>, vector<32x64xf32>
    %c0_27 = arith.constant 0 : index
    %c576 = arith.constant 576 : index
    %21 = vector.load %arg5[%c0_27, %c576] : memref<1x912xf32, #tpu.memory_space<vmem>>, vector<1x64xf32>
    %c0_28 = arith.constant 0 : index
    %c480_29 = arith.constant 480 : index
    %22 = vector.load %arg3[%c0_28, %c480_29] : memref<32x528xf32, #tpu.memory_space<vmem>>, vector<32x32xf32>
    %c0_30 = arith.constant 0 : index
    %c640 = arith.constant 640 : index
    %23 = vector.load %arg5[%c0_30, %c640] : memref<1x912xf32, #tpu.memory_space<vmem>>, vector<1x32xf32>
    %c0_31 = arith.constant 0 : index
    %c672 = arith.constant 672 : index
    %24 = vector.load %arg5[%c0_31, %c672] : memref<1x912xf32, #tpu.memory_space<vmem>>, vector<1x32xf32>
    %c0_32 = arith.constant 0 : index
    %c704 = arith.constant 704 : index
    %25 = vector.load %arg5[%c0_32, %c704] : memref<1x912xf32, #tpu.memory_space<vmem>>, vector<1x32xf32>
    %c0_33 = arith.constant 0 : index
    %c320_34 = arith.constant 320 : index
    %26 = vector.load %arg3[%c0_33, %c320_34] : memref<32x528xf32, #tpu.memory_space<vmem>>, vector<32x64xf32>
    %c0_35 = arith.constant 0 : index
    %c736 = arith.constant 736 : index
    %27 = vector.load %arg5[%c0_35, %c736] : memref<1x912xf32, #tpu.memory_space<vmem>>, vector<1x64xf32>
    %c0_36 = arith.constant 0 : index
    %c32 = arith.constant 32 : index
    %28 = vector.load %arg4[%c0_36, %c32] : memref<64x64xf32, #tpu.memory_space<vmem>>, vector<64x32xf32>
    %c0_37 = arith.constant 0 : index
    %c800 = arith.constant 800 : index
    %29 = vector.load %arg5[%c0_37, %c800] : memref<1x912xf32, #tpu.memory_space<vmem>>, vector<1x32xf32>
    %c0_38 = arith.constant 0 : index
    %c832 = arith.constant 832 : index
    %30 = vector.load %arg5[%c0_38, %c832] : memref<1x912xf32, #tpu.memory_space<vmem>>, vector<1x32xf32>
    %c0_39 = arith.constant 0 : index
    %c864 = arith.constant 864 : index
    %31 = vector.load %arg5[%c0_39, %c864] : memref<1x912xf32, #tpu.memory_space<vmem>>, vector<1x32xf32>
    %c0_40 = arith.constant 0 : index
    %c512_41 = arith.constant 512 : index
    %32 = vector.load %arg3[%c0_40, %c512_41] : memref<32x528xf32, #tpu.memory_space<vmem>>, vector<32x16xf32>
    %c0_42 = arith.constant 0 : index
    %c896 = arith.constant 896 : index
    %33 = vector.load %arg5[%c0_42, %c896] : memref<1x912xf32, #tpu.memory_space<vmem>>, vector<1x16xf32>
    %c0_43 = arith.constant 0 : index
    %c0_44 = arith.constant 0 : index
    %c0_45 = arith.constant 0 : index
    %34 = vector.load %arg1[%c0_43, %c0_44, %c0_45] : memref<2x8x32xf32, #tpu.memory_space<vmem>>, vector<1x8x32xf32>
    %35 = vector.shape_cast %34 : vector<1x8x32xf32> to vector<8x32xf32>
    %c0_46 = arith.constant 0 : index
    %c0_47 = arith.constant 0 : index
    %c0_48 = arith.constant 0 : index
    %36 = vector.load %arg2[%c0_46, %c0_47, %c0_48] : memref<2x8x32xf32, #tpu.memory_space<vmem>>, vector<1x8x32xf32>
    %37 = vector.shape_cast %36 : vector<1x8x32xf32> to vector<8x32xf32>
    %cst = arith.constant dense<0.000000e+00> : vector<8x96xf32>
    %38 = tpu.matmul %35, %0, %cst {dimension_numbers = #tpu.dot_dimension_numbers<[1], [0], [0], [1], [0, 0, 1, 1], [], []>} : vector<8x32xf32>, vector<32x96xf32>, vector<8x96xf32> -> vector<8x96xf32>
    %39 = vector.broadcast %1 : vector<1x96xf32> to vector<8x96xf32>
    %40 = arith.addf %38, %39 : vector<8x96xf32>
    %41 = vector.extract_strided_slice %40 {offsets = [0, 0], sizes = [8, 32], strides = [1, 1]} : vector<8x96xf32> to vector<8x32xf32>
    %cst_49 = arith.constant 0.353553385 : f32
    %42 = vector.broadcast %cst_49 : f32 to vector<8x32xf32>
    %43 = arith.mulf %41, %42 : vector<8x32xf32>
    %44 = vector.extract_strided_slice %40 {offsets = [0, 32], sizes = [8, 32], strides = [1, 1]} : vector<8x96xf32> to vector<8x32xf32>
    %45 = vector.extract_strided_slice %40 {offsets = [0, 64], sizes = [8, 32], strides = [1, 1]} : vector<8x96xf32> to vector<8x32xf32>
    %46 = vector.extract_strided_slice %43 {offsets = [0, 0], sizes = [8, 8], strides = [1, 1]} : vector<8x32xf32> to vector<8x8xf32>
    %47 = vector.extract_strided_slice %44 {offsets = [0, 0], sizes = [8, 8], strides = [1, 1]} : vector<8x32xf32> to vector<8x8xf32>
    %cst_50 = arith.constant dense<0.000000e+00> : vector<8x8xf32>
    %48 = tpu.matmul %46, %47, %cst_50 {dimension_numbers = #tpu.dot_dimension_numbers<[1], [1], [0], [0], [0, 0, 1, 0], [], []>} : vector<8x8xf32>, vector<8x8xf32>, vector<8x8xf32> -> vector<8x8xf32>
    %49 = vector.extract_strided_slice %43 {offsets = [0, 8], sizes = [8, 8], strides = [1, 1]} : vector<8x32xf32> to vector<8x8xf32>
    %50 = vector.extract_strided_slice %44 {offsets = [0, 8], sizes = [8, 8], strides = [1, 1]} : vector<8x32xf32> to vector<8x8xf32>
    %cst_51 = arith.constant dense<0.000000e+00> : vector<8x8xf32>
    %51 = tpu.matmul %49, %50, %cst_51 {dimension_numbers = #tpu.dot_dimension_numbers<[1], [1], [0], [0], [0, 0, 1, 0], [], []>} : vector<8x8xf32>, vector<8x8xf32>, vector<8x8xf32> -> vector<8x8xf32>
    %52 = vector.extract_strided_slice %43 {offsets = [0, 16], sizes = [8, 8], strides = [1, 1]} : vector<8x32xf32> to vector<8x8xf32>
    %53 = vector.extract_strided_slice %44 {offsets = [0, 16], sizes = [8, 8], strides = [1, 1]} : vector<8x32xf32> to vector<8x8xf32>
    %cst_52 = arith.constant dense<0.000000e+00> : vector<8x8xf32>
    %54 = tpu.matmul %52, %53, %cst_52 {dimension_numbers = #tpu.dot_dimension_numbers<[1], [1], [0], [0], [0, 0, 1, 0], [], []>} : vector<8x8xf32>, vector<8x8xf32>, vector<8x8xf32> -> vector<8x8xf32>
    %55 = vector.extract_strided_slice %43 {offsets = [0, 24], sizes = [8, 8], strides = [1, 1]} : vector<8x32xf32> to vector<8x8xf32>
    %56 = vector.extract_strided_slice %44 {offsets = [0, 24], sizes = [8, 8], strides = [1, 1]} : vector<8x32xf32> to vector<8x8xf32>
    %cst_53 = arith.constant dense<0.000000e+00> : vector<8x8xf32>
    %57 = tpu.matmul %55, %56, %cst_53 {dimension_numbers = #tpu.dot_dimension_numbers<[1], [1], [0], [0], [0, 0, 1, 0], [], []>} : vector<8x8xf32>, vector<8x8xf32>, vector<8x8xf32> -> vector<8x8xf32>
    %58 = arith.maximumf %48, %51 : vector<8x8xf32>
    %59 = arith.maximumf %58, %54 : vector<8x8xf32>
    %60 = arith.maximumf %59, %57 : vector<8x8xf32>
    %61 = arith.subf %48, %60 : vector<8x8xf32>
    %62 = math.exp %61 : vector<8x8xf32>
    %63 = arith.subf %51, %60 : vector<8x8xf32>
    %64 = math.exp %63 : vector<8x8xf32>
    %65 = arith.subf %54, %60 : vector<8x8xf32>
    %66 = math.exp %65 : vector<8x8xf32>
    %67 = arith.subf %57, %60 : vector<8x8xf32>
    %68 = math.exp %67 : vector<8x8xf32>
    %69 = arith.addf %62, %64 : vector<8x8xf32>
    %70 = arith.addf %69, %66 : vector<8x8xf32>
    %71 = arith.addf %70, %68 : vector<8x8xf32>
    %72 = tpu.reciprocal %71 : vector<8x8xf32> -> vector<8x8xf32>
    %73 = arith.mulf %62, %72 : vector<8x8xf32>
    %74 = vector.extract_strided_slice %45 {offsets = [0, 0], sizes = [8, 8], strides = [1, 1]} : vector<8x32xf32> to vector<8x8xf32>
    %cst_54 = arith.constant dense<0.000000e+00> : vector<8x8xf32>
    %75 = tpu.matmul %73, %74, %cst_54 {dimension_numbers = #tpu.dot_dimension_numbers<[1], [0], [0], [1], [0, 0, 1, 1], [], []>} : vector<8x8xf32>, vector<8x8xf32>, vector<8x8xf32> -> vector<8x8xf32>
    %76 = vector.extract_strided_slice %2 {offsets = [0, 0], sizes = [8, 32], strides = [1, 1]} : vector<32x32xf32> to vector<8x32xf32>
    %cst_55 = arith.constant dense<0.000000e+00> : vector<8x32xf32>
    %77 = tpu.matmul %75, %76, %cst_55 {dimension_numbers = #tpu.dot_dimension_numbers<[1], [0], [0], [1], [0, 0, 1, 1], [], []>} : vector<8x8xf32>, vector<8x32xf32>, vector<8x32xf32> -> vector<8x32xf32>
    %78 = arith.mulf %64, %72 : vector<8x8xf32>
    %79 = vector.extract_strided_slice %45 {offsets = [0, 8], sizes = [8, 8], strides = [1, 1]} : vector<8x32xf32> to vector<8x8xf32>
    %cst_56 = arith.constant dense<0.000000e+00> : vector<8x8xf32>
    %80 = tpu.matmul %78, %79, %cst_56 {dimension_numbers = #tpu.dot_dimension_numbers<[1], [0], [0], [1], [0, 0, 1, 1], [], []>} : vector<8x8xf32>, vector<8x8xf32>, vector<8x8xf32> -> vector<8x8xf32>
    %81 = vector.extract_strided_slice %2 {offsets = [8, 0], sizes = [8, 32], strides = [1, 1]} : vector<32x32xf32> to vector<8x32xf32>
    %cst_57 = arith.constant dense<0.000000e+00> : vector<8x32xf32>
    %82 = tpu.matmul %80, %81, %cst_57 {dimension_numbers = #tpu.dot_dimension_numbers<[1], [0], [0], [1], [0, 0, 1, 1], [], []>} : vector<8x8xf32>, vector<8x32xf32>, vector<8x32xf32> -> vector<8x32xf32>
    %83 = arith.addf %77, %82 : vector<8x32xf32>
    %84 = arith.mulf %66, %72 : vector<8x8xf32>
    %85 = vector.extract_strided_slice %45 {offsets = [0, 16], sizes = [8, 8], strides = [1, 1]} : vector<8x32xf32> to vector<8x8xf32>
    %cst_58 = arith.constant dense<0.000000e+00> : vector<8x8xf32>
    %86 = tpu.matmul %84, %85, %cst_58 {dimension_numbers = #tpu.dot_dimension_numbers<[1], [0], [0], [1], [0, 0, 1, 1], [], []>} : vector<8x8xf32>, vector<8x8xf32>, vector<8x8xf32> -> vector<8x8xf32>
    %87 = vector.extract_strided_slice %2 {offsets = [16, 0], sizes = [8, 32], strides = [1, 1]} : vector<32x32xf32> to vector<8x32xf32>
    %cst_59 = arith.constant dense<0.000000e+00> : vector<8x32xf32>
    %88 = tpu.matmul %86, %87, %cst_59 {dimension_numbers = #tpu.dot_dimension_numbers<[1], [0], [0], [1], [0, 0, 1, 1], [], []>} : vector<8x8xf32>, vector<8x32xf32>, vector<8x32xf32> -> vector<8x32xf32>
    %89 = arith.addf %83, %88 : vector<8x32xf32>
    %90 = arith.mulf %68, %72 : vector<8x8xf32>
    %91 = vector.extract_strided_slice %45 {offsets = [0, 24], sizes = [8, 8], strides = [1, 1]} : vector<8x32xf32> to vector<8x8xf32>
    %cst_60 = arith.constant dense<0.000000e+00> : vector<8x8xf32>
    %92 = tpu.matmul %90, %91, %cst_60 {dimension_numbers = #tpu.dot_dimension_numbers<[1], [0], [0], [1], [0, 0, 1, 1], [], []>} : vector<8x8xf32>, vector<8x8xf32>, vector<8x8xf32> -> vector<8x8xf32>
    %93 = vector.extract_strided_slice %2 {offsets = [24, 0], sizes = [8, 32], strides = [1, 1]} : vector<32x32xf32> to vector<8x32xf32>
    %cst_61 = arith.constant dense<0.000000e+00> : vector<8x32xf32>
    %94 = tpu.matmul %92, %93, %cst_61 {dimension_numbers = #tpu.dot_dimension_numbers<[1], [0], [0], [1], [0, 0, 1, 1], [], []>} : vector<8x8xf32>, vector<8x32xf32>, vector<8x32xf32> -> vector<8x32xf32>
    %95 = arith.addf %89, %94 : vector<8x32xf32>
    %96 = vector.broadcast %3 : vector<1x32xf32> to vector<8x32xf32>
    %97 = arith.addf %95, %96 : vector<8x32xf32>
    %98 = arith.addf %35, %97 : vector<8x32xf32>
    %cst_62 = arith.constant dense<0.000000e+00> : vector<8xf32>
    %99 = vector.multi_reduction <add>, %98, %cst_62 [1] : vector<8x32xf32> to vector<8xf32>
    %100 = vector.shape_cast %99 : vector<8xf32> to vector<8x1xf32>
    %cst_63 = arith.constant 3.200000e+01 : f32
    %101 = vector.broadcast %cst_63 : f32 to vector<8x1xf32>
    %102 = arith.divf %100, %101 : vector<8x1xf32>
    %103 = vector.broadcast %102 : vector<8x1xf32> to vector<8x32xf32>
    %104 = arith.subf %98, %103 : vector<8x32xf32>
    %105 = arith.mulf %104, %104 : vector<8x32xf32>
    %cst_64 = arith.constant dense<0.000000e+00> : vector<8xf32>
    %106 = vector.multi_reduction <add>, %105, %cst_64 [1] : vector<8x32xf32> to vector<8xf32>
    %107 = vector.shape_cast %106 : vector<8xf32> to vector<8x1xf32>
    %cst_65 = arith.constant 3.200000e+01 : f32
    %108 = vector.broadcast %cst_65 : f32 to vector<8x1xf32>
    %109 = arith.divf %107, %108 : vector<8x1xf32>
    %110 = vector.broadcast %102 : vector<8x1xf32> to vector<8x32xf32>
    %111 = arith.subf %98, %110 : vector<8x32xf32>
    %cst_66 = arith.constant 9.99999974E-6 : f32
    %112 = vector.broadcast %cst_66 : f32 to vector<8x1xf32>
    %113 = arith.addf %109, %112 : vector<8x1xf32>
    %114 = math.rsqrt %113 : vector<8x1xf32>
    %115 = vector.broadcast %114 : vector<8x1xf32> to vector<8x32xf32>
    %116 = arith.mulf %111, %115 : vector<8x32xf32>
    %117 = vector.broadcast %4 : vector<1x32xf32> to vector<8x32xf32>
    %118 = arith.mulf %116, %117 : vector<8x32xf32>
    %119 = vector.broadcast %5 : vector<1x32xf32> to vector<8x32xf32>
    %120 = arith.addf %118, %119 : vector<8x32xf32>
    %cst_67 = arith.constant dense<0.000000e+00> : vector<8x64xf32>
    %121 = tpu.matmul %120, %6, %cst_67 {dimension_numbers = #tpu.dot_dimension_numbers<[1], [0], [0], [1], [0, 0, 1, 1], [], []>} : vector<8x32xf32>, vector<32x64xf32>, vector<8x64xf32> -> vector<8x64xf32>
    %122 = vector.broadcast %7 : vector<1x64xf32> to vector<8x64xf32>
    %123 = arith.addf %121, %122 : vector<8x64xf32>
    %cst_68 = arith.constant 0.000000e+00 : f32
    %124 = vector.broadcast %cst_68 : f32 to vector<8x64xf32>
    %125 = arith.maximumf %123, %124 : vector<8x64xf32>
    %cst_69 = arith.constant dense<0.000000e+00> : vector<8x32xf32>
    %126 = tpu.matmul %125, %8, %cst_69 {dimension_numbers = #tpu.dot_dimension_numbers<[1], [0], [0], [1], [0, 0, 1, 1], [], []>} : vector<8x64xf32>, vector<64x32xf32>, vector<8x32xf32> -> vector<8x32xf32>
    %127 = vector.broadcast %9 : vector<1x32xf32> to vector<8x32xf32>
    %128 = arith.addf %126, %127 : vector<8x32xf32>
    %129 = arith.addf %120, %128 : vector<8x32xf32>
    %cst_70 = arith.constant dense<0.000000e+00> : vector<8xf32>
    %130 = vector.multi_reduction <add>, %129, %cst_70 [1] : vector<8x32xf32> to vector<8xf32>
    %131 = vector.shape_cast %130 : vector<8xf32> to vector<8x1xf32>
    %cst_71 = arith.constant 3.200000e+01 : f32
    %132 = vector.broadcast %cst_71 : f32 to vector<8x1xf32>
    %133 = arith.divf %131, %132 : vector<8x1xf32>
    %134 = vector.broadcast %133 : vector<8x1xf32> to vector<8x32xf32>
    %135 = arith.subf %129, %134 : vector<8x32xf32>
    %136 = arith.mulf %135, %135 : vector<8x32xf32>
    %cst_72 = arith.constant dense<0.000000e+00> : vector<8xf32>
    %137 = vector.multi_reduction <add>, %136, %cst_72 [1] : vector<8x32xf32> to vector<8xf32>
    %138 = vector.shape_cast %137 : vector<8xf32> to vector<8x1xf32>
    %cst_73 = arith.constant 3.200000e+01 : f32
    %139 = vector.broadcast %cst_73 : f32 to vector<8x1xf32>
    %140 = arith.divf %138, %139 : vector<8x1xf32>
    %141 = vector.broadcast %133 : vector<8x1xf32> to vector<8x32xf32>
    %142 = arith.subf %129, %141 : vector<8x32xf32>
    %cst_74 = arith.constant 9.99999974E-6 : f32
    %143 = vector.broadcast %cst_74 : f32 to vector<8x1xf32>
    %144 = arith.addf %140, %143 : vector<8x1xf32>
    %145 = math.rsqrt %144 : vector<8x1xf32>
    %146 = vector.broadcast %145 : vector<8x1xf32> to vector<8x32xf32>
    %147 = arith.mulf %142, %146 : vector<8x32xf32>
    %148 = vector.broadcast %10 : vector<1x32xf32> to vector<8x32xf32>
    %149 = arith.mulf %147, %148 : vector<8x32xf32>
    %150 = vector.broadcast %11 : vector<1x32xf32> to vector<8x32xf32>
    %151 = arith.addf %149, %150 : vector<8x32xf32>
    %cst_75 = arith.constant dense<0.000000e+00> : vector<8x96xf32>
    %152 = tpu.matmul %37, %12, %cst_75 {dimension_numbers = #tpu.dot_dimension_numbers<[1], [0], [0], [1], [0, 0, 1, 1], [], []>} : vector<8x32xf32>, vector<32x96xf32>, vector<8x96xf32> -> vector<8x96xf32>
    %153 = vector.broadcast %13 : vector<1x96xf32> to vector<8x96xf32>
    %154 = arith.addf %152, %153 : vector<8x96xf32>
    %155 = vector.extract_strided_slice %154 {offsets = [0, 0], sizes = [8, 32], strides = [1, 1]} : vector<8x96xf32> to vector<8x32xf32>
    %cst_76 = arith.constant 0.353553385 : f32
    %156 = vector.broadcast %cst_76 : f32 to vector<8x32xf32>
    %157 = arith.mulf %155, %156 : vector<8x32xf32>
    %158 = vector.extract_strided_slice %154 {offsets = [0, 32], sizes = [8, 32], strides = [1, 1]} : vector<8x96xf32> to vector<8x32xf32>
    %159 = vector.extract_strided_slice %154 {offsets = [0, 64], sizes = [8, 32], strides = [1, 1]} : vector<8x96xf32> to vector<8x32xf32>
    %160 = vector.extract_strided_slice %157 {offsets = [0, 0], sizes = [8, 8], strides = [1, 1]} : vector<8x32xf32> to vector<8x8xf32>
    %161 = vector.extract_strided_slice %158 {offsets = [0, 0], sizes = [8, 8], strides = [1, 1]} : vector<8x32xf32> to vector<8x8xf32>
    %cst_77 = arith.constant dense<0.000000e+00> : vector<8x8xf32>
    %162 = tpu.matmul %160, %161, %cst_77 {dimension_numbers = #tpu.dot_dimension_numbers<[1], [1], [0], [0], [0, 0, 1, 0], [], []>} : vector<8x8xf32>, vector<8x8xf32>, vector<8x8xf32> -> vector<8x8xf32>
    %163 = vector.extract_strided_slice %157 {offsets = [0, 8], sizes = [8, 8], strides = [1, 1]} : vector<8x32xf32> to vector<8x8xf32>
    %164 = vector.extract_strided_slice %158 {offsets = [0, 8], sizes = [8, 8], strides = [1, 1]} : vector<8x32xf32> to vector<8x8xf32>
    %cst_78 = arith.constant dense<0.000000e+00> : vector<8x8xf32>
    %165 = tpu.matmul %163, %164, %cst_78 {dimension_numbers = #tpu.dot_dimension_numbers<[1], [1], [0], [0], [0, 0, 1, 0], [], []>} : vector<8x8xf32>, vector<8x8xf32>, vector<8x8xf32> -> vector<8x8xf32>
    %166 = vector.extract_strided_slice %157 {offsets = [0, 16], sizes = [8, 8], strides = [1, 1]} : vector<8x32xf32> to vector<8x8xf32>
    %167 = vector.extract_strided_slice %158 {offsets = [0, 16], sizes = [8, 8], strides = [1, 1]} : vector<8x32xf32> to vector<8x8xf32>
    %cst_79 = arith.constant dense<0.000000e+00> : vector<8x8xf32>
    %168 = tpu.matmul %166, %167, %cst_79 {dimension_numbers = #tpu.dot_dimension_numbers<[1], [1], [0], [0], [0, 0, 1, 0], [], []>} : vector<8x8xf32>, vector<8x8xf32>, vector<8x8xf32> -> vector<8x8xf32>
    %169 = vector.extract_strided_slice %157 {offsets = [0, 24], sizes = [8, 8], strides = [1, 1]} : vector<8x32xf32> to vector<8x8xf32>
    %170 = vector.extract_strided_slice %158 {offsets = [0, 24], sizes = [8, 8], strides = [1, 1]} : vector<8x32xf32> to vector<8x8xf32>
    %cst_80 = arith.constant dense<0.000000e+00> : vector<8x8xf32>
    %171 = tpu.matmul %169, %170, %cst_80 {dimension_numbers = #tpu.dot_dimension_numbers<[1], [1], [0], [0], [0, 0, 1, 0], [], []>} : vector<8x8xf32>, vector<8x8xf32>, vector<8x8xf32> -> vector<8x8xf32>
    %172 = arith.maximumf %162, %165 : vector<8x8xf32>
    %173 = arith.maximumf %172, %168 : vector<8x8xf32>
    %174 = arith.maximumf %173, %171 : vector<8x8xf32>
    %175 = arith.subf %162, %174 : vector<8x8xf32>
    %176 = math.exp %175 : vector<8x8xf32>
    %177 = arith.subf %165, %174 : vector<8x8xf32>
    %178 = math.exp %177 : vector<8x8xf32>
    %179 = arith.subf %168, %174 : vector<8x8xf32>
    %180 = math.exp %179 : vector<8x8xf32>
    %181 = arith.subf %171, %174 : vector<8x8xf32>
    %182 = math.exp %181 : vector<8x8xf32>
    %183 = arith.addf %176, %178 : vector<8x8xf32>
    %184 = arith.addf %183, %180 : vector<8x8xf32>
    %185 = arith.addf %184, %182 : vector<8x8xf32>
    %186 = tpu.reciprocal %185 : vector<8x8xf32> -> vector<8x8xf32>
    %187 = arith.mulf %176, %186 : vector<8x8xf32>
    %188 = vector.extract_strided_slice %159 {offsets = [0, 0], sizes = [8, 8], strides = [1, 1]} : vector<8x32xf32> to vector<8x8xf32>
    %cst_81 = arith.constant dense<0.000000e+00> : vector<8x8xf32>
    %189 = tpu.matmul %187, %188, %cst_81 {dimension_numbers = #tpu.dot_dimension_numbers<[1], [0], [0], [1], [0, 0, 1, 1], [], []>} : vector<8x8xf32>, vector<8x8xf32>, vector<8x8xf32> -> vector<8x8xf32>
    %190 = vector.extract_strided_slice %14 {offsets = [0, 0], sizes = [8, 32], strides = [1, 1]} : vector<32x32xf32> to vector<8x32xf32>
    %cst_82 = arith.constant dense<0.000000e+00> : vector<8x32xf32>
    %191 = tpu.matmul %189, %190, %cst_82 {dimension_numbers = #tpu.dot_dimension_numbers<[1], [0], [0], [1], [0, 0, 1, 1], [], []>} : vector<8x8xf32>, vector<8x32xf32>, vector<8x32xf32> -> vector<8x32xf32>
    %192 = arith.mulf %178, %186 : vector<8x8xf32>
    %193 = vector.extract_strided_slice %159 {offsets = [0, 8], sizes = [8, 8], strides = [1, 1]} : vector<8x32xf32> to vector<8x8xf32>
    %cst_83 = arith.constant dense<0.000000e+00> : vector<8x8xf32>
    %194 = tpu.matmul %192, %193, %cst_83 {dimension_numbers = #tpu.dot_dimension_numbers<[1], [0], [0], [1], [0, 0, 1, 1], [], []>} : vector<8x8xf32>, vector<8x8xf32>, vector<8x8xf32> -> vector<8x8xf32>
    %195 = vector.extract_strided_slice %14 {offsets = [8, 0], sizes = [8, 32], strides = [1, 1]} : vector<32x32xf32> to vector<8x32xf32>
    %cst_84 = arith.constant dense<0.000000e+00> : vector<8x32xf32>
    %196 = tpu.matmul %194, %195, %cst_84 {dimension_numbers = #tpu.dot_dimension_numbers<[1], [0], [0], [1], [0, 0, 1, 1], [], []>} : vector<8x8xf32>, vector<8x32xf32>, vector<8x32xf32> -> vector<8x32xf32>
    %197 = arith.addf %191, %196 : vector<8x32xf32>
    %198 = arith.mulf %180, %186 : vector<8x8xf32>
    %199 = vector.extract_strided_slice %159 {offsets = [0, 16], sizes = [8, 8], strides = [1, 1]} : vector<8x32xf32> to vector<8x8xf32>
    %cst_85 = arith.constant dense<0.000000e+00> : vector<8x8xf32>
    %200 = tpu.matmul %198, %199, %cst_85 {dimension_numbers = #tpu.dot_dimension_numbers<[1], [0], [0], [1], [0, 0, 1, 1], [], []>} : vector<8x8xf32>, vector<8x8xf32>, vector<8x8xf32> -> vector<8x8xf32>
    %201 = vector.extract_strided_slice %14 {offsets = [16, 0], sizes = [8, 32], strides = [1, 1]} : vector<32x32xf32> to vector<8x32xf32>
    %cst_86 = arith.constant dense<0.000000e+00> : vector<8x32xf32>
    %202 = tpu.matmul %200, %201, %cst_86 {dimension_numbers = #tpu.dot_dimension_numbers<[1], [0], [0], [1], [0, 0, 1, 1], [], []>} : vector<8x8xf32>, vector<8x32xf32>, vector<8x32xf32> -> vector<8x32xf32>
    %203 = arith.addf %197, %202 : vector<8x32xf32>
    %204 = arith.mulf %182, %186 : vector<8x8xf32>
    %205 = vector.extract_strided_slice %159 {offsets = [0, 24], sizes = [8, 8], strides = [1, 1]} : vector<8x32xf32> to vector<8x8xf32>
    %cst_87 = arith.constant dense<0.000000e+00> : vector<8x8xf32>
    %206 = tpu.matmul %204, %205, %cst_87 {dimension_numbers = #tpu.dot_dimension_numbers<[1], [0], [0], [1], [0, 0, 1, 1], [], []>} : vector<8x8xf32>, vector<8x8xf32>, vector<8x8xf32> -> vector<8x8xf32>
    %207 = vector.extract_strided_slice %14 {offsets = [24, 0], sizes = [8, 32], strides = [1, 1]} : vector<32x32xf32> to vector<8x32xf32>
    %cst_88 = arith.constant dense<0.000000e+00> : vector<8x32xf32>
    %208 = tpu.matmul %206, %207, %cst_88 {dimension_numbers = #tpu.dot_dimension_numbers<[1], [0], [0], [1], [0, 0, 1, 1], [], []>} : vector<8x8xf32>, vector<8x32xf32>, vector<8x32xf32> -> vector<8x32xf32>
    %209 = arith.addf %203, %208 : vector<8x32xf32>
    %210 = vector.broadcast %15 : vector<1x32xf32> to vector<8x32xf32>
    %211 = arith.addf %209, %210 : vector<8x32xf32>
    %212 = arith.addf %37, %211 : vector<8x32xf32>
    %cst_89 = arith.constant dense<0.000000e+00> : vector<8xf32>
    %213 = vector.multi_reduction <add>, %212, %cst_89 [1] : vector<8x32xf32> to vector<8xf32>
    %214 = vector.shape_cast %213 : vector<8xf32> to vector<8x1xf32>
    %cst_90 = arith.constant 3.200000e+01 : f32
    %215 = vector.broadcast %cst_90 : f32 to vector<8x1xf32>
    %216 = arith.divf %214, %215 : vector<8x1xf32>
    %217 = vector.broadcast %216 : vector<8x1xf32> to vector<8x32xf32>
    %218 = arith.subf %212, %217 : vector<8x32xf32>
    %219 = arith.mulf %218, %218 : vector<8x32xf32>
    %cst_91 = arith.constant dense<0.000000e+00> : vector<8xf32>
    %220 = vector.multi_reduction <add>, %219, %cst_91 [1] : vector<8x32xf32> to vector<8xf32>
    %221 = vector.shape_cast %220 : vector<8xf32> to vector<8x1xf32>
    %cst_92 = arith.constant 3.200000e+01 : f32
    %222 = vector.broadcast %cst_92 : f32 to vector<8x1xf32>
    %223 = arith.divf %221, %222 : vector<8x1xf32>
    %224 = vector.broadcast %216 : vector<8x1xf32> to vector<8x32xf32>
    %225 = arith.subf %212, %224 : vector<8x32xf32>
    %cst_93 = arith.constant 9.99999974E-6 : f32
    %226 = vector.broadcast %cst_93 : f32 to vector<8x1xf32>
    %227 = arith.addf %223, %226 : vector<8x1xf32>
    %228 = math.rsqrt %227 : vector<8x1xf32>
    %229 = vector.broadcast %228 : vector<8x1xf32> to vector<8x32xf32>
    %230 = arith.mulf %225, %229 : vector<8x32xf32>
    %231 = vector.broadcast %16 : vector<1x32xf32> to vector<8x32xf32>
    %232 = arith.mulf %230, %231 : vector<8x32xf32>
    %233 = vector.broadcast %17 : vector<1x32xf32> to vector<8x32xf32>
    %234 = arith.addf %232, %233 : vector<8x32xf32>
    %cst_94 = arith.constant dense<0.000000e+00> : vector<8x32xf32>
    %235 = tpu.matmul %234, %18, %cst_94 {dimension_numbers = #tpu.dot_dimension_numbers<[1], [0], [0], [1], [0, 0, 1, 1], [], []>} : vector<8x32xf32>, vector<32x32xf32>, vector<8x32xf32> -> vector<8x32xf32>
    %236 = vector.broadcast %19 : vector<1x32xf32> to vector<8x32xf32>
    %237 = arith.addf %235, %236 : vector<8x32xf32>
    %cst_95 = arith.constant 0.353553385 : f32
    %238 = vector.broadcast %cst_95 : f32 to vector<8x32xf32>
    %239 = arith.mulf %237, %238 : vector<8x32xf32>
    %cst_96 = arith.constant dense<0.000000e+00> : vector<8x64xf32>
    %240 = tpu.matmul %151, %20, %cst_96 {dimension_numbers = #tpu.dot_dimension_numbers<[1], [0], [0], [1], [0, 0, 1, 1], [], []>} : vector<8x32xf32>, vector<32x64xf32>, vector<8x64xf32> -> vector<8x64xf32>
    %241 = vector.broadcast %21 : vector<1x64xf32> to vector<8x64xf32>
    %242 = arith.addf %240, %241 : vector<8x64xf32>
    %243 = vector.extract_strided_slice %242 {offsets = [0, 0], sizes = [8, 32], strides = [1, 1]} : vector<8x64xf32> to vector<8x32xf32>
    %244 = vector.extract_strided_slice %242 {offsets = [0, 32], sizes = [8, 32], strides = [1, 1]} : vector<8x64xf32> to vector<8x32xf32>
    %245 = vector.extract_strided_slice %239 {offsets = [0, 0], sizes = [8, 8], strides = [1, 1]} : vector<8x32xf32> to vector<8x8xf32>
    %246 = vector.extract_strided_slice %243 {offsets = [0, 0], sizes = [8, 8], strides = [1, 1]} : vector<8x32xf32> to vector<8x8xf32>
    %cst_97 = arith.constant dense<0.000000e+00> : vector<8x8xf32>
    %247 = tpu.matmul %245, %246, %cst_97 {dimension_numbers = #tpu.dot_dimension_numbers<[1], [1], [0], [0], [0, 0, 1, 0], [], []>} : vector<8x8xf32>, vector<8x8xf32>, vector<8x8xf32> -> vector<8x8xf32>
    %248 = vector.extract_strided_slice %239 {offsets = [0, 8], sizes = [8, 8], strides = [1, 1]} : vector<8x32xf32> to vector<8x8xf32>
    %249 = vector.extract_strided_slice %243 {offsets = [0, 8], sizes = [8, 8], strides = [1, 1]} : vector<8x32xf32> to vector<8x8xf32>
    %cst_98 = arith.constant dense<0.000000e+00> : vector<8x8xf32>
    %250 = tpu.matmul %248, %249, %cst_98 {dimension_numbers = #tpu.dot_dimension_numbers<[1], [1], [0], [0], [0, 0, 1, 0], [], []>} : vector<8x8xf32>, vector<8x8xf32>, vector<8x8xf32> -> vector<8x8xf32>
    %251 = vector.extract_strided_slice %239 {offsets = [0, 16], sizes = [8, 8], strides = [1, 1]} : vector<8x32xf32> to vector<8x8xf32>
    %252 = vector.extract_strided_slice %243 {offsets = [0, 16], sizes = [8, 8], strides = [1, 1]} : vector<8x32xf32> to vector<8x8xf32>
    %cst_99 = arith.constant dense<0.000000e+00> : vector<8x8xf32>
    %253 = tpu.matmul %251, %252, %cst_99 {dimension_numbers = #tpu.dot_dimension_numbers<[1], [1], [0], [0], [0, 0, 1, 0], [], []>} : vector<8x8xf32>, vector<8x8xf32>, vector<8x8xf32> -> vector<8x8xf32>
    %254 = vector.extract_strided_slice %239 {offsets = [0, 24], sizes = [8, 8], strides = [1, 1]} : vector<8x32xf32> to vector<8x8xf32>
    %255 = vector.extract_strided_slice %243 {offsets = [0, 24], sizes = [8, 8], strides = [1, 1]} : vector<8x32xf32> to vector<8x8xf32>
    %cst_100 = arith.constant dense<0.000000e+00> : vector<8x8xf32>
    %256 = tpu.matmul %254, %255, %cst_100 {dimension_numbers = #tpu.dot_dimension_numbers<[1], [1], [0], [0], [0, 0, 1, 0], [], []>} : vector<8x8xf32>, vector<8x8xf32>, vector<8x8xf32> -> vector<8x8xf32>
    %257 = arith.maximumf %247, %250 : vector<8x8xf32>
    %258 = arith.maximumf %257, %253 : vector<8x8xf32>
    %259 = arith.maximumf %258, %256 : vector<8x8xf32>
    %260 = arith.subf %247, %259 : vector<8x8xf32>
    %261 = math.exp %260 : vector<8x8xf32>
    %262 = arith.subf %250, %259 : vector<8x8xf32>
    %263 = math.exp %262 : vector<8x8xf32>
    %264 = arith.subf %253, %259 : vector<8x8xf32>
    %265 = math.exp %264 : vector<8x8xf32>
    %266 = arith.subf %256, %259 : vector<8x8xf32>
    %267 = math.exp %266 : vector<8x8xf32>
    %268 = arith.addf %261, %263 : vector<8x8xf32>
    %269 = arith.addf %268, %265 : vector<8x8xf32>
    %270 = arith.addf %269, %267 : vector<8x8xf32>
    %271 = tpu.reciprocal %270 : vector<8x8xf32> -> vector<8x8xf32>
    %272 = arith.mulf %261, %271 : vector<8x8xf32>
    %273 = vector.extract_strided_slice %244 {offsets = [0, 0], sizes = [8, 8], strides = [1, 1]} : vector<8x32xf32> to vector<8x8xf32>
    %cst_101 = arith.constant dense<0.000000e+00> : vector<8x8xf32>
    %274 = tpu.matmul %272, %273, %cst_101 {dimension_numbers = #tpu.dot_dimension_numbers<[1], [0], [0], [1], [0, 0, 1, 1], [], []>} : vector<8x8xf32>, vector<8x8xf32>, vector<8x8xf32> -> vector<8x8xf32>
    %275 = vector.extract_strided_slice %22 {offsets = [0, 0], sizes = [8, 32], strides = [1, 1]} : vector<32x32xf32> to vector<8x32xf32>
    %cst_102 = arith.constant dense<0.000000e+00> : vector<8x32xf32>
    %276 = tpu.matmul %274, %275, %cst_102 {dimension_numbers = #tpu.dot_dimension_numbers<[1], [0], [0], [1], [0, 0, 1, 1], [], []>} : vector<8x8xf32>, vector<8x32xf32>, vector<8x32xf32> -> vector<8x32xf32>
    %277 = arith.mulf %263, %271 : vector<8x8xf32>
    %278 = vector.extract_strided_slice %244 {offsets = [0, 8], sizes = [8, 8], strides = [1, 1]} : vector<8x32xf32> to vector<8x8xf32>
    %cst_103 = arith.constant dense<0.000000e+00> : vector<8x8xf32>
    %279 = tpu.matmul %277, %278, %cst_103 {dimension_numbers = #tpu.dot_dimension_numbers<[1], [0], [0], [1], [0, 0, 1, 1], [], []>} : vector<8x8xf32>, vector<8x8xf32>, vector<8x8xf32> -> vector<8x8xf32>
    %280 = vector.extract_strided_slice %22 {offsets = [8, 0], sizes = [8, 32], strides = [1, 1]} : vector<32x32xf32> to vector<8x32xf32>
    %cst_104 = arith.constant dense<0.000000e+00> : vector<8x32xf32>
    %281 = tpu.matmul %279, %280, %cst_104 {dimension_numbers = #tpu.dot_dimension_numbers<[1], [0], [0], [1], [0, 0, 1, 1], [], []>} : vector<8x8xf32>, vector<8x32xf32>, vector<8x32xf32> -> vector<8x32xf32>
    %282 = arith.addf %276, %281 : vector<8x32xf32>
    %283 = arith.mulf %265, %271 : vector<8x8xf32>
    %284 = vector.extract_strided_slice %244 {offsets = [0, 16], sizes = [8, 8], strides = [1, 1]} : vector<8x32xf32> to vector<8x8xf32>
    %cst_105 = arith.constant dense<0.000000e+00> : vector<8x8xf32>
    %285 = tpu.matmul %283, %284, %cst_105 {dimension_numbers = #tpu.dot_dimension_numbers<[1], [0], [0], [1], [0, 0, 1, 1], [], []>} : vector<8x8xf32>, vector<8x8xf32>, vector<8x8xf32> -> vector<8x8xf32>
    %286 = vector.extract_strided_slice %22 {offsets = [16, 0], sizes = [8, 32], strides = [1, 1]} : vector<32x32xf32> to vector<8x32xf32>
    %cst_106 = arith.constant dense<0.000000e+00> : vector<8x32xf32>
    %287 = tpu.matmul %285, %286, %cst_106 {dimension_numbers = #tpu.dot_dimension_numbers<[1], [0], [0], [1], [0, 0, 1, 1], [], []>} : vector<8x8xf32>, vector<8x32xf32>, vector<8x32xf32> -> vector<8x32xf32>
    %288 = arith.addf %282, %287 : vector<8x32xf32>
    %289 = arith.mulf %267, %271 : vector<8x8xf32>
    %290 = vector.extract_strided_slice %244 {offsets = [0, 24], sizes = [8, 8], strides = [1, 1]} : vector<8x32xf32> to vector<8x8xf32>
    %cst_107 = arith.constant dense<0.000000e+00> : vector<8x8xf32>
    %291 = tpu.matmul %289, %290, %cst_107 {dimension_numbers = #tpu.dot_dimension_numbers<[1], [0], [0], [1], [0, 0, 1, 1], [], []>} : vector<8x8xf32>, vector<8x8xf32>, vector<8x8xf32> -> vector<8x8xf32>
    %292 = vector.extract_strided_slice %22 {offsets = [24, 0], sizes = [8, 32], strides = [1, 1]} : vector<32x32xf32> to vector<8x32xf32>
    %cst_108 = arith.constant dense<0.000000e+00> : vector<8x32xf32>
    %293 = tpu.matmul %291, %292, %cst_108 {dimension_numbers = #tpu.dot_dimension_numbers<[1], [0], [0], [1], [0, 0, 1, 1], [], []>} : vector<8x8xf32>, vector<8x32xf32>, vector<8x32xf32> -> vector<8x32xf32>
    %294 = arith.addf %288, %293 : vector<8x32xf32>
    %295 = vector.broadcast %23 : vector<1x32xf32> to vector<8x32xf32>
    %296 = arith.addf %294, %295 : vector<8x32xf32>
    %297 = arith.addf %234, %296 : vector<8x32xf32>
    %cst_109 = arith.constant dense<0.000000e+00> : vector<8xf32>
    %298 = vector.multi_reduction <add>, %297, %cst_109 [1] : vector<8x32xf32> to vector<8xf32>
    %299 = vector.shape_cast %298 : vector<8xf32> to vector<8x1xf32>
    %cst_110 = arith.constant 3.200000e+01 : f32
    %300 = vector.broadcast %cst_110 : f32 to vector<8x1xf32>
    %301 = arith.divf %299, %300 : vector<8x1xf32>
    %302 = vector.broadcast %301 : vector<8x1xf32> to vector<8x32xf32>
    %303 = arith.subf %297, %302 : vector<8x32xf32>
    %304 = arith.mulf %303, %303 : vector<8x32xf32>
    %cst_111 = arith.constant dense<0.000000e+00> : vector<8xf32>
    %305 = vector.multi_reduction <add>, %304, %cst_111 [1] : vector<8x32xf32> to vector<8xf32>
    %306 = vector.shape_cast %305 : vector<8xf32> to vector<8x1xf32>
    %cst_112 = arith.constant 3.200000e+01 : f32
    %307 = vector.broadcast %cst_112 : f32 to vector<8x1xf32>
    %308 = arith.divf %306, %307 : vector<8x1xf32>
    %309 = vector.broadcast %301 : vector<8x1xf32> to vector<8x32xf32>
    %310 = arith.subf %297, %309 : vector<8x32xf32>
    %cst_113 = arith.constant 9.99999974E-6 : f32
    %311 = vector.broadcast %cst_113 : f32 to vector<8x1xf32>
    %312 = arith.addf %308, %311 : vector<8x1xf32>
    %313 = math.rsqrt %312 : vector<8x1xf32>
    %314 = vector.broadcast %313 : vector<8x1xf32> to vector<8x32xf32>
    %315 = arith.mulf %310, %314 : vector<8x32xf32>
    %316 = vector.broadcast %24 : vector<1x32xf32> to vector<8x32xf32>
    %317 = arith.mulf %315, %316 : vector<8x32xf32>
    %318 = vector.broadcast %25 : vector<1x32xf32> to vector<8x32xf32>
    %319 = arith.addf %317, %318 : vector<8x32xf32>
    %cst_114 = arith.constant dense<0.000000e+00> : vector<8x64xf32>
    %320 = tpu.matmul %319, %26, %cst_114 {dimension_numbers = #tpu.dot_dimension_numbers<[1], [0], [0], [1], [0, 0, 1, 1], [], []>} : vector<8x32xf32>, vector<32x64xf32>, vector<8x64xf32> -> vector<8x64xf32>
    %321 = vector.broadcast %27 : vector<1x64xf32> to vector<8x64xf32>
    %322 = arith.addf %320, %321 : vector<8x64xf32>
    %cst_115 = arith.constant 0.000000e+00 : f32
    %323 = vector.broadcast %cst_115 : f32 to vector<8x64xf32>
    %324 = arith.maximumf %322, %323 : vector<8x64xf32>
    %cst_116 = arith.constant dense<0.000000e+00> : vector<8x32xf32>
    %325 = tpu.matmul %324, %28, %cst_116 {dimension_numbers = #tpu.dot_dimension_numbers<[1], [0], [0], [1], [0, 0, 1, 1], [], []>} : vector<8x64xf32>, vector<64x32xf32>, vector<8x32xf32> -> vector<8x32xf32>
    %326 = vector.broadcast %29 : vector<1x32xf32> to vector<8x32xf32>
    %327 = arith.addf %325, %326 : vector<8x32xf32>
    %328 = arith.addf %319, %327 : vector<8x32xf32>
    %cst_117 = arith.constant dense<0.000000e+00> : vector<8xf32>
    %329 = vector.multi_reduction <add>, %328, %cst_117 [1] : vector<8x32xf32> to vector<8xf32>
    %330 = vector.shape_cast %329 : vector<8xf32> to vector<8x1xf32>
    %cst_118 = arith.constant 3.200000e+01 : f32
    %331 = vector.broadcast %cst_118 : f32 to vector<8x1xf32>
    %332 = arith.divf %330, %331 : vector<8x1xf32>
    %333 = vector.broadcast %332 : vector<8x1xf32> to vector<8x32xf32>
    %334 = arith.subf %328, %333 : vector<8x32xf32>
    %335 = arith.mulf %334, %334 : vector<8x32xf32>
    %cst_119 = arith.constant dense<0.000000e+00> : vector<8xf32>
    %336 = vector.multi_reduction <add>, %335, %cst_119 [1] : vector<8x32xf32> to vector<8xf32>
    %337 = vector.shape_cast %336 : vector<8xf32> to vector<8x1xf32>
    %cst_120 = arith.constant 3.200000e+01 : f32
    %338 = vector.broadcast %cst_120 : f32 to vector<8x1xf32>
    %339 = arith.divf %337, %338 : vector<8x1xf32>
    %340 = vector.broadcast %332 : vector<8x1xf32> to vector<8x32xf32>
    %341 = arith.subf %328, %340 : vector<8x32xf32>
    %cst_121 = arith.constant 9.99999974E-6 : f32
    %342 = vector.broadcast %cst_121 : f32 to vector<8x1xf32>
    %343 = arith.addf %339, %342 : vector<8x1xf32>
    %344 = math.rsqrt %343 : vector<8x1xf32>
    %345 = vector.broadcast %344 : vector<8x1xf32> to vector<8x32xf32>
    %346 = arith.mulf %341, %345 : vector<8x32xf32>
    %347 = vector.broadcast %30 : vector<1x32xf32> to vector<8x32xf32>
    %348 = arith.mulf %346, %347 : vector<8x32xf32>
    %349 = vector.broadcast %31 : vector<1x32xf32> to vector<8x32xf32>
    %350 = arith.addf %348, %349 : vector<8x32xf32>
    %cst_122 = arith.constant dense<0.000000e+00> : vector<8x16xf32>
    %351 = tpu.matmul %350, %32, %cst_122 {dimension_numbers = #tpu.dot_dimension_numbers<[1], [0], [0], [1], [0, 0, 1, 1], [], []>} : vector<8x32xf32>, vector<32x16xf32>, vector<8x16xf32> -> vector<8x16xf32>
    %352 = vector.broadcast %33 : vector<1x16xf32> to vector<8x16xf32>
    %353 = arith.addf %351, %352 : vector<8x16xf32>
    %c0_123 = arith.constant 0 : index
    %c0_124 = arith.constant 0 : index
    %c0_125 = arith.constant 0 : index
    %354 = vector.load %arg6[%c0_123, %c0_124, %c0_125] : memref<2x8x16xf32, #tpu.memory_space<vmem>>, vector<1x8x16xf32>
    %355 = vector.shape_cast %354 : vector<1x8x16xf32> to vector<8x16xf32>
    %356 = vector.shape_cast %353 : vector<8x16xf32> to vector<1x8x16xf32>
    tpu.vector_store %arg6[%c0_123, %c0_124, %c0_125], %356 {strides = array<i32>} : memref<2x8x16xf32, #tpu.memory_space<vmem>>, vector<1x8x16xf32>,
    %c1 = arith.constant 1 : index
    %c0_126 = arith.constant 0 : index
    %c0_127 = arith.constant 0 : index
    %357 = vector.load %arg1[%c1, %c0_126, %c0_127] : memref<2x8x32xf32, #tpu.memory_space<vmem>>, vector<1x8x32xf32>
    %358 = vector.shape_cast %357 : vector<1x8x32xf32> to vector<8x32xf32>
    %c1_128 = arith.constant 1 : index
    %c0_129 = arith.constant 0 : index
    %c0_130 = arith.constant 0 : index
    %359 = vector.load %arg2[%c1_128, %c0_129, %c0_130] : memref<2x8x32xf32, #tpu.memory_space<vmem>>, vector<1x8x32xf32>
    %360 = vector.shape_cast %359 : vector<1x8x32xf32> to vector<8x32xf32>
    %cst_131 = arith.constant dense<0.000000e+00> : vector<8x96xf32>
    %361 = tpu.matmul %358, %0, %cst_131 {dimension_numbers = #tpu.dot_dimension_numbers<[1], [0], [0], [1], [0, 0, 1, 1], [], []>} : vector<8x32xf32>, vector<32x96xf32>, vector<8x96xf32> -> vector<8x96xf32>
    %362 = vector.broadcast %1 : vector<1x96xf32> to vector<8x96xf32>
    %363 = arith.addf %361, %362 : vector<8x96xf32>
    %364 = vector.extract_strided_slice %363 {offsets = [0, 0], sizes = [8, 32], strides = [1, 1]} : vector<8x96xf32> to vector<8x32xf32>
    %cst_132 = arith.constant 0.353553385 : f32
    %365 = vector.broadcast %cst_132 : f32 to vector<8x32xf32>
    %366 = arith.mulf %364, %365 : vector<8x32xf32>
    %367 = vector.extract_strided_slice %363 {offsets = [0, 32], sizes = [8, 32], strides = [1, 1]} : vector<8x96xf32> to vector<8x32xf32>
    %368 = vector.extract_strided_slice %363 {offsets = [0, 64], sizes = [8, 32], strides = [1, 1]} : vector<8x96xf32> to vector<8x32xf32>
    %369 = vector.extract_strided_slice %366 {offsets = [0, 0], sizes = [8, 8], strides = [1, 1]} : vector<8x32xf32> to vector<8x8xf32>
    %370 = vector.extract_strided_slice %367 {offsets = [0, 0], sizes = [8, 8], strides = [1, 1]} : vector<8x32xf32> to vector<8x8xf32>
    %cst_133 = arith.constant dense<0.000000e+00> : vector<8x8xf32>
    %371 = tpu.matmul %369, %370, %cst_133 {dimension_numbers = #tpu.dot_dimension_numbers<[1], [1], [0], [0], [0, 0, 1, 0], [], []>} : vector<8x8xf32>, vector<8x8xf32>, vector<8x8xf32> -> vector<8x8xf32>
    %372 = vector.extract_strided_slice %366 {offsets = [0, 8], sizes = [8, 8], strides = [1, 1]} : vector<8x32xf32> to vector<8x8xf32>
    %373 = vector.extract_strided_slice %367 {offsets = [0, 8], sizes = [8, 8], strides = [1, 1]} : vector<8x32xf32> to vector<8x8xf32>
    %cst_134 = arith.constant dense<0.000000e+00> : vector<8x8xf32>
    %374 = tpu.matmul %372, %373, %cst_134 {dimension_numbers = #tpu.dot_dimension_numbers<[1], [1], [0], [0], [0, 0, 1, 0], [], []>} : vector<8x8xf32>, vector<8x8xf32>, vector<8x8xf32> -> vector<8x8xf32>
    %375 = vector.extract_strided_slice %366 {offsets = [0, 16], sizes = [8, 8], strides = [1, 1]} : vector<8x32xf32> to vector<8x8xf32>
    %376 = vector.extract_strided_slice %367 {offsets = [0, 16], sizes = [8, 8], strides = [1, 1]} : vector<8x32xf32> to vector<8x8xf32>
    %cst_135 = arith.constant dense<0.000000e+00> : vector<8x8xf32>
    %377 = tpu.matmul %375, %376, %cst_135 {dimension_numbers = #tpu.dot_dimension_numbers<[1], [1], [0], [0], [0, 0, 1, 0], [], []>} : vector<8x8xf32>, vector<8x8xf32>, vector<8x8xf32> -> vector<8x8xf32>
    %378 = vector.extract_strided_slice %366 {offsets = [0, 24], sizes = [8, 8], strides = [1, 1]} : vector<8x32xf32> to vector<8x8xf32>
    %379 = vector.extract_strided_slice %367 {offsets = [0, 24], sizes = [8, 8], strides = [1, 1]} : vector<8x32xf32> to vector<8x8xf32>
    %cst_136 = arith.constant dense<0.000000e+00> : vector<8x8xf32>
    %380 = tpu.matmul %378, %379, %cst_136 {dimension_numbers = #tpu.dot_dimension_numbers<[1], [1], [0], [0], [0, 0, 1, 0], [], []>} : vector<8x8xf32>, vector<8x8xf32>, vector<8x8xf32> -> vector<8x8xf32>
    %381 = arith.maximumf %371, %374 : vector<8x8xf32>
    %382 = arith.maximumf %381, %377 : vector<8x8xf32>
    %383 = arith.maximumf %382, %380 : vector<8x8xf32>
    %384 = arith.subf %371, %383 : vector<8x8xf32>
    %385 = math.exp %384 : vector<8x8xf32>
    %386 = arith.subf %374, %383 : vector<8x8xf32>
    %387 = math.exp %386 : vector<8x8xf32>
    %388 = arith.subf %377, %383 : vector<8x8xf32>
    %389 = math.exp %388 : vector<8x8xf32>
    %390 = arith.subf %380, %383 : vector<8x8xf32>
    %391 = math.exp %390 : vector<8x8xf32>
    %392 = arith.addf %385, %387 : vector<8x8xf32>
    %393 = arith.addf %392, %389 : vector<8x8xf32>
    %394 = arith.addf %393, %391 : vector<8x8xf32>
    %395 = tpu.reciprocal %394 : vector<8x8xf32> -> vector<8x8xf32>
    %396 = arith.mulf %385, %395 : vector<8x8xf32>
    %397 = vector.extract_strided_slice %368 {offsets = [0, 0], sizes = [8, 8], strides = [1, 1]} : vector<8x32xf32> to vector<8x8xf32>
    %cst_137 = arith.constant dense<0.000000e+00> : vector<8x8xf32>
    %398 = tpu.matmul %396, %397, %cst_137 {dimension_numbers = #tpu.dot_dimension_numbers<[1], [0], [0], [1], [0, 0, 1, 1], [], []>} : vector<8x8xf32>, vector<8x8xf32>, vector<8x8xf32> -> vector<8x8xf32>
    %399 = vector.extract_strided_slice %2 {offsets = [0, 0], sizes = [8, 32], strides = [1, 1]} : vector<32x32xf32> to vector<8x32xf32>
    %cst_138 = arith.constant dense<0.000000e+00> : vector<8x32xf32>
    %400 = tpu.matmul %398, %399, %cst_138 {dimension_numbers = #tpu.dot_dimension_numbers<[1], [0], [0], [1], [0, 0, 1, 1], [], []>} : vector<8x8xf32>, vector<8x32xf32>, vector<8x32xf32> -> vector<8x32xf32>
    %401 = arith.mulf %387, %395 : vector<8x8xf32>
    %402 = vector.extract_strided_slice %368 {offsets = [0, 8], sizes = [8, 8], strides = [1, 1]} : vector<8x32xf32> to vector<8x8xf32>
    %cst_139 = arith.constant dense<0.000000e+00> : vector<8x8xf32>
    %403 = tpu.matmul %401, %402, %cst_139 {dimension_numbers = #tpu.dot_dimension_numbers<[1], [0], [0], [1], [0, 0, 1, 1], [], []>} : vector<8x8xf32>, vector<8x8xf32>, vector<8x8xf32> -> vector<8x8xf32>
    %404 = vector.extract_strided_slice %2 {offsets = [8, 0], sizes = [8, 32], strides = [1, 1]} : vector<32x32xf32> to vector<8x32xf32>
    %cst_140 = arith.constant dense<0.000000e+00> : vector<8x32xf32>
    %405 = tpu.matmul %403, %404, %cst_140 {dimension_numbers = #tpu.dot_dimension_numbers<[1], [0], [0], [1], [0, 0, 1, 1], [], []>} : vector<8x8xf32>, vector<8x32xf32>, vector<8x32xf32> -> vector<8x32xf32>
    %406 = arith.addf %400, %405 : vector<8x32xf32>
    %407 = arith.mulf %389, %395 : vector<8x8xf32>
    %408 = vector.extract_strided_slice %368 {offsets = [0, 16], sizes = [8, 8], strides = [1, 1]} : vector<8x32xf32> to vector<8x8xf32>
    %cst_141 = arith.constant dense<0.000000e+00> : vector<8x8xf32>
    %409 = tpu.matmul %407, %408, %cst_141 {dimension_numbers = #tpu.dot_dimension_numbers<[1], [0], [0], [1], [0, 0, 1, 1], [], []>} : vector<8x8xf32>, vector<8x8xf32>, vector<8x8xf32> -> vector<8x8xf32>
    %410 = vector.extract_strided_slice %2 {offsets = [16, 0], sizes = [8, 32], strides = [1, 1]} : vector<32x32xf32> to vector<8x32xf32>
    %cst_142 = arith.constant dense<0.000000e+00> : vector<8x32xf32>
    %411 = tpu.matmul %409, %410, %cst_142 {dimension_numbers = #tpu.dot_dimension_numbers<[1], [0], [0], [1], [0, 0, 1, 1], [], []>} : vector<8x8xf32>, vector<8x32xf32>, vector<8x32xf32> -> vector<8x32xf32>
    %412 = arith.addf %406, %411 : vector<8x32xf32>
    %413 = arith.mulf %391, %395 : vector<8x8xf32>
    %414 = vector.extract_strided_slice %368 {offsets = [0, 24], sizes = [8, 8], strides = [1, 1]} : vector<8x32xf32> to vector<8x8xf32>
    %cst_143 = arith.constant dense<0.000000e+00> : vector<8x8xf32>
    %415 = tpu.matmul %413, %414, %cst_143 {dimension_numbers = #tpu.dot_dimension_numbers<[1], [0], [0], [1], [0, 0, 1, 1], [], []>} : vector<8x8xf32>, vector<8x8xf32>, vector<8x8xf32> -> vector<8x8xf32>
    %416 = vector.extract_strided_slice %2 {offsets = [24, 0], sizes = [8, 32], strides = [1, 1]} : vector<32x32xf32> to vector<8x32xf32>
    %cst_144 = arith.constant dense<0.000000e+00> : vector<8x32xf32>
    %417 = tpu.matmul %415, %416, %cst_144 {dimension_numbers = #tpu.dot_dimension_numbers<[1], [0], [0], [1], [0, 0, 1, 1], [], []>} : vector<8x8xf32>, vector<8x32xf32>, vector<8x32xf32> -> vector<8x32xf32>
    %418 = arith.addf %412, %417 : vector<8x32xf32>
    %419 = vector.broadcast %3 : vector<1x32xf32> to vector<8x32xf32>
    %420 = arith.addf %418, %419 : vector<8x32xf32>
    %421 = arith.addf %358, %420 : vector<8x32xf32>
    %cst_145 = arith.constant dense<0.000000e+00> : vector<8xf32>
    %422 = vector.multi_reduction <add>, %421, %cst_145 [1] : vector<8x32xf32> to vector<8xf32>
    %423 = vector.shape_cast %422 : vector<8xf32> to vector<8x1xf32>
    %cst_146 = arith.constant 3.200000e+01 : f32
    %424 = vector.broadcast %cst_146 : f32 to vector<8x1xf32>
    %425 = arith.divf %423, %424 : vector<8x1xf32>
    %426 = vector.broadcast %425 : vector<8x1xf32> to vector<8x32xf32>
    %427 = arith.subf %421, %426 : vector<8x32xf32>
    %428 = arith.mulf %427, %427 : vector<8x32xf32>
    %cst_147 = arith.constant dense<0.000000e+00> : vector<8xf32>
    %429 = vector.multi_reduction <add>, %428, %cst_147 [1] : vector<8x32xf32> to vector<8xf32>
    %430 = vector.shape_cast %429 : vector<8xf32> to vector<8x1xf32>
    %cst_148 = arith.constant 3.200000e+01 : f32
    %431 = vector.broadcast %cst_148 : f32 to vector<8x1xf32>
    %432 = arith.divf %430, %431 : vector<8x1xf32>
    %433 = vector.broadcast %425 : vector<8x1xf32> to vector<8x32xf32>
    %434 = arith.subf %421, %433 : vector<8x32xf32>
    %cst_149 = arith.constant 9.99999974E-6 : f32
    %435 = vector.broadcast %cst_149 : f32 to vector<8x1xf32>
    %436 = arith.addf %432, %435 : vector<8x1xf32>
    %437 = math.rsqrt %436 : vector<8x1xf32>
    %438 = vector.broadcast %437 : vector<8x1xf32> to vector<8x32xf32>
    %439 = arith.mulf %434, %438 : vector<8x32xf32>
    %440 = vector.broadcast %4 : vector<1x32xf32> to vector<8x32xf32>
    %441 = arith.mulf %439, %440 : vector<8x32xf32>
    %442 = vector.broadcast %5 : vector<1x32xf32> to vector<8x32xf32>
    %443 = arith.addf %441, %442 : vector<8x32xf32>
    %cst_150 = arith.constant dense<0.000000e+00> : vector<8x64xf32>
    %444 = tpu.matmul %443, %6, %cst_150 {dimension_numbers = #tpu.dot_dimension_numbers<[1], [0], [0], [1], [0, 0, 1, 1], [], []>} : vector<8x32xf32>, vector<32x64xf32>, vector<8x64xf32> -> vector<8x64xf32>
    %445 = vector.broadcast %7 : vector<1x64xf32> to vector<8x64xf32>
    %446 = arith.addf %444, %445 : vector<8x64xf32>
    %cst_151 = arith.constant 0.000000e+00 : f32
    %447 = vector.broadcast %cst_151 : f32 to vector<8x64xf32>
    %448 = arith.maximumf %446, %447 : vector<8x64xf32>
    %cst_152 = arith.constant dense<0.000000e+00> : vector<8x32xf32>
    %449 = tpu.matmul %448, %8, %cst_152 {dimension_numbers = #tpu.dot_dimension_numbers<[1], [0], [0], [1], [0, 0, 1, 1], [], []>} : vector<8x64xf32>, vector<64x32xf32>, vector<8x32xf32> -> vector<8x32xf32>
    %450 = vector.broadcast %9 : vector<1x32xf32> to vector<8x32xf32>
    %451 = arith.addf %449, %450 : vector<8x32xf32>
    %452 = arith.addf %443, %451 : vector<8x32xf32>
    %cst_153 = arith.constant dense<0.000000e+00> : vector<8xf32>
    %453 = vector.multi_reduction <add>, %452, %cst_153 [1] : vector<8x32xf32> to vector<8xf32>
    %454 = vector.shape_cast %453 : vector<8xf32> to vector<8x1xf32>
    %cst_154 = arith.constant 3.200000e+01 : f32
    %455 = vector.broadcast %cst_154 : f32 to vector<8x1xf32>
    %456 = arith.divf %454, %455 : vector<8x1xf32>
    %457 = vector.broadcast %456 : vector<8x1xf32> to vector<8x32xf32>
    %458 = arith.subf %452, %457 : vector<8x32xf32>
    %459 = arith.mulf %458, %458 : vector<8x32xf32>
    %cst_155 = arith.constant dense<0.000000e+00> : vector<8xf32>
    %460 = vector.multi_reduction <add>, %459, %cst_155 [1] : vector<8x32xf32> to vector<8xf32>
    %461 = vector.shape_cast %460 : vector<8xf32> to vector<8x1xf32>
    %cst_156 = arith.constant 3.200000e+01 : f32
    %462 = vector.broadcast %cst_156 : f32 to vector<8x1xf32>
    %463 = arith.divf %461, %462 : vector<8x1xf32>
    %464 = vector.broadcast %456 : vector<8x1xf32> to vector<8x32xf32>
    %465 = arith.subf %452, %464 : vector<8x32xf32>
    %cst_157 = arith.constant 9.99999974E-6 : f32
    %466 = vector.broadcast %cst_157 : f32 to vector<8x1xf32>
    %467 = arith.addf %463, %466 : vector<8x1xf32>
    %468 = math.rsqrt %467 : vector<8x1xf32>
    %469 = vector.broadcast %468 : vector<8x1xf32> to vector<8x32xf32>
    %470 = arith.mulf %465, %469 : vector<8x32xf32>
    %471 = vector.broadcast %10 : vector<1x32xf32> to vector<8x32xf32>
    %472 = arith.mulf %470, %471 : vector<8x32xf32>
    %473 = vector.broadcast %11 : vector<1x32xf32> to vector<8x32xf32>
    %474 = arith.addf %472, %473 : vector<8x32xf32>
    %cst_158 = arith.constant dense<0.000000e+00> : vector<8x96xf32>
    %475 = tpu.matmul %360, %12, %cst_158 {dimension_numbers = #tpu.dot_dimension_numbers<[1], [0], [0], [1], [0, 0, 1, 1], [], []>} : vector<8x32xf32>, vector<32x96xf32>, vector<8x96xf32> -> vector<8x96xf32>
    %476 = vector.broadcast %13 : vector<1x96xf32> to vector<8x96xf32>
    %477 = arith.addf %475, %476 : vector<8x96xf32>
    %478 = vector.extract_strided_slice %477 {offsets = [0, 0], sizes = [8, 32], strides = [1, 1]} : vector<8x96xf32> to vector<8x32xf32>
    %cst_159 = arith.constant 0.353553385 : f32
    %479 = vector.broadcast %cst_159 : f32 to vector<8x32xf32>
    %480 = arith.mulf %478, %479 : vector<8x32xf32>
    %481 = vector.extract_strided_slice %477 {offsets = [0, 32], sizes = [8, 32], strides = [1, 1]} : vector<8x96xf32> to vector<8x32xf32>
    %482 = vector.extract_strided_slice %477 {offsets = [0, 64], sizes = [8, 32], strides = [1, 1]} : vector<8x96xf32> to vector<8x32xf32>
    %483 = vector.extract_strided_slice %480 {offsets = [0, 0], sizes = [8, 8], strides = [1, 1]} : vector<8x32xf32> to vector<8x8xf32>
    %484 = vector.extract_strided_slice %481 {offsets = [0, 0], sizes = [8, 8], strides = [1, 1]} : vector<8x32xf32> to vector<8x8xf32>
    %cst_160 = arith.constant dense<0.000000e+00> : vector<8x8xf32>
    %485 = tpu.matmul %483, %484, %cst_160 {dimension_numbers = #tpu.dot_dimension_numbers<[1], [1], [0], [0], [0, 0, 1, 0], [], []>} : vector<8x8xf32>, vector<8x8xf32>, vector<8x8xf32> -> vector<8x8xf32>
    %486 = vector.extract_strided_slice %480 {offsets = [0, 8], sizes = [8, 8], strides = [1, 1]} : vector<8x32xf32> to vector<8x8xf32>
    %487 = vector.extract_strided_slice %481 {offsets = [0, 8], sizes = [8, 8], strides = [1, 1]} : vector<8x32xf32> to vector<8x8xf32>
    %cst_161 = arith.constant dense<0.000000e+00> : vector<8x8xf32>
    %488 = tpu.matmul %486, %487, %cst_161 {dimension_numbers = #tpu.dot_dimension_numbers<[1], [1], [0], [0], [0, 0, 1, 0], [], []>} : vector<8x8xf32>, vector<8x8xf32>, vector<8x8xf32> -> vector<8x8xf32>
    %489 = vector.extract_strided_slice %480 {offsets = [0, 16], sizes = [8, 8], strides = [1, 1]} : vector<8x32xf32> to vector<8x8xf32>
    %490 = vector.extract_strided_slice %481 {offsets = [0, 16], sizes = [8, 8], strides = [1, 1]} : vector<8x32xf32> to vector<8x8xf32>
    %cst_162 = arith.constant dense<0.000000e+00> : vector<8x8xf32>
    %491 = tpu.matmul %489, %490, %cst_162 {dimension_numbers = #tpu.dot_dimension_numbers<[1], [1], [0], [0], [0, 0, 1, 0], [], []>} : vector<8x8xf32>, vector<8x8xf32>, vector<8x8xf32> -> vector<8x8xf32>
    %492 = vector.extract_strided_slice %480 {offsets = [0, 24], sizes = [8, 8], strides = [1, 1]} : vector<8x32xf32> to vector<8x8xf32>
    %493 = vector.extract_strided_slice %481 {offsets = [0, 24], sizes = [8, 8], strides = [1, 1]} : vector<8x32xf32> to vector<8x8xf32>
    %cst_163 = arith.constant dense<0.000000e+00> : vector<8x8xf32>
    %494 = tpu.matmul %492, %493, %cst_163 {dimension_numbers = #tpu.dot_dimension_numbers<[1], [1], [0], [0], [0, 0, 1, 0], [], []>} : vector<8x8xf32>, vector<8x8xf32>, vector<8x8xf32> -> vector<8x8xf32>
    %495 = arith.maximumf %485, %488 : vector<8x8xf32>
    %496 = arith.maximumf %495, %491 : vector<8x8xf32>
    %497 = arith.maximumf %496, %494 : vector<8x8xf32>
    %498 = arith.subf %485, %497 : vector<8x8xf32>
    %499 = math.exp %498 : vector<8x8xf32>
    %500 = arith.subf %488, %497 : vector<8x8xf32>
    %501 = math.exp %500 : vector<8x8xf32>
    %502 = arith.subf %491, %497 : vector<8x8xf32>
    %503 = math.exp %502 : vector<8x8xf32>
    %504 = arith.subf %494, %497 : vector<8x8xf32>
    %505 = math.exp %504 : vector<8x8xf32>
    %506 = arith.addf %499, %501 : vector<8x8xf32>
    %507 = arith.addf %506, %503 : vector<8x8xf32>
    %508 = arith.addf %507, %505 : vector<8x8xf32>
    %509 = tpu.reciprocal %508 : vector<8x8xf32> -> vector<8x8xf32>
    %510 = arith.mulf %499, %509 : vector<8x8xf32>
    %511 = vector.extract_strided_slice %482 {offsets = [0, 0], sizes = [8, 8], strides = [1, 1]} : vector<8x32xf32> to vector<8x8xf32>
    %cst_164 = arith.constant dense<0.000000e+00> : vector<8x8xf32>
    %512 = tpu.matmul %510, %511, %cst_164 {dimension_numbers = #tpu.dot_dimension_numbers<[1], [0], [0], [1], [0, 0, 1, 1], [], []>} : vector<8x8xf32>, vector<8x8xf32>, vector<8x8xf32> -> vector<8x8xf32>
    %513 = vector.extract_strided_slice %14 {offsets = [0, 0], sizes = [8, 32], strides = [1, 1]} : vector<32x32xf32> to vector<8x32xf32>
    %cst_165 = arith.constant dense<0.000000e+00> : vector<8x32xf32>
    %514 = tpu.matmul %512, %513, %cst_165 {dimension_numbers = #tpu.dot_dimension_numbers<[1], [0], [0], [1], [0, 0, 1, 1], [], []>} : vector<8x8xf32>, vector<8x32xf32>, vector<8x32xf32> -> vector<8x32xf32>
    %515 = arith.mulf %501, %509 : vector<8x8xf32>
    %516 = vector.extract_strided_slice %482 {offsets = [0, 8], sizes = [8, 8], strides = [1, 1]} : vector<8x32xf32> to vector<8x8xf32>
    %cst_166 = arith.constant dense<0.000000e+00> : vector<8x8xf32>
    %517 = tpu.matmul %515, %516, %cst_166 {dimension_numbers = #tpu.dot_dimension_numbers<[1], [0], [0], [1], [0, 0, 1, 1], [], []>} : vector<8x8xf32>, vector<8x8xf32>, vector<8x8xf32> -> vector<8x8xf32>
    %518 = vector.extract_strided_slice %14 {offsets = [8, 0], sizes = [8, 32], strides = [1, 1]} : vector<32x32xf32> to vector<8x32xf32>
    %cst_167 = arith.constant dense<0.000000e+00> : vector<8x32xf32>
    %519 = tpu.matmul %517, %518, %cst_167 {dimension_numbers = #tpu.dot_dimension_numbers<[1], [0], [0], [1], [0, 0, 1, 1], [], []>} : vector<8x8xf32>, vector<8x32xf32>, vector<8x32xf32> -> vector<8x32xf32>
    %520 = arith.addf %514, %519 : vector<8x32xf32>
    %521 = arith.mulf %503, %509 : vector<8x8xf32>
    %522 = vector.extract_strided_slice %482 {offsets = [0, 16], sizes = [8, 8], strides = [1, 1]} : vector<8x32xf32> to vector<8x8xf32>
    %cst_168 = arith.constant dense<0.000000e+00> : vector<8x8xf32>
    %523 = tpu.matmul %521, %522, %cst_168 {dimension_numbers = #tpu.dot_dimension_numbers<[1], [0], [0], [1], [0, 0, 1, 1], [], []>} : vector<8x8xf32>, vector<8x8xf32>, vector<8x8xf32> -> vector<8x8xf32>
    %524 = vector.extract_strided_slice %14 {offsets = [16, 0], sizes = [8, 32], strides = [1, 1]} : vector<32x32xf32> to vector<8x32xf32>
    %cst_169 = arith.constant dense<0.000000e+00> : vector<8x32xf32>
    %525 = tpu.matmul %523, %524, %cst_169 {dimension_numbers = #tpu.dot_dimension_numbers<[1], [0], [0], [1], [0, 0, 1, 1], [], []>} : vector<8x8xf32>, vector<8x32xf32>, vector<8x32xf32> -> vector<8x32xf32>
    %526 = arith.addf %520, %525 : vector<8x32xf32>
    %527 = arith.mulf %505, %509 : vector<8x8xf32>
    %528 = vector.extract_strided_slice %482 {offsets = [0, 24], sizes = [8, 8], strides = [1, 1]} : vector<8x32xf32> to vector<8x8xf32>
    %cst_170 = arith.constant dense<0.000000e+00> : vector<8x8xf32>
    %529 = tpu.matmul %527, %528, %cst_170 {dimension_numbers = #tpu.dot_dimension_numbers<[1], [0], [0], [1], [0, 0, 1, 1], [], []>} : vector<8x8xf32>, vector<8x8xf32>, vector<8x8xf32> -> vector<8x8xf32>
    %530 = vector.extract_strided_slice %14 {offsets = [24, 0], sizes = [8, 32], strides = [1, 1]} : vector<32x32xf32> to vector<8x32xf32>
    %cst_171 = arith.constant dense<0.000000e+00> : vector<8x32xf32>
    %531 = tpu.matmul %529, %530, %cst_171 {dimension_numbers = #tpu.dot_dimension_numbers<[1], [0], [0], [1], [0, 0, 1, 1], [], []>} : vector<8x8xf32>, vector<8x32xf32>, vector<8x32xf32> -> vector<8x32xf32>
    %532 = arith.addf %526, %531 : vector<8x32xf32>
    %533 = vector.broadcast %15 : vector<1x32xf32> to vector<8x32xf32>
    %534 = arith.addf %532, %533 : vector<8x32xf32>
    %535 = arith.addf %360, %534 : vector<8x32xf32>
    %cst_172 = arith.constant dense<0.000000e+00> : vector<8xf32>
    %536 = vector.multi_reduction <add>, %535, %cst_172 [1] : vector<8x32xf32> to vector<8xf32>
    %537 = vector.shape_cast %536 : vector<8xf32> to vector<8x1xf32>
    %cst_173 = arith.constant 3.200000e+01 : f32
    %538 = vector.broadcast %cst_173 : f32 to vector<8x1xf32>
    %539 = arith.divf %537, %538 : vector<8x1xf32>
    %540 = vector.broadcast %539 : vector<8x1xf32> to vector<8x32xf32>
    %541 = arith.subf %535, %540 : vector<8x32xf32>
    %542 = arith.mulf %541, %541 : vector<8x32xf32>
    %cst_174 = arith.constant dense<0.000000e+00> : vector<8xf32>
    %543 = vector.multi_reduction <add>, %542, %cst_174 [1] : vector<8x32xf32> to vector<8xf32>
    %544 = vector.shape_cast %543 : vector<8xf32> to vector<8x1xf32>
    %cst_175 = arith.constant 3.200000e+01 : f32
    %545 = vector.broadcast %cst_175 : f32 to vector<8x1xf32>
    %546 = arith.divf %544, %545 : vector<8x1xf32>
    %547 = vector.broadcast %539 : vector<8x1xf32> to vector<8x32xf32>
    %548 = arith.subf %535, %547 : vector<8x32xf32>
    %cst_176 = arith.constant 9.99999974E-6 : f32
    %549 = vector.broadcast %cst_176 : f32 to vector<8x1xf32>
    %550 = arith.addf %546, %549 : vector<8x1xf32>
    %551 = math.rsqrt %550 : vector<8x1xf32>
    %552 = vector.broadcast %551 : vector<8x1xf32> to vector<8x32xf32>
    %553 = arith.mulf %548, %552 : vector<8x32xf32>
    %554 = vector.broadcast %16 : vector<1x32xf32> to vector<8x32xf32>
    %555 = arith.mulf %553, %554 : vector<8x32xf32>
    %556 = vector.broadcast %17 : vector<1x32xf32> to vector<8x32xf32>
    %557 = arith.addf %555, %556 : vector<8x32xf32>
    %cst_177 = arith.constant dense<0.000000e+00> : vector<8x32xf32>
    %558 = tpu.matmul %557, %18, %cst_177 {dimension_numbers = #tpu.dot_dimension_numbers<[1], [0], [0], [1], [0, 0, 1, 1], [], []>} : vector<8x32xf32>, vector<32x32xf32>, vector<8x32xf32> -> vector<8x32xf32>
    %559 = vector.broadcast %19 : vector<1x32xf32> to vector<8x32xf32>
    %560 = arith.addf %558, %559 : vector<8x32xf32>
    %cst_178 = arith.constant 0.353553385 : f32
    %561 = vector.broadcast %cst_178 : f32 to vector<8x32xf32>
    %562 = arith.mulf %560, %561 : vector<8x32xf32>
    %cst_179 = arith.constant dense<0.000000e+00> : vector<8x64xf32>
    %563 = tpu.matmul %474, %20, %cst_179 {dimension_numbers = #tpu.dot_dimension_numbers<[1], [0], [0], [1], [0, 0, 1, 1], [], []>} : vector<8x32xf32>, vector<32x64xf32>, vector<8x64xf32> -> vector<8x64xf32>
    %564 = vector.broadcast %21 : vector<1x64xf32> to vector<8x64xf32>
    %565 = arith.addf %563, %564 : vector<8x64xf32>
    %566 = vector.extract_strided_slice %565 {offsets = [0, 0], sizes = [8, 32], strides = [1, 1]} : vector<8x64xf32> to vector<8x32xf32>
    %567 = vector.extract_strided_slice %565 {offsets = [0, 32], sizes = [8, 32], strides = [1, 1]} : vector<8x64xf32> to vector<8x32xf32>
    %568 = vector.extract_strided_slice %562 {offsets = [0, 0], sizes = [8, 8], strides = [1, 1]} : vector<8x32xf32> to vector<8x8xf32>
    %569 = vector.extract_strided_slice %566 {offsets = [0, 0], sizes = [8, 8], strides = [1, 1]} : vector<8x32xf32> to vector<8x8xf32>
    %cst_180 = arith.constant dense<0.000000e+00> : vector<8x8xf32>
    %570 = tpu.matmul %568, %569, %cst_180 {dimension_numbers = #tpu.dot_dimension_numbers<[1], [1], [0], [0], [0, 0, 1, 0], [], []>} : vector<8x8xf32>, vector<8x8xf32>, vector<8x8xf32> -> vector<8x8xf32>
    %571 = vector.extract_strided_slice %562 {offsets = [0, 8], sizes = [8, 8], strides = [1, 1]} : vector<8x32xf32> to vector<8x8xf32>
    %572 = vector.extract_strided_slice %566 {offsets = [0, 8], sizes = [8, 8], strides = [1, 1]} : vector<8x32xf32> to vector<8x8xf32>
    %cst_181 = arith.constant dense<0.000000e+00> : vector<8x8xf32>
    %573 = tpu.matmul %571, %572, %cst_181 {dimension_numbers = #tpu.dot_dimension_numbers<[1], [1], [0], [0], [0, 0, 1, 0], [], []>} : vector<8x8xf32>, vector<8x8xf32>, vector<8x8xf32> -> vector<8x8xf32>
    %574 = vector.extract_strided_slice %562 {offsets = [0, 16], sizes = [8, 8], strides = [1, 1]} : vector<8x32xf32> to vector<8x8xf32>
    %575 = vector.extract_strided_slice %566 {offsets = [0, 16], sizes = [8, 8], strides = [1, 1]} : vector<8x32xf32> to vector<8x8xf32>
    %cst_182 = arith.constant dense<0.000000e+00> : vector<8x8xf32>
    %576 = tpu.matmul %574, %575, %cst_182 {dimension_numbers = #tpu.dot_dimension_numbers<[1], [1], [0], [0], [0, 0, 1, 0], [], []>} : vector<8x8xf32>, vector<8x8xf32>, vector<8x8xf32> -> vector<8x8xf32>
    %577 = vector.extract_strided_slice %562 {offsets = [0, 24], sizes = [8, 8], strides = [1, 1]} : vector<8x32xf32> to vector<8x8xf32>
    %578 = vector.extract_strided_slice %566 {offsets = [0, 24], sizes = [8, 8], strides = [1, 1]} : vector<8x32xf32> to vector<8x8xf32>
    %cst_183 = arith.constant dense<0.000000e+00> : vector<8x8xf32>
    %579 = tpu.matmul %577, %578, %cst_183 {dimension_numbers = #tpu.dot_dimension_numbers<[1], [1], [0], [0], [0, 0, 1, 0], [], []>} : vector<8x8xf32>, vector<8x8xf32>, vector<8x8xf32> -> vector<8x8xf32>
    %580 = arith.maximumf %570, %573 : vector<8x8xf32>
    %581 = arith.maximumf %580, %576 : vector<8x8xf32>
    %582 = arith.maximumf %581, %579 : vector<8x8xf32>
    %583 = arith.subf %570, %582 : vector<8x8xf32>
    %584 = math.exp %583 : vector<8x8xf32>
    %585 = arith.subf %573, %582 : vector<8x8xf32>
    %586 = math.exp %585 : vector<8x8xf32>
    %587 = arith.subf %576, %582 : vector<8x8xf32>
    %588 = math.exp %587 : vector<8x8xf32>
    %589 = arith.subf %579, %582 : vector<8x8xf32>
    %590 = math.exp %589 : vector<8x8xf32>
    %591 = arith.addf %584, %586 : vector<8x8xf32>
    %592 = arith.addf %591, %588 : vector<8x8xf32>
    %593 = arith.addf %592, %590 : vector<8x8xf32>
    %594 = tpu.reciprocal %593 : vector<8x8xf32> -> vector<8x8xf32>
    %595 = arith.mulf %584, %594 : vector<8x8xf32>
    %596 = vector.extract_strided_slice %567 {offsets = [0, 0], sizes = [8, 8], strides = [1, 1]} : vector<8x32xf32> to vector<8x8xf32>
    %cst_184 = arith.constant dense<0.000000e+00> : vector<8x8xf32>
    %597 = tpu.matmul %595, %596, %cst_184 {dimension_numbers = #tpu.dot_dimension_numbers<[1], [0], [0], [1], [0, 0, 1, 1], [], []>} : vector<8x8xf32>, vector<8x8xf32>, vector<8x8xf32> -> vector<8x8xf32>
    %598 = vector.extract_strided_slice %22 {offsets = [0, 0], sizes = [8, 32], strides = [1, 1]} : vector<32x32xf32> to vector<8x32xf32>
    %cst_185 = arith.constant dense<0.000000e+00> : vector<8x32xf32>
    %599 = tpu.matmul %597, %598, %cst_185 {dimension_numbers = #tpu.dot_dimension_numbers<[1], [0], [0], [1], [0, 0, 1, 1], [], []>} : vector<8x8xf32>, vector<8x32xf32>, vector<8x32xf32> -> vector<8x32xf32>
    %600 = arith.mulf %586, %594 : vector<8x8xf32>
    %601 = vector.extract_strided_slice %567 {offsets = [0, 8], sizes = [8, 8], strides = [1, 1]} : vector<8x32xf32> to vector<8x8xf32>
    %cst_186 = arith.constant dense<0.000000e+00> : vector<8x8xf32>
    %602 = tpu.matmul %600, %601, %cst_186 {dimension_numbers = #tpu.dot_dimension_numbers<[1], [0], [0], [1], [0, 0, 1, 1], [], []>} : vector<8x8xf32>, vector<8x8xf32>, vector<8x8xf32> -> vector<8x8xf32>
    %603 = vector.extract_strided_slice %22 {offsets = [8, 0], sizes = [8, 32], strides = [1, 1]} : vector<32x32xf32> to vector<8x32xf32>
    %cst_187 = arith.constant dense<0.000000e+00> : vector<8x32xf32>
    %604 = tpu.matmul %602, %603, %cst_187 {dimension_numbers = #tpu.dot_dimension_numbers<[1], [0], [0], [1], [0, 0, 1, 1], [], []>} : vector<8x8xf32>, vector<8x32xf32>, vector<8x32xf32> -> vector<8x32xf32>
    %605 = arith.addf %599, %604 : vector<8x32xf32>
    %606 = arith.mulf %588, %594 : vector<8x8xf32>
    %607 = vector.extract_strided_slice %567 {offsets = [0, 16], sizes = [8, 8], strides = [1, 1]} : vector<8x32xf32> to vector<8x8xf32>
    %cst_188 = arith.constant dense<0.000000e+00> : vector<8x8xf32>
    %608 = tpu.matmul %606, %607, %cst_188 {dimension_numbers = #tpu.dot_dimension_numbers<[1], [0], [0], [1], [0, 0, 1, 1], [], []>} : vector<8x8xf32>, vector<8x8xf32>, vector<8x8xf32> -> vector<8x8xf32>
    %609 = vector.extract_strided_slice %22 {offsets = [16, 0], sizes = [8, 32], strides = [1, 1]} : vector<32x32xf32> to vector<8x32xf32>
    %cst_189 = arith.constant dense<0.000000e+00> : vector<8x32xf32>
    %610 = tpu.matmul %608, %609, %cst_189 {dimension_numbers = #tpu.dot_dimension_numbers<[1], [0], [0], [1], [0, 0, 1, 1], [], []>} : vector<8x8xf32>, vector<8x32xf32>, vector<8x32xf32> -> vector<8x32xf32>
    %611 = arith.addf %605, %610 : vector<8x32xf32>
    %612 = arith.mulf %590, %594 : vector<8x8xf32>
    %613 = vector.extract_strided_slice %567 {offsets = [0, 24], sizes = [8, 8], strides = [1, 1]} : vector<8x32xf32> to vector<8x8xf32>
    %cst_190 = arith.constant dense<0.000000e+00> : vector<8x8xf32>
    %614 = tpu.matmul %612, %613, %cst_190 {dimension_numbers = #tpu.dot_dimension_numbers<[1], [0], [0], [1], [0, 0, 1, 1], [], []>} : vector<8x8xf32>, vector<8x8xf32>, vector<8x8xf32> -> vector<8x8xf32>
    %615 = vector.extract_strided_slice %22 {offsets = [24, 0], sizes = [8, 32], strides = [1, 1]} : vector<32x32xf32> to vector<8x32xf32>
    %cst_191 = arith.constant dense<0.000000e+00> : vector<8x32xf32>
    %616 = tpu.matmul %614, %615, %cst_191 {dimension_numbers = #tpu.dot_dimension_numbers<[1], [0], [0], [1], [0, 0, 1, 1], [], []>} : vector<8x8xf32>, vector<8x32xf32>, vector<8x32xf32> -> vector<8x32xf32>
    %617 = arith.addf %611, %616 : vector<8x32xf32>
    %618 = vector.broadcast %23 : vector<1x32xf32> to vector<8x32xf32>
    %619 = arith.addf %617, %618 : vector<8x32xf32>
    %620 = arith.addf %557, %619 : vector<8x32xf32>
    %cst_192 = arith.constant dense<0.000000e+00> : vector<8xf32>
    %621 = vector.multi_reduction <add>, %620, %cst_192 [1] : vector<8x32xf32> to vector<8xf32>
    %622 = vector.shape_cast %621 : vector<8xf32> to vector<8x1xf32>
    %cst_193 = arith.constant 3.200000e+01 : f32
    %623 = vector.broadcast %cst_193 : f32 to vector<8x1xf32>
    %624 = arith.divf %622, %623 : vector<8x1xf32>
    %625 = vector.broadcast %624 : vector<8x1xf32> to vector<8x32xf32>
    %626 = arith.subf %620, %625 : vector<8x32xf32>
    %627 = arith.mulf %626, %626 : vector<8x32xf32>
    %cst_194 = arith.constant dense<0.000000e+00> : vector<8xf32>
    %628 = vector.multi_reduction <add>, %627, %cst_194 [1] : vector<8x32xf32> to vector<8xf32>
    %629 = vector.shape_cast %628 : vector<8xf32> to vector<8x1xf32>
    %cst_195 = arith.constant 3.200000e+01 : f32
    %630 = vector.broadcast %cst_195 : f32 to vector<8x1xf32>
    %631 = arith.divf %629, %630 : vector<8x1xf32>
    %632 = vector.broadcast %624 : vector<8x1xf32> to vector<8x32xf32>
    %633 = arith.subf %620, %632 : vector<8x32xf32>
    %cst_196 = arith.constant 9.99999974E-6 : f32
    %634 = vector.broadcast %cst_196 : f32 to vector<8x1xf32>
    %635 = arith.addf %631, %634 : vector<8x1xf32>
    %636 = math.rsqrt %635 : vector<8x1xf32>
    %637 = vector.broadcast %636 : vector<8x1xf32> to vector<8x32xf32>
    %638 = arith.mulf %633, %637 : vector<8x32xf32>
    %639 = vector.broadcast %24 : vector<1x32xf32> to vector<8x32xf32>
    %640 = arith.mulf %638, %639 : vector<8x32xf32>
    %641 = vector.broadcast %25 : vector<1x32xf32> to vector<8x32xf32>
    %642 = arith.addf %640, %641 : vector<8x32xf32>
    %cst_197 = arith.constant dense<0.000000e+00> : vector<8x64xf32>
    %643 = tpu.matmul %642, %26, %cst_197 {dimension_numbers = #tpu.dot_dimension_numbers<[1], [0], [0], [1], [0, 0, 1, 1], [], []>} : vector<8x32xf32>, vector<32x64xf32>, vector<8x64xf32> -> vector<8x64xf32>
    %644 = vector.broadcast %27 : vector<1x64xf32> to vector<8x64xf32>
    %645 = arith.addf %643, %644 : vector<8x64xf32>
    %cst_198 = arith.constant 0.000000e+00 : f32
    %646 = vector.broadcast %cst_198 : f32 to vector<8x64xf32>
    %647 = arith.maximumf %645, %646 : vector<8x64xf32>
    %cst_199 = arith.constant dense<0.000000e+00> : vector<8x32xf32>
    %648 = tpu.matmul %647, %28, %cst_199 {dimension_numbers = #tpu.dot_dimension_numbers<[1], [0], [0], [1], [0, 0, 1, 1], [], []>} : vector<8x64xf32>, vector<64x32xf32>, vector<8x32xf32> -> vector<8x32xf32>
    %649 = vector.broadcast %29 : vector<1x32xf32> to vector<8x32xf32>
    %650 = arith.addf %648, %649 : vector<8x32xf32>
    %651 = arith.addf %642, %650 : vector<8x32xf32>
    %cst_200 = arith.constant dense<0.000000e+00> : vector<8xf32>
    %652 = vector.multi_reduction <add>, %651, %cst_200 [1] : vector<8x32xf32> to vector<8xf32>
    %653 = vector.shape_cast %652 : vector<8xf32> to vector<8x1xf32>
    %cst_201 = arith.constant 3.200000e+01 : f32
    %654 = vector.broadcast %cst_201 : f32 to vector<8x1xf32>
    %655 = arith.divf %653, %654 : vector<8x1xf32>
    %656 = vector.broadcast %655 : vector<8x1xf32> to vector<8x32xf32>
    %657 = arith.subf %651, %656 : vector<8x32xf32>
    %658 = arith.mulf %657, %657 : vector<8x32xf32>
    %cst_202 = arith.constant dense<0.000000e+00> : vector<8xf32>
    %659 = vector.multi_reduction <add>, %658, %cst_202 [1] : vector<8x32xf32> to vector<8xf32>
    %660 = vector.shape_cast %659 : vector<8xf32> to vector<8x1xf32>
    %cst_203 = arith.constant 3.200000e+01 : f32
    %661 = vector.broadcast %cst_203 : f32 to vector<8x1xf32>
    %662 = arith.divf %660, %661 : vector<8x1xf32>
    %663 = vector.broadcast %655 : vector<8x1xf32> to vector<8x32xf32>
    %664 = arith.subf %651, %663 : vector<8x32xf32>
    %cst_204 = arith.constant 9.99999974E-6 : f32
    %665 = vector.broadcast %cst_204 : f32 to vector<8x1xf32>
    %666 = arith.addf %662, %665 : vector<8x1xf32>
    %667 = math.rsqrt %666 : vector<8x1xf32>
    %668 = vector.broadcast %667 : vector<8x1xf32> to vector<8x32xf32>
    %669 = arith.mulf %664, %668 : vector<8x32xf32>
    %670 = vector.broadcast %30 : vector<1x32xf32> to vector<8x32xf32>
    %671 = arith.mulf %669, %670 : vector<8x32xf32>
    %672 = vector.broadcast %31 : vector<1x32xf32> to vector<8x32xf32>
    %673 = arith.addf %671, %672 : vector<8x32xf32>
    %cst_205 = arith.constant dense<0.000000e+00> : vector<8x16xf32>
    %674 = tpu.matmul %673, %32, %cst_205 {dimension_numbers = #tpu.dot_dimension_numbers<[1], [0], [0], [1], [0, 0, 1, 1], [], []>} : vector<8x32xf32>, vector<32x16xf32>, vector<8x16xf32> -> vector<8x16xf32>
    %675 = vector.broadcast %33 : vector<1x16xf32> to vector<8x16xf32>
    %676 = arith.addf %674, %675 : vector<8x16xf32>
    %c1_206 = arith.constant 1 : index
    %c0_207 = arith.constant 0 : index
    %c0_208 = arith.constant 0 : index
    %677 = vector.load %arg6[%c1_206, %c0_207, %c0_208] : memref<2x8x16xf32, #tpu.memory_space<vmem>>, vector<1x8x16xf32>
    %678 = vector.shape_cast %677 : vector<1x8x16xf32> to vector<8x16xf32>
    %679 = vector.shape_cast %676 : vector<8x16xf32> to vector<1x8x16xf32>
    tpu.vector_store %arg6[%c1_206, %c0_207, %c0_208], %679 {strides = array<i32>} : memref<2x8x16xf32, #tpu.memory_space<vmem>>, vector<1x8x16xf32>,
    return
  }
  func.func @transform_0(%arg0: i32) -> (i32, i32, i32) {
    %c0_i32 = arith.constant 0 : i32
    %c0_i32_0 = arith.constant 0 : i32
    %c0_i32_1 = arith.constant 0 : i32
    return %arg0, %c0_i32, %c0_i32_0 : i32, i32, i32
  }
  func.func @transform_1(%arg0: i32) -> (i32, i32, i32) {
    %c0_i32 = arith.constant 0 : i32
    %c0_i32_0 = arith.constant 0 : i32
    %c0_i32_1 = arith.constant 0 : i32
    return %arg0, %c0_i32, %c0_i32_0 : i32, i32, i32
  }
  func.func @transform_2(%arg0: i32) -> (i32, i32) {
    %c0_i32 = arith.constant 0 : i32
    %c0_i32_0 = arith.constant 0 : i32
    %c0_i32_1 = arith.constant 0 : i32
    return %c0_i32, %c0_i32_0 : i32, i32
  }
  func.func @transform_3(%arg0: i32) -> (i32, i32) {
    %c0_i32 = arith.constant 0 : i32
    %c0_i32_0 = arith.constant 0 : i32
    %c0_i32_1 = arith.constant 0 : i32
    return %c0_i32, %c0_i32_0 : i32, i32
  }
  func.func @transform_4(%arg0: i32) -> (i32, i32) {
    %c0_i32 = arith.constant 0 : i32
    %c0_i32_0 = arith.constant 0 : i32
    %c0_i32_1 = arith.constant 0 : i32
    return %c0_i32, %c0_i32_0 : i32, i32
  }
  func.func @transform_5(%arg0: i32) -> (i32, i32, i32) {
    %c0_i32 = arith.constant 0 : i32
    %c0_i32_0 = arith.constant 0 : i32
    %c0_i32_1 = arith.constant 0 : i32
    return %arg0, %c0_i32, %c0_i32_0 : i32, i32, i32
  }
}

</mosaic_0001>

<bundles_post_ra>
// kernel: tpu_custom_call.1
= control target key start
LH: loop header
LB: loop body
LE: loop exit
PB: predicated region body
PF: predicated region fallthrough
CT: control target
= control target key end

     0   :  { %10 = vsyncpa [#allocation3], 0  ;;  %s9950_s0 = inlined_call_operand.hbm [shape: f32[2,8,32], index: 0, kind: input, shape index: {}]   ;;  %s9951_s1 = inlined_call_operand.hbm [shape: f32[2,8,32], index: 1, kind: input, shape index: {}]   ;;  %s9952_s2 = inlined_call_operand.hbm [shape: f32[32,528], index: 2, kind: input, shape index: {}]   ;;  %s9953_s3 = inlined_call_operand.hbm [shape: f32[64,64], index: 3, kind: input, shape index: {}]   ;;  %s9954_s4 = inlined_call_operand.vmem [shape: f32[1,912], index: 4, kind: input, shape index: {}]   ;;  %s9955_s5 = inlined_call_operand.hbm [shape: f32[2,8,16], index: 5, kind: output, shape index: {}]  }
   0x1   :  { %11 = vsyncpa [#allocation6], 0 }
   0x2   :  { %12 = vsyncpa [#allocation9], 0 }
   0x3   :  { %13 = vsyncpa [#allocation4], 0  ;;  %s8876_s18 = smov [#allocation5]   ;;  %s8877_s20 = smov [#allocation2]  }
   0x4   :  { %s31_s19 = sshll.u32 %s8876_s18, 4  ;;  %s19_s21 = sshll.u32 %s8877_s20, 4  ;;  %s32_s19 = int_to_ptr.vmem [resolvable:$true] %s31_s19  ;;  %s8929_s21 = int_to_ptr.vmem [resolvable:$true] %s19_s21 }
   0x5   :  { %s8758_s24 = scalar_lea.hbm %s9951_s1, 256 }
   0x6   :  { %p8759_p0 = scmp.ne.s32.totalorder %s9951_s1, %s8758_s24  ;;  %p8762_p1 = scmp.lt.u32.totalorder %s8758_s24, %s9951_s1 }
   0x8   :  { %p8764_p2 = pnand %p8762_p1, %p8759_p0 }
   0xa   :  { %8767 = shalt.err (!%p8764_p2)
}
   0xb   :  { %s8768_s29 = scalar_lea.vmem %s32_s19, 256  ;;  %p8773_p4 = scmp.lt.s32.totalorder %s32_s19, %s32_s19 }
   0xc   :  { %p8769_p3 = scmp.ne.s32.totalorder %s32_s19, %s8768_s29  ;;  %p8774_p5 = scmp.lt.s32.totalorder %s8768_s29, %s8768_s29 }
   0xe   :  { %p8775_p6 = por %p8774_p5, %p8773_p4 }
  0x10   :  { %p8776_p7 = pnand %p8775_p6, %p8769_p3 }
  0x12   :  { %8779 = shalt.err (!%p8776_p7)
}
  0x13   :  { %s8878_s30 = smov 128   ;;  %s8879_s6 = smov 8  }
  0x14   :  { %37 = dma.hbm_to_vmem [thread:$0]  %s9951_s1, 256, %s32_s19, [#allocation6], %s8878_s30, %s8878_s30, %s8879_s6  }
  0x15   :  { %s8780_s11 = scalar_lea.hbm %s9950_s0, 256 }
  0x16   :  { %p8781_p8 = scmp.ne.s32.totalorder %s9950_s0, %s8780_s11  ;;  %p8784_p9 = scmp.lt.u32.totalorder %s8780_s11, %s9950_s0 }
  0x18   :  { %p8786_p10 = pnand %p8784_p9, %p8781_p8 }
  0x1a   :  { %8789 = shalt.err (!%p8786_p10)
}
  0x1b   :  { %s8790_s16 = scalar_lea.vmem %s8929_s21, 256  ;;  %p8795_p12 = scmp.lt.s32.totalorder %s8929_s21, %s8929_s21 }
  0x1c   :  { %p8791_p11 = scmp.ne.s32.totalorder %s8929_s21, %s8790_s16  ;;  %p8796_p13 = scmp.lt.s32.totalorder %s8790_s16, %s8790_s16 }
  0x1e   :  { %p8797_p0 = por %p8796_p13, %p8795_p12 }
  0x20   :  { %p8798_p1 = pnand %p8797_p0, %p8791_p11 }
  0x22   :  { %8801 = shalt.err (!%p8798_p1)
}
  0x23   :  { %25 = dma.hbm_to_vmem [thread:$0]  %s9950_s0, 256, %s8929_s21, [#allocation3], %s8878_s30, %s8878_s30, %s8879_s6  }
  0x24   :  { %s8880_s18 = smov [#allocation7]   ;;  %s8802_s23 = scalar_lea.hbm %s9952_s2, 2560 }
  0x25   :  { %s43_s19 = sshll.u32 %s8880_s18, 4  ;;  %p8803_p2 = scmp.ne.s32.totalorder %s9952_s2, %s8802_s23  ;;  %s44_s19 = int_to_ptr.vmem [resolvable:$true] %s43_s19 }
  0x26   :  { %p8806_p3 = scmp.lt.u32.totalorder %s8802_s23, %s9952_s2 }
  0x28   :  { %p8808_p4 = pnand %p8806_p3, %p8803_p2 }
  0x2a   :  { %8811 = shalt.err (!%p8808_p4)
}
  0x2b   :  { %s8812_s28 = scalar_lea.vmem %s44_s19, 2560  ;;  %p8817_p6 = scmp.lt.s32.totalorder %s44_s19, %s44_s19 }
  0x2c   :  { %p8813_p5 = scmp.ne.s32.totalorder %s44_s19, %s8812_s28  ;;  %p8818_p7 = scmp.lt.s32.totalorder %s8812_s28, %s8812_s28 }
  0x2e   :  { %p8819_p8 = por %p8818_p7, %p8817_p6 }
  0x30   :  { %p8820_p9 = pnand %p8819_p8, %p8813_p5 }
  0x32   :  { %8823 = shalt.err (!%p8820_p9)
}
  0x33   :  { %s8881_s0 = smov 640   ;;  %s8882_s21 = smov 40  }
  0x34   :  { %49 = dma.hbm_to_vmem [thread:$0]  %s9952_s2, 2560, %s44_s19, [#allocation6], %s8881_s0, %s8881_s0, %s8882_s21  }
  0x35   :  { %s8883_s8 = smov [#allocation8]   ;;  %s8824_s12 = scalar_lea.hbm %s9953_s3, 1024 }
  0x36   :  { %s55_s9 = sshll.u32 %s8883_s8, 4  ;;  %p8825_p10 = scmp.ne.s32.totalorder %s9953_s3, %s8824_s12  ;;  %s56_s9 = int_to_ptr.vmem [resolvable:$true] %s55_s9 }
  0x37   :  { %p8828_p11 = scmp.lt.u32.totalorder %s8824_s12, %s9953_s3 }
  0x39   :  { %p8830_p12 = pnand %p8828_p11, %p8825_p10 }
  0x3b   :  { %8833 = shalt.err (!%p8830_p12)
}
  0x3c   :  { %s8834_s1 = scalar_lea.vmem %s56_s9, 1024  ;;  %p8839_p0 = scmp.lt.s32.totalorder %s56_s9, %s56_s9 }
  0x3d   :  { %p8835_p13 = scmp.ne.s32.totalorder %s56_s9, %s8834_s1  ;;  %p8840_p1 = scmp.lt.s32.totalorder %s8834_s1, %s8834_s1 }
  0x3f   :  { %p8841_p2 = por %p8840_p1, %p8839_p0 }
  0x41   :  { %p8842_p3 = pnand %p8841_p2, %p8835_p13 }
  0x43   :  { %8845 = shalt.err (!%p8842_p3)
}
  0x44   :  { %61 = dma.hbm_to_vmem [thread:$0]  %s9953_s3, 1024, %s56_s9, [#allocation9], %s8878_s30, %s8878_s30, %s8879_s6  }
  0x45   :  { %8868 = dma.done.wait [#allocation3], 256  }
  0x46   :  { %8869 = vsyncadd [#allocation3], 4294967040 }
  0x47   :  { %8870 = dma.done.wait [#allocation6], 2816  }
  0x48   :  { %8871 = vsyncadd [#allocation6], 4294964480 }
  0x49   :  { %8872 = dma.done.wait [#allocation9], 1024  }
  0x4a   :  { %8873 = vsyncadd [#allocation9], 4294966272  ;;  %v9958_v0 = vmov 0.0|0.0   ;;  %vm8885_vm0 = vmmov 0   ;;  %v9961_v1 = vmov 0.0   ;;  %v9000_v2 = vld [vmem:[#allocation7 + $0x28] sm:$0xff] }
  0x4b   :  { %8443 = vmatprep.subr.bf16.mxu0 %v9958_v0  ;;  %7861 = vmatprep.mubr.msk.f32.mxu0 %vm8885_vm0, %v9961_v1  ;;  %v9002_v3 = vld [vmem:[#allocation7] sm:$0xff]  ;;  %v9004_v4 = vld [vmem:[#allocation7 + $0x50] sm:$0xff]  ;;  %v9006_v5 = vld [vmem:[#allocation7 + $0x78] sm:$0xff]  ;;  %vm122_vm1 = vcmask 261120   ;;  %s8887_s19 = smov 80   ;;  %s8888_s20 = smov 96  }
  0x4c   :  { %7864 = vmatprep.subr.mxu1 %v9961_v1  ;;  %7866 = vmatprep.mubr.msk.f32.mxu1 %vm8885_vm0, %v9961_v1  ;;  %v9010_v6 = vpack.c.bf16 %v9000_v2, %v9002_v3  ;;  %v9015_v7 = vpack.c.bf16 %v9006_v5, %v9004_v4  ;;  %v9019_v8 = vld [vmem:[#allocation2] sm:$0xff]  ;;  %s8889_s22 = smov 88   ;;  %s8890_s23 = smov 120   ;;  %vm200_vm2 = vcmask 64512   ;;  %v9075_v55 = vld [vmem:[#allocation7 + $0x18] sm:$0xff]  ;;  %v9093_v62 = vld [vmem:[#allocation7 + $0x68] sm:$0xff] }
  0x4d   :  { %v9029_v9 = vld [vmem:[%s9954_s4] ss:$0 sm:$0xff]  ;;  %s8891_s24 = smov 72   ;;  %s8892_s25 = smov 112   ;;  %v9097_v63 = vld [vmem:[#allocation7 + $0x30] sm:$0xff]  ;;  %vm1244_vm3 = vcmask 523264  }
  0x4e   :  { %8445 = vmatpush3.bf16.msra.mxu0 %v9010_v6  ;;  %s8893_s26 = smov 104   ;;  %s8894_s27 = smov 56   ;;  %v9065_v52 = vld [vmem:[#allocation7 + $0x40] sm:$0xff]  ;;  %vm3912_vm4 = vcmask 130048  }
  0x4f   :  { %8446 = vmatprep.subr.bf16.mxu0 %v9958_v0  ;;  %s8895_s28 = smov 64   ;;  %s8896_s0 = smov 48  }
  0x50   :  { %s8897_s29 = smov 32  }
  0x52   :  { %8448 = vmatpush3.bf16.msra.mxu0 %v9015_v7 }
  0x53   :  { %7874 = vmatprep.subr.mxu0 %v9961_v1 }
  0x55   :  { %7862 = vmatmul.mubr.msk.f32.vlgmr.msra.gmra.mrb[0].mxu0 %vm122_vm1, %v9019_v8 }
  0x56   :  { %7876 = vmatprep.mubr.msk.f32.mxu0 %vm8885_vm0, %v9961_v1 }
 0x128   :  { %v192_v10 = vpop.f32.mrb[0].mxu0 }
 0x129   :  { %v193_v11 = vadd.f32 %v9029_v9, %v192_v10  ;;  %v7863_v12 = vpop.f32.mrb[1].mxu0  ;;  %v8603_v10 = vpack.i.bf16 %v9097_v63, %v9000_v2 }
 0x12b   :  { %356 = vrot.lane.b32.xlu1 %v193_v11, %s8887_s19  ;;  %198 = vrot.lane.b32.xlu0 %v193_v11, %s8888_s20  ;;  %v196_v13 = vmul.f32 0.35355338, %v193_v11 }
 0x12f   :  { %278 = vrot.lane.b32.xlu0 %v193_v11, %s8889_s22  ;;  %276 = vrot.lane.b32.xlu1 %v196_v13, %s8890_s23 }
 0x133   :  { %434 = vrot.lane.b32.xlu0 %v193_v11, %s8891_s24  ;;  %354 = vrot.lane.b32.xlu1 %v196_v13, %s8892_s25 }
 0x137   :  { %432 = vrot.lane.b32.xlu0 %v196_v13, %s8893_s26  ;;  %607 = vrot.lane.b32.xlu1 %v193_v11, %s8894_s27 }
 0x13b   :  { %530 = vrot.lane.b32.xlu0 %v193_v11, %s8895_s28  ;;  %830 = vrot.lane.b32.xlu1 %v193_v11, %s8896_s0 }
 0x13f   :  { %981 = vrot.lane.b32.xlu0 %v193_v11, %s8882_s21  ;;  %1131 = vrot.lane.b32.xlu1 %v9029_v9, %s8897_s29 }
 0x143   :  { %8604 = vrot.lane.b32.xlu1 %v8603_v10, %s8897_s29 }
 0x19d   :  { %v357_v14 = vpop.permute.xlu1 %356  ;;  %v199_v15 = vpop.permute.xlu0 %198 }
 0x19e   :  { %7865 = vmatpush3.xpose.msk.msra.mxu1 %vm200_vm2, %v199_v15  ;;  %7875 = vmatpush3.xpose.msk.msra.mxu0 %vm200_vm2, %v357_v14 }
 0x19f   :  { %7869 = vmatprep.subr.mxu1 %v9961_v1  ;;  %7884 = vmatprep.subr.mxu0 %v9961_v1 }
 0x1a1   :  { %v279_v16 = vpop.permute.xlu0 %278  ;;  %v277_v17 = vpop.permute.xlu1 %276  ;;  %7867 = vmatmul.mubr.msk.f32.vlgmr.msra.gmra.mrb[0].mxu1 %vm200_vm2, %v196_v13 }
 0x1a2   :  { %7870 = vmatpush3.xpose.msk.msra.mxu1 %vm200_vm2, %v279_v16  ;;  %7871 = vmatprep.mubr.msk.f32.mxu1 %vm8885_vm0, %v9961_v1  ;;  %v9104_v16 = vld [vmem:[#allocation7 + $0x90] sm:$0xff] }
 0x1a3   :  { %7879 = vmatprep.subr.mxu1 %v9961_v1 }
 0x1a5   :  { %v435_v18 = vpop.permute.xlu0 %434  ;;  %v355_v19 = vpop.permute.xlu1 %354  ;;  %7872 = vmatmul.mubr.msk.f32.vlgmr.msra.gmra.mrb[2].mxu1 %vm200_vm2, %v277_v17 }
 0x1a6   :  { %7877 = vmatmul.mubr.msk.f32.vlgmr.msra.gmra.mrb[2].mxu0 %vm200_vm2, %v355_v19  ;;  %7880 = vmatpush3.xpose.msk.msra.mxu1 %vm200_vm2, %v435_v18 }
 0x1a7   :  { %7881 = vmatprep.mubr.msk.f32.mxu1 %vm8885_vm0, %v9961_v1  ;;  %7889 = vmatprep.subr.mxu1 %v9961_v1 }
 0x1a8   :  { %7886 = vmatprep.mubr.msk.f32.mxu0 %vm8885_vm0, %v9961_v1 }
 0x1a9   :  { %v433_v20 = vpop.permute.xlu0 %432  ;;  %v608_v21 = vpop.permute.xlu1 %607 }
 0x1aa   :  { %7882 = vmatmul.mubr.msk.f32.vlgmr.msra.gmra.mrb[4].mxu1 %vm200_vm2, %v433_v20 }
 0x1ab   :  { %7890 = vmatpush3.msra.mxu1 %v608_v21  ;;  %7891 = vmatprep.mubr.msk.f32.mxu1 %vm8885_vm0, %v9961_v1 }
 0x1ac   :  { %7899 = vmatprep.subr.mxu1 %v9961_v1 }
 0x1ad   :  { %v531_v22 = vpop.permute.xlu0 %530  ;;  %v831_v56 = vpop.permute.xlu1 %830 }
 0x1ae   :  { %7885 = vmatpush3.msra.mxu0 %v531_v22 }
 0x1af   :  { %7894 = vmatprep.subr.mxu0 %v9961_v1 }
 0x1b1   :  { %v982_v61 = vpop.permute.xlu0 %981 }
 0x274   :  { %v272_v23 = vpop.f32.mrb[0].mxu1 }
 0x275   :  { %v7868_v24 = vpop.f32.mrb[1].mxu1 }
 0x278   :  { %v350_v25 = vpop.f32.mrb[2].mxu1 }
 0x279   :  { %v510_v26 = vmax.f32 %v272_v23, %v350_v25  ;;  %v7873_v27 = vpop.f32.mrb[3].mxu1  ;;  %v428_v28 = vpop.f32.mrb[2].mxu0 }
 0x27a   :  { %v7878_v29 = vpop.f32.mrb[3].mxu0 }
 0x27b   :  { %v511_v30 = vmax.f32 %v510_v26, %v428_v28  ;;  %v9119_v29 = vld [vmem:[#allocation7 + $0x8] sm:$0xff] }
 0x27d   :  { %v506_v31 = vpop.f32.mrb[4].mxu1 }
 0x27e   :  { %v512_v32 = vmax.f32 %v511_v30, %v506_v31  ;;  %v7883_v33 = vpop.f32.mrb[5].mxu1  ;;  %v8598_v30 = vpack.i.bf16 %v9119_v29, %v9002_v3 }
 0x280   :  { %v513_v34 = vsub.f32 %v272_v23, %v512_v32  ;;  %v516_v35 = vsub.f32 %v350_v25, %v512_v32  ;;  %v519_v36 = vsub.f32 %v428_v28, %v512_v32  ;;  %v522_v37 = vsub.f32 %v506_v31, %v512_v32  ;;  %v9114_v23 = vpop.permute.xlu1 %1131  ;;  %v9127_v31 = vld [vmem:[%s9954_s4 + $0x1] ss:$0 sm:$0xff] }
 0x281   :  { %v9129_v32 = vld [vmem:[#allocation7 + $0x80] sm:$0xff] }
 0x282   :  { %v514_v38 = vmul.f32 1.442695, %v513_v34  ;;  %v517_v39 = vmul.f32 1.442695, %v516_v35  ;;  %v520_v40 = vmul.f32 1.442695, %v519_v36 }
 0x283   :  { %v523_v41 = vmul.f32 1.442695, %v522_v37  ;;  %v9137_v37 = vld [vmem:[#allocation7 + $0x58] sm:$0xff] }
 0x284   :  { %8668 = vpow2.f32 %v514_v38  ;;  %v8608_v38 = vpack.i.bf16 %v9137_v37, %v9004_v4 }
 0x285   :  { %8670 = vpow2.f32 %v517_v39  ;;  %v9142_v39 = vld [vmem:[#allocation7 + $0x10] sm:$0xff] }
 0x286   :  { %8672 = vpow2.f32 %v520_v40  ;;  %v9144_v40 = vld [vmem:[#allocation7 + $0x38] sm:$0xff] }
 0x287   :  { %8674 = vpow2.f32 %v523_v41  ;;  %v9152_v41 = vld [vmem:[#allocation7 + $0x60] sm:$0xff] }
 0x28e   :  { %v8669_v42 = vpop.eup %8668 }
 0x28f   :  { %v8671_v43 = vpop.eup %8670 }
 0x290   :  { %v525_v44 = vadd.f32 %v8671_v43, %v8669_v42  ;;  %v8673_v45 = vpop.eup %8672 }
 0x291   :  { %v8675_v47 = vpop.eup %8674 }
 0x292   :  { %v526_v46 = vadd.f32 %v8673_v45, %v525_v44  ;;  %v9162_v44 = vld [vmem:[#allocation8] sm:$0xff] }
 0x294   :  { %v527_v48 = vadd.f32 %v8675_v47, %v526_v46 }
 0x296   :  { %8676 = vrcp.f32 %v527_v48  ;;  %v9172_v48 = vld [vmem:[#allocation8 + $0x18] sm:$0xff] }
 0x2a0   :  { %v8677_v49 = vpop.eup %8676 }
 0x2a1   :  { %v529_v50 = vmul.f32 %v8677_v49, %v8669_v42  ;;  %v606_v51 = vmul.f32 %v8677_v49, %v8671_v43  ;;  %v829_v53 = vmul.f32 %v8677_v49, %v8673_v45  ;;  %v980_v54 = vmul.f32 %v8677_v49, %v8675_v47  ;;  %v9154_v42 = vld [vmem:[#allocation7 + $0x88] sm:$0xff]  ;;  %v9170_v47 = vld [vmem:[#allocation8 + $0x10] sm:$0xff] }
 0x2a2   :  { %v9158_v4 = vpack.c.bf16 %v9154_v42, %v9152_v41  ;;  %v1341_v43 = vlaneseq  ;;  %v9164_v45 = vld [vmem:[#allocation8 + $0x8] sm:$0xff] }
 0x2a3   :  { %7887 = vmatmul.mubr.msk.f32.vlgmr.msra.gmra.mrb[4].mxu0 %vm200_vm2, %v529_v50  ;;  %7892 = vmatmul.mubr.msk.f32.vlgmr.msra.gmra.mrb[6].mxu1 %vm200_vm2, %v606_v51  ;;  %v9168_v46 = vpack.c.bf16 %v9164_v45, %v9162_v44  ;;  %v103_v50 = vld [vmem:[%s9954_s4 + $0x2] sm:$0x3]  ;;  %v9182_v51 = vpack.c.bf16 %v9172_v48, %v9170_v47 }
 0x2a4   :  { %7895 = vmatpush3.msra.mxu0 %v9065_v52  ;;  %7896 = vmatprep.mubr.msk.f32.mxu0 %vm8885_vm0, %v9961_v1  ;;  %v9174_v49 = vshrl.u32 %v1341_v43, 7 }
 0x2a5   :  { %7901 = vmatprep.mubr.msk.f32.mxu1 %vm8885_vm0, %v9961_v1  ;;  %7904 = vmatprep.subr.mxu0 %v9961_v1 }
 0x2a6   :  { %7900 = vmatpush3.msra.mxu1 %v9075_v55 }
 0x2a7   :  { %7909 = vmatprep.subr.mxu1 %v9961_v1 }
 0x376   :  { %v602_v57 = vpop.f32.mrb[4].mxu0  ;;  %v679_v58 = vpop.f32.mrb[6].mxu1 }
 0x377   :  { %v7888_v59 = vpop.f32.mrb[5].mxu0  ;;  %v7893_v60 = vpop.f32.mrb[7].mxu1  ;;  %7897 = vmatmul.mubr.msk.f32.vlgmr.msra.gmra.mrb[6].mxu0 %vm200_vm2, %v679_v58  ;;  %7902 = vmatmul.mubr.msk.f32.vlgmr.msra.gmra.mrb[8].mxu1 %vm200_vm2, %v602_v57  ;;  %v9189_v57 = vld [vmem:[#allocation8 + $0x28] sm:$0xff] }
 0x378   :  { %7905 = vmatpush3.msra.mxu0 %v831_v56  ;;  %7906 = vmatprep.mubr.msk.f32.mxu0 %vm8885_vm0, %v9961_v1  ;;  %v9187_v56 = vld [vmem:[#allocation8 + $0x20] sm:$0xff] }
 0x379   :  { %7914 = vmatprep.subr.mxu0 %v9961_v1  ;;  %7911 = vmatprep.mubr.msk.f32.mxu1 %vm8885_vm0, %v9961_v1  ;;  %v9198_v60 = vpack.c.bf16 %v9189_v57, %v9187_v56 }
 0x37a   :  { %7910 = vmatpush3.msra.mxu1 %v9093_v62 }
 0x37b   :  { %7907 = vmatmul.mubr.msk.f32.vlgmr.msra.gmra.mrb[8].mxu0 %vm200_vm2, %v829_v53  ;;  %7919 = vmatprep.subr.mxu1 %v9961_v1  ;;  %v9957_v53 = vsub.s32 0, %v9174_v49 }
 0x37c   :  { %7915 = vmatpush3.msra.mxu0 %v982_v61  ;;  %7916 = vmatprep.mubr.msk.f32.mxu0 %vm8885_vm0, %v9961_v1  ;;  %v8605_v61 = vpop.permute.xlu1 %8604 }
 0x37d   :  { %8449 = vmatprep.subr.bf16.mxu0 %v9958_v0  ;;  %v1344_v58 = vrot.slane %v103_v50, %v9957_v53 }
 0x37f   :  { %7917 = vmatmul.mubr.msk.f32.vlgmr.msra.gmra.mrb[10].mxu0 %vm200_vm2, %v980_v54  ;;  %v9956_v54 = vsub.s32 1, %v9174_v49 }
 0x380   :  { %7932 = vmatprep.mubr.msk.f32.mxu0 %vm8885_vm0, %v9961_v1 }
 0x381   :  { %v1348_v59 = vrot.slane %v103_v50, %v9956_v54 }
 0x44a   :  { %v752_v11 = vpop.f32.mrb[6].mxu0  ;;  %v825_v12 = vpop.f32.mrb[8].mxu1 }
 0x44b   :  { %v826_v13 = vadd.f32 %v825_v12, %v752_v11  ;;  %v7898_v14 = vpop.f32.mrb[7].mxu0  ;;  %v7903_v15 = vpop.f32.mrb[9].mxu1 }
 0x44e   :  { %v902_v17 = vpop.f32.mrb[8].mxu0 }
 0x44f   :  { %v7908_v18 = vpop.f32.mrb[9].mxu0  ;;  %7912 = vmatmul.mubr.msk.f32.vlgmr.msra.gmra.mrb[10].mxu1 %vm200_vm2, %v902_v17 }
 0x450   :  { %7920 = vmatpush3.msra.mxu1 %v9104_v16  ;;  %7921 = vmatprep.mubr.msk.f32.mxu1 %vm8885_vm0, %v9961_v1  ;;  %v8607_v18 = vunpack.i.h.bf16 %v8605_v61 }
 0x451   :  { %8455 = vmatprep.subr.bf16.mxu1 %v9958_v0 }
 0x452   :  { %v1053_v2 = vpop.f32.mrb[10].mxu0 }
 0x453   :  { %v7918_v9 = vpop.f32.mrb[11].mxu0  ;;  %7922 = vmatmul.mubr.msk.f32.vlgmr.msra.gmra.mrb[12].mxu1 %vm200_vm2, %v1053_v2  ;;  %v8606_v2 = vunpack.i.l.bf16 %v8605_v61 }
 0x454   :  { %7951 = vmatprep.mubr.msk.f32.mxu1 %vm8885_vm0, %v9961_v1  ;;  %8457 = vmatpush3.bf16.msra.mxu1 %v9168_v46 }
 0x455   :  { %8458 = vmatprep.subr.bf16.mxu1 %v9958_v0 }
 0x458   :  { %8460 = vmatpush3.bf16.msra.mxu1 %v9182_v51 }
 0x459   :  { %8461 = vmatprep.subr.bf16.mxu1 %v9958_v0 }
 0x45c   :  { %8463 = vmatpush3.bf16.msra.mxu1 %v9198_v60 }
 0x45d   :  { %8464 = vmatprep.subr.bf16.mxu1 %v9958_v0 }
 0x522   :  { %v975_v19 = vpop.f32.mrb[10].mxu1 }
 0x523   :  { %v979_v20 = vadd.f32 %v975_v19, %v826_v13  ;;  %v7913_v21 = vpop.f32.mrb[11].mxu1 }
 0x526   :  { %v1126_v22 = vpop.f32.mrb[12].mxu1 }
 0x527   :  { %v1130_v24 = vadd.f32 %v1126_v22, %v979_v20  ;;  %v7923_v25 = vpop.f32.mrb[13].mxu1 }
 0x529   :  { %v1134_v26 = vadd.f32 %v9114_v23, %v1130_v24 }
 0x52b   :  { %v1135_v27 = vadd.f32 %v1134_v26, %v9019_v8  ;;  %v8613_v8 = vpack.i.bf16 %v9129_v32, %v9006_v5  ;;  %v9148_v5 = vpack.c.bf16 %v9144_v40, %v9142_v39 }
 0x52d   :  { %v1136_v28 = vsel %vm122_vm1, %v1135_v27, 0.0  ;;  %8451 = vmatpush3.bf16.msra.mxu0 %v9148_v5 }
 0x52e   :  { %1137 = vadd.xlane.f32.xlu0 %v1136_v28  ;;  %8452 = vmatprep.subr.bf16.mxu0 %v9958_v0 }
 0x531   :  { %8454 = vmatpush3.bf16.msra.mxu0 %v9158_v4 }
 0x532   :  { %8467 = vmatprep.subr.bf16.mxu0 %v9958_v0 }
 0x544   :  { %8599 = vrot.lane.b32.xlu0 %v8598_v30, %s8897_s29 }
 0x548   :  { %1157 = vrot.lane.b32.xlu0 %v9127_v31, %s8888_s20 }
 0x54c   :  { %8614 = vrot.lane.b32.xlu0 %v8613_v8, %s8897_s29 }
 0x550   :  { %1383 = vrot.lane.b32.xlu0 %v1348_v59, %s8897_s29 }
 0x5bb   :  { %v1138_v33 = vpop.xlane.xlu0 %1137 }
 0x5bc   :  { %v1140_v34 = vmul.f32 0.03125, %v1138_v33 }
 0x5be   :  { %v1141_v3 = vsub.f32 %v1135_v27, %v1140_v34  ;;  %v1374_v27 = vsel %vm122_vm1, %v8606_v2, %v8607_v18 }
 0x5bf   :  { %v8600_v12 = vpop.permute.xlu0 %8599 }
 0x5c0   :  { %v1142_v35 = vmul.f32 %v1141_v3, %v1141_v3  ;;  %v8602_v9 = vunpack.i.h.bf16 %v8600_v12  ;;  %v8601_v19 = vunpack.i.l.bf16 %v8600_v12 }
 0x5c2   :  { %v1143_v36 = vsel %vm122_vm1, %v1142_v35, 0.0  ;;  %v1373_v28 = vsel %vm122_vm1, %v8601_v19, %v8602_v9 }
 0x5c3   :  { %1144 = vadd.xlane.f32.xlu1 %v1143_v36  ;;  %v9207_v14 = vpop.permute.xlu0 %1157  ;;  %v9217_v35 = vpack.c.bf16 %v1374_v27, %v1373_v28  ;;  %v9235_v36 = vld [vmem:[#allocation8 + $0x30] sm:$0xff]  ;;  %v9299_v28 = vld [vmem:[%s9954_s4 + $0x2] ss:$0 sm:$0xff] }
 0x5c7   :  { %v8615_v15 = vpop.permute.xlu0 %8614 }
 0x5c8   :  { %v8617_v21 = vunpack.i.h.bf16 %v8615_v15  ;;  %v8616_v26 = vunpack.i.l.bf16 %v8615_v15 }
 0x5ca   :  { %v1376_v34 = vsel %vm122_vm1, %v8616_v26, %v8617_v21 }
 0x5cb   :  { %v1384_v12 = vpop.permute.xlu0 %1383 }
 0x5d4   :  { %8609 = vrot.lane.b32.xlu1 %v8608_v38, %s8897_s29  ;;  %v9237_v38 = vld [vmem:[#allocation8 + $0x38] sm:$0xff] }
 0x5d5   :  { %v9241_v43 = vpack.c.bf16 %v9237_v38, %v9235_v36 }
 0x5d7   :  { %8466 = vmatpush3.bf16.msra.mxu1 %v9241_v43 }
 0x5d8   :  { %1381 = vrot.lane.b32.xlu1 %v1344_v58, %s8897_s29  ;;  %7970 = vmatprep.subr.mxu1 %v9961_v1 }
 0x5dc   :  { %1161 = vrot.lane.b32.xlu1 %v9127_v31, %s8895_s28 }
 0x650   :  { %v1145_v10 = vpop.xlane.xlu1 %1144 }
 0x651   :  { %v1146_v11 = vmul.f32 0.03125, %v1145_v10 }
 0x653   :  { %v1147_v13 = vadd.f32 1e-05, %v1146_v11 }
 0x654   :  { %v8610_v17 = vpop.permute.xlu1 %8609 }
 0x655   :  { %8678 = vrsqrt.f32 %v1147_v13  ;;  %v8612_v24 = vunpack.i.h.bf16 %v8610_v17  ;;  %v8611_v25 = vunpack.i.l.bf16 %v8610_v17 }
 0x657   :  { %v1375_v33 = vsel %vm122_vm1, %v8611_v25, %v8612_v24 }
 0x658   :  { %v1382_v50 = vpop.permute.xlu1 %1381 }
 0x659   :  { %v9250_v13 = vsel %vm122_vm1, %v1382_v50, %v1384_v12 }
 0x65c   :  { %v9245_v58 = vpop.permute.xlu1 %1161 }
 0x65f   :  { %v8679_v20 = vpop.eup %8678 }
 0x660   :  { %v1149_v22 = vmul.f32 %v8679_v20, %v1141_v3  ;;  %v9222_v3 = vpack.c.bf16 %v1376_v34, %v1375_v33 }
 0x662   :  { %v1156_v30 = vmul.f32 %v9127_v31, %v1149_v22  ;;  %v9228_v31 = vld [vmem:[#allocation5] sm:$0xff] }
 0x664   :  { %v9213_v8 = vadd.f32 %v9207_v14, %v1156_v30 }
 0x666   :  { %7933 = vmatmul.mubr.msk.f32.vlgmr.msra.gmra.mrb[12].mxu0 %vm122_vm1, %v9213_v8 }
 0x667   :  { %8469 = vmatpush3.bf16.msra.mxu0 %v9217_v35  ;;  %7962 = vmatprep.mubr.msk.f32.mxu0 %vm8885_vm0, %v9961_v1 }
 0x668   :  { %8470 = vmatprep.subr.bf16.mxu0 %v9958_v0 }
 0x66b   :  { %8472 = vmatpush3.bf16.msra.mxu0 %v9222_v3 }
 0x66c   :  { %7965 = vmatprep.subr.mxu0 %v9961_v1 }
 0x66e   :  { %7963 = vmatmul.mubr.msk.f32.vlgmr.msra.gmra.mrb[14].mxu0 %vm122_vm1, %v9228_v31 }
 0x66f   :  { %7967 = vmatprep.mubr.msk.f32.mxu0 %vm8885_vm0, %v9961_v1 }
 0x739   :  { %v1233_v59 = vpop.f32.mrb[12].mxu0 }
 0x73a   :  { %v1234_v61 = vadd.f32 %v1233_v59, %v9245_v58  ;;  %v7934_v10 = vpop.f32.mrb[13].mxu0 }
 0x73c   :  { %v1237_v11 = vmax.f32 %v1234_v61, 0.0 }
 0x73e   :  { %7952 = vmatmul.mubr.msk.f32.vlgmr.msra.gmra.mrb[14].mxu1 %vm1244_vm3, %v1237_v11 }
 0x73f   :  { %7972 = vmatprep.mubr.msk.f32.mxu1 %vm8885_vm0, %v9961_v1 }
 0x741   :  { %v1456_v15 = vpop.f32.mrb[14].mxu0 }
 0x742   :  { %v1457_v17 = vadd.f32 %v1456_v15, %v9250_v13  ;;  %v7964_v18 = vpop.f32.mrb[15].mxu0 }
 0x744   :  { %1541 = vrot.lane.b32.xlu1 %v1457_v17, %s8889_s22  ;;  %1462 = vrot.lane.b32.xlu0 %v1457_v17, %s8888_s20  ;;  %v1460_v2 = vmul.f32 0.35355338, %v1457_v17 }
 0x748   :  { %1619 = vrot.lane.b32.xlu0 %v1457_v17, %s8887_s19  ;;  %1539 = vrot.lane.b32.xlu1 %v1460_v2, %s8890_s23 }
 0x74c   :  { %1697 = vrot.lane.b32.xlu0 %v1457_v17, %s8891_s24  ;;  %1617 = vrot.lane.b32.xlu1 %v1460_v2, %s8892_s25 }
 0x750   :  { %1695 = vrot.lane.b32.xlu0 %v1460_v2, %s8893_s26  ;;  %1870 = vrot.lane.b32.xlu1 %v1457_v17, %s8894_s27 }
 0x754   :  { %1793 = vrot.lane.b32.xlu0 %v1457_v17, %s8895_s28  ;;  %1947 = vrot.lane.b32.xlu1 %v9065_v52, %s8888_s20 }
 0x758   :  { %2101 = vrot.lane.b32.xlu0 %v1457_v17, %s8896_s0  ;;  %2256 = vrot.lane.b32.xlu1 %v1457_v17, %s8882_s21 }
 0x75c   :  { %2024 = vrot.lane.b32.xlu0 %v9075_v55, %s8888_s20  ;;  %2178 = vrot.lane.b32.xlu1 %v9093_v62, %s8888_s20 }
 0x760   :  { %2333 = vrot.lane.b32.xlu0 %v9104_v16, %s8888_s20 }
 0x7b6   :  { %v1542_v9 = vpop.permute.xlu1 %1541  ;;  %v1463_v19 = vpop.permute.xlu0 %1462 }
 0x7b7   :  { %7966 = vmatpush3.xpose.msk.msra.mxu0 %vm200_vm2, %v1463_v19  ;;  %7971 = vmatpush3.xpose.msk.msra.mxu1 %vm200_vm2, %v1542_v9 }
 0x7b8   :  { %7975 = vmatprep.subr.mxu0 %v9961_v1  ;;  %7980 = vmatprep.subr.mxu1 %v9961_v1 }
 0x7ba   :  { %v1620_v20 = vpop.permute.xlu0 %1619  ;;  %v1540_v21 = vpop.permute.xlu1 %1539  ;;  %7968 = vmatmul.mubr.msk.f32.vlgmr.msra.gmra.mrb[16].mxu0 %vm200_vm2, %v1460_v2 }
 0x7bb   :  { %7973 = vmatmul.mubr.msk.f32.vlgmr.msra.gmra.mrb[16].mxu1 %vm200_vm2, %v1540_v21  ;;  %7976 = vmatpush3.xpose.msk.msra.mxu0 %vm200_vm2, %v1620_v20 }
 0x7bc   :  { %7977 = vmatprep.mubr.msk.f32.mxu0 %vm8885_vm0, %v9961_v1  ;;  %7982 = vmatprep.mubr.msk.f32.mxu1 %vm8885_vm0, %v9961_v1 }
 0x7bd   :  { %7985 = vmatprep.subr.mxu0 %v9961_v1 }
 0x7be   :  { %v1698_v22 = vpop.permute.xlu0 %1697  ;;  %v1618_v24 = vpop.permute.xlu1 %1617 }
 0x7bf   :  { %7978 = vmatmul.mubr.msk.f32.vlgmr.msra.gmra.mrb[18].mxu0 %vm200_vm2, %v1618_v24  ;;  %7981 = vmatpush3.xpose.msk.msra.mxu1 %vm200_vm2, %v1698_v22 }
 0x7c0   :  { %7990 = vmatprep.subr.mxu1 %v9961_v1  ;;  %7987 = vmatprep.mubr.msk.f32.mxu0 %vm8885_vm0, %v9961_v1 }
 0x7c2   :  { %v1696_v25 = vpop.permute.xlu0 %1695  ;;  %v1871_v26 = vpop.permute.xlu1 %1870 }
 0x7c3   :  { %7983 = vmatmul.mubr.msk.f32.vlgmr.msra.gmra.mrb[18].mxu1 %vm200_vm2, %v1696_v25 }
 0x7c4   :  { %7991 = vmatpush3.msra.mxu1 %v1871_v26  ;;  %7992 = vmatprep.mubr.msk.f32.mxu1 %vm8885_vm0, %v9961_v1 }
 0x7c5   :  { %8000 = vmatprep.subr.mxu1 %v9961_v1 }
 0x7c6   :  { %v1794_v27 = vpop.permute.xlu0 %1793 }
 0x7c7   :  { %7986 = vmatpush3.msra.mxu0 %v1794_v27 }
 0x7c8   :  { %7995 = vmatprep.subr.mxu0 %v9961_v1 }
 0x7ca   :  { %v2102_v9 = vpop.permute.xlu0 %2101 }
 0x7ce   :  { %v9304_v22 = vpop.permute.xlu0 %2024 }
 0x811   :  { %v1314_v30 = vpop.f32.mrb[14].mxu1 }
 0x812   :  { %v1315_v33 = vadd.f32 %v9299_v28, %v1314_v30  ;;  %v7953_v34 = vpop.f32.mrb[15].mxu1 }
 0x814   :  { %v1318_v50 = vadd.f32 %v1315_v33, %v9213_v8 }
 0x816   :  { %v1319_v59 = vsel %vm122_vm1, %v1318_v50, 0.0 }
 0x817   :  { %1320 = vadd.xlane.f32.xlu0 %v1319_v59  ;;  %v9306_v59 = vpop.permute.xlu0 %2333 }
 0x88d   :  { %v1535_v61 = vpop.f32.mrb[16].mxu0 }
 0x88e   :  { %v7969_v10 = vpop.f32.mrb[17].mxu0  ;;  %v1613_v11 = vpop.f32.mrb[16].mxu1 }
 0x88f   :  { %v1773_v12 = vmax.f32 %v1535_v61, %v1613_v11  ;;  %v7974_v15 = vpop.f32.mrb[17].mxu1 }
 0x892   :  { %v1691_v17 = vpop.f32.mrb[18].mxu0 }
 0x893   :  { %v1774_v18 = vmax.f32 %v1773_v12, %v1691_v17  ;;  %v7979_v2 = vpop.f32.mrb[19].mxu0 }
 0x896   :  { %v1769_v19 = vpop.f32.mrb[18].mxu1 }
 0x897   :  { %v1775_v20 = vmax.f32 %v1774_v18, %v1769_v19  ;;  %v7984_v21 = vpop.f32.mrb[19].mxu1 }
 0x899   :  { %v1776_v24 = vsub.f32 %v1535_v61, %v1775_v20  ;;  %v1779_v25 = vsub.f32 %v1613_v11, %v1775_v20  ;;  %v1782_v8 = vsub.f32 %v1691_v17, %v1775_v20  ;;  %v1785_v26 = vsub.f32 %v1769_v19, %v1775_v20 }
 0x89b   :  { %v1777_v27 = vmul.f32 1.442695, %v1776_v24  ;;  %v1780_v30 = vmul.f32 1.442695, %v1779_v25  ;;  %v1783_v33 = vmul.f32 1.442695, %v1782_v8 }
 0x89c   :  { %v1786_v34 = vmul.f32 1.442695, %v1785_v26 }
 0x89d   :  { %8680 = vpow2.f32 %v1777_v27 }
 0x89e   :  { %8682 = vpow2.f32 %v1780_v30 }
 0x89f   :  { %8684 = vpow2.f32 %v1783_v33 }
 0x8a0   :  { %8686 = vpow2.f32 %v1786_v34 }
 0x8a4   :  { %v1321_v10 = vpop.xlane.xlu0 %1320 }
 0x8a5   :  { %v1322_v12 = vmul.f32 0.03125, %v1321_v10 }
 0x8a7   :  { %v8681_v15 = vpop.eup %8680  ;;  %v9308_v18 = vsub.f32 %v1318_v50, %v1322_v12  ;;  %v9313_v50 = vpop.permute.xlu1 %1947 }
 0x8a8   :  { %v8683_v2 = vpop.eup %8682 }
 0x8a9   :  { %v1788_v61 = vadd.f32 %v8683_v2, %v8681_v15  ;;  %v1324_v11 = vmul.f32 %v9308_v18, %v9308_v18  ;;  %v8685_v17 = vpop.eup %8684 }
 0x8aa   :  { %v8687_v21 = vpop.eup %8686 }
 0x8ab   :  { %v1789_v19 = vadd.f32 %v8685_v17, %v1788_v61  ;;  %v1325_v20 = vsel %vm122_vm1, %v1324_v11, 0.0  ;;  %v2257_v33 = vpop.permute.xlu1 %2256 }
 0x8ac   :  { %1326 = vadd.xlane.f32.xlu0 %v1325_v20 }
 0x8ad   :  { %v1790_v24 = vadd.f32 %v8687_v21, %v1789_v19 }
 0x8af   :  { %8688 = vrcp.f32 %v1790_v24  ;;  %v9325_v34 = vpop.permute.xlu1 %2178 }
 0x8b9   :  { %v8689_v25 = vpop.eup %8688 }
 0x8ba   :  { %v1792_v8 = vmul.f32 %v8689_v25, %v8681_v15  ;;  %v1869_v26 = vmul.f32 %v8689_v25, %v8683_v2  ;;  %v2100_v27 = vmul.f32 %v8689_v25, %v8685_v17  ;;  %v2255_v30 = vmul.f32 %v8689_v25, %v8687_v21 }
 0x8bc   :  { %7988 = vmatmul.mubr.msk.f32.vlgmr.msra.gmra.mrb[20].mxu0 %vm200_vm2, %v1792_v8  ;;  %7993 = vmatmul.mubr.msk.f32.vlgmr.msra.gmra.mrb[20].mxu1 %vm200_vm2, %v1869_v26  ;;  %v8623_v26 = vpack.i.bf16 %v9065_v52, %v9075_v55 }
 0x8bd   :  { %7996 = vmatpush3.msra.mxu0 %v9313_v50  ;;  %7997 = vmatprep.mubr.msk.f32.mxu0 %vm8885_vm0, %v9961_v1 }
 0x8be   :  { %8001 = vmatpush3.msra.mxu1 %v9304_v22  ;;  %8002 = vmatprep.mubr.msk.f32.mxu1 %vm8885_vm0, %v9961_v1 }
 0x8bf   :  { %8005 = vmatprep.subr.mxu0 %v9961_v1  ;;  %8010 = vmatprep.subr.mxu1 %v9961_v1 }
 0x8c2   :  { %8624 = vrot.lane.b32.xlu0 %v8623_v26, %s8895_s28 }
 0x98f   :  { %v1865_v10 = vpop.f32.mrb[20].mxu0  ;;  %v1942_v12 = vpop.f32.mrb[20].mxu1 }
 0x990   :  { %v7989_v15 = vpop.f32.mrb[21].mxu0  ;;  %v7994_v2 = vpop.f32.mrb[21].mxu1  ;;  %7998 = vmatmul.mubr.msk.f32.vlgmr.msra.gmra.mrb[22].mxu0 %vm200_vm2, %v1942_v12  ;;  %8003 = vmatmul.mubr.msk.f32.vlgmr.msra.gmra.mrb[22].mxu1 %vm200_vm2, %v1865_v10 }
 0x991   :  { %8006 = vmatpush3.msra.mxu0 %v2102_v9  ;;  %8007 = vmatprep.mubr.msk.f32.mxu0 %vm8885_vm0, %v9961_v1  ;;  %v7520_v9 = vld [vmem:[%s9954_s4 + $0x3] ss:$0 sm:$0xff] }
 0x992   :  { %8015 = vmatprep.subr.mxu0 %v9961_v1  ;;  %8011 = vmatpush3.msra.mxu1 %v9325_v34 }
 0x993   :  { %8012 = vmatprep.mubr.msk.f32.mxu1 %vm8885_vm0, %v9961_v1  ;;  %8020 = vmatprep.subr.mxu1 %v9961_v1 }
 0x994   :  { %8008 = vmatmul.mubr.msk.f32.vlgmr.msra.gmra.mrb[24].mxu0 %vm200_vm2, %v2100_v27  ;;  %2415 = vrot.lane.b32.xlu1 %v7520_v9, %s8895_s28 }
 0x995   :  { %8016 = vmatpush3.msra.mxu0 %v2257_v33  ;;  %8017 = vmatprep.mubr.msk.f32.mxu0 %vm8885_vm0, %v9961_v1 }
 0x996   :  { %8473 = vmatprep.subr.bf16.mxu0 %v9958_v0 }
 0x998   :  { %8018 = vmatmul.mubr.msk.f32.vlgmr.msra.gmra.mrb[26].mxu0 %vm200_vm2, %v2255_v30 }
 0x999   :  { %8033 = vmatprep.mubr.msk.f32.mxu0 %vm8885_vm0, %v9961_v1 }
 0xa06   :  { %v9358_v12 = vpop.permute.xlu1 %2415 }
 0xa63   :  { %v2019_v61 = vpop.f32.mrb[22].mxu0  ;;  %v2096_v11 = vpop.f32.mrb[22].mxu1 }
 0xa64   :  { %v2097_v17 = vadd.f32 %v2096_v11, %v2019_v61  ;;  %v7999_v19 = vpop.f32.mrb[23].mxu0  ;;  %v8004_v20 = vpop.f32.mrb[23].mxu1 }
 0xa65   :  { %v8618_v20 = vpack.i.bf16 %v9097_v63, %v9119_v29 }
 0xa67   :  { %v2173_v21 = vpop.f32.mrb[24].mxu0 }
 0xa68   :  { %v8009_v24 = vpop.f32.mrb[25].mxu0  ;;  %8013 = vmatmul.mubr.msk.f32.vlgmr.msra.gmra.mrb[24].mxu1 %vm200_vm2, %v2173_v21  ;;  %v1327_v21 = vpop.xlane.xlu0 %1326 }
 0xa69   :  { %8021 = vmatpush3.msra.mxu1 %v9306_v59  ;;  %8022 = vmatprep.mubr.msk.f32.mxu1 %vm8885_vm0, %v9961_v1 }
 0xa6a   :  { %8479 = vmatprep.subr.bf16.mxu1 %v9958_v0 }
 0xa6b   :  { %v2328_v25 = vpop.f32.mrb[26].mxu0 }
 0xa6c   :  { %v8019_v8 = vpop.f32.mrb[27].mxu0  ;;  %8023 = vmatmul.mubr.msk.f32.vlgmr.msra.gmra.mrb[26].mxu1 %vm200_vm2, %v2328_v25 }
 0xa6d   :  { %8044 = vmatprep.mubr.msk.f32.mxu1 %vm8885_vm0, %v9961_v1 }
 0xb3b   :  { %v2250_v27 = vpop.f32.mrb[24].mxu1 }
 0xb3c   :  { %v2254_v30 = vadd.f32 %v2250_v27, %v2097_v17  ;;  %v8014_v33 = vpop.f32.mrb[25].mxu1  ;;  %v8628_v17 = vpack.i.bf16 %v9129_v32, %v9137_v37 }
 0xb3f   :  { %v2405_v10 = vpop.f32.mrb[26].mxu1 }
 0xb40   :  { %v2409_v15 = vadd.f32 %v2405_v10, %v2254_v30  ;;  %v8024_v2 = vpop.f32.mrb[27].mxu1 }
 0xb42   :  { %v2418_v61 = vadd.f32 %v9358_v12, %v2409_v15 }
 0xb44   :  { %v2419_v11 = vadd.f32 %v2418_v61, %v9228_v31  ;;  %v8625_v31 = vpop.permute.xlu0 %8624 }
 0xb45   :  { %v8627_v24 = vunpack.i.h.bf16 %v8625_v31  ;;  %v8626_v25 = vunpack.i.l.bf16 %v8625_v31 }
 0xb46   :  { %v2420_v19 = vsel %vm122_vm1, %v2419_v11, 0.0 }
 0xb47   :  { %2421 = vadd.xlane.f32.xlu1 %v2420_v19  ;;  %v9372_v8 = vpack.c.bf16 %v8627_v24, %v8626_v25  ;;  %v7521_v19 = vld [vmem:[%s9954_s4 + $0x4] ss:$0 sm:$0xff] }
 0xb49   :  { %8475 = vmatpush3.bf16.msra.mxu0 %v9372_v8 }
 0xb4a   :  { %8476 = vmatprep.subr.bf16.mxu0 %v9958_v0 }
 0xb58   :  { %8619 = vrot.lane.b32.xlu1 %v8618_v20, %s8895_s28  ;;  %v1328_v20 = vmul.f32 0.03125, %v1327_v21 }
 0xb5c   :  { %8629 = vrot.lane.b32.xlu1 %v8628_v17, %s8895_s28  ;;  %v1329_v17 = vadd.f32 1e-05, %v1328_v20 }
 0xb5e   :  { %8690 = vrsqrt.f32 %v1329_v17 }
 0xb60   :  { %1332 = vrot.lane.b32.xlu1 %v9299_v28, %s8888_s20 }
 0xb64   :  { %2433 = vrot.lane.b32.xlu1 %v7520_v9, %s8897_s29 }
 0xb68   :  { %2545 = vrot.lane.b32.xlu1 %v7521_v19, %s8895_s28  ;;  %v8691_v25 = vpop.eup %8690 }
 0xbd4   :  { %v2422_v63 = vpop.xlane.xlu1 %2421 }
 0xbd5   :  { %v2423_v29 = vmul.f32 0.03125, %v2422_v63 }
 0xbd7   :  { %v2424_v32 = vsub.f32 %v2419_v11, %v2423_v29  ;;  %v8633_v11 = vpack.i.bf16 %v9104_v16, %v9093_v62 }
 0xbd8   :  { %v8620_v37 = vpop.permute.xlu1 %8619 }
 0xbd9   :  { %v8622_v26 = vunpack.i.h.bf16 %v8620_v37  ;;  %v8621_v27 = vunpack.i.l.bf16 %v8620_v37  ;;  %v2425_v30 = vmul.f32 %v2424_v32, %v2424_v32 }
 0xbdb   :  { %v9376_v33 = vpack.c.bf16 %v8622_v26, %v8621_v27  ;;  %v2426_v9 = vsel %vm122_vm1, %v2425_v30, 0.0  ;;  %v1331_v26 = vmul.f32 %v8691_v25, %v9308_v18 }
 0xbdc   :  { %2427 = vadd.xlane.f32.xlu0 %v2426_v9  ;;  %v8630_v10 = vpop.permute.xlu1 %8629 }
 0xbdd   :  { %v8632_v15 = vunpack.i.h.bf16 %v8630_v10  ;;  %v8631_v2 = vunpack.i.l.bf16 %v8630_v10  ;;  %8481 = vmatpush3.bf16.msra.mxu1 %v9376_v33 }
 0xbde   :  { %8482 = vmatprep.subr.bf16.mxu1 %v9958_v0 }
 0xbdf   :  { %v9381_v61 = vpack.c.bf16 %v8632_v15, %v8631_v2 }
 0xbe0   :  { %v9395_v29 = vpop.permute.xlu1 %1332 }
 0xbe1   :  { %8484 = vmatpush3.bf16.msra.mxu1 %v9381_v61  ;;  %v1335_v9 = vmul.f32 %v9395_v29, %v1331_v26 }
 0xbe2   :  { %8052 = vmatprep.subr.mxu1 %v9961_v1 }
 0xbe4   :  { %v9409_v15 = vpop.permute.xlu1 %2433 }
 0xbe8   :  { %v9418_v17 = vpop.permute.xlu1 %2545 }
 0xbf2   :  { %8634 = vrot.lane.b32.xlu0 %v8633_v11, %s8895_s28 }
 0xbf6   :  { %1336 = vrot.lane.b32.xlu0 %v9299_v28, %s8895_s28 }
 0xbfa   :  { %2456 = vrot.lane.b32.xlu0 %v7521_v19, %s8888_s20 }
 0xc69   :  { %v2428_v31 = vpop.xlane.xlu0 %2427 }
 0xc6a   :  { %v2429_v24 = vmul.f32 0.03125, %v2428_v31 }
 0xc6c   :  { %v2430_v63 = vadd.f32 1e-05, %v2429_v24 }
 0xc6d   :  { %v8635_v37 = vpop.permute.xlu0 %8634 }
 0xc6e   :  { %8692 = vrsqrt.f32 %v2430_v63  ;;  %v8637_v27 = vunpack.i.h.bf16 %v8635_v37  ;;  %v8636_v30 = vunpack.i.l.bf16 %v8635_v37 }
 0xc70   :  { %v9399_v28 = vpack.c.bf16 %v8637_v27, %v8636_v30 }
 0xc71   :  { %v9401_v10 = vpop.permute.xlu0 %1336 }
 0xc72   :  { %v1339_v21 = vadd.f32 %v9401_v10, %v1335_v9  ;;  %8478 = vmatpush3.bf16.msra.mxu0 %v9399_v28 }
 0xc73   :  { %8047 = vmatprep.subr.mxu0 %v9961_v1 }
 0xc74   :  { %8045 = vmatmul.mubr.msk.f32.vlgmr.msra.gmra.mrb[28].mxu1 %vm122_vm1, %v1339_v21 }
 0xc75   :  { %8054 = vmatprep.mubr.msk.f32.mxu1 %vm8885_vm0, %v9961_v1 }
 0xc78   :  { %v8693_v18 = vpop.eup %8692 }
 0xc79   :  { %v2432_v2 = vmul.f32 %v8693_v18, %v2424_v32  ;;  %v9426_v32 = vpop.permute.xlu0 %2456 }
 0xc7b   :  { %v2436_v11 = vmul.f32 %v9409_v15, %v2432_v2 }
 0xc7d   :  { %v9412_v20 = vadd.f32 %v7521_v19, %v2436_v11 }
 0xc7f   :  { %8034 = vmatmul.mubr.msk.f32.vlgmr.msra.gmra.mrb[28].mxu0 %vm122_vm1, %v9412_v20 }
 0xc80   :  { %8049 = vmatprep.mubr.msk.f32.mxu0 %vm8885_vm0, %v9961_v1 }
 0xd47   :  { %v2617_v31 = vpop.f32.mrb[28].mxu1 }
 0xd48   :  { %v2618_v24 = vadd.f32 %v2617_v31, %v9418_v17  ;;  %v8046_v25 = vpop.f32.mrb[29].mxu1 }
 0xd4a   :  { %2777 = vrot.lane.b32.xlu0 %v2618_v24, %s8892_s25  ;;  %2699 = vrot.lane.b32.xlu1 %v2618_v24, %s8890_s23 }
 0xd4b   :  { %8048 = vmatpush3.xpose.msk.msra.mxu0 %vm200_vm2, %v2618_v24 }
 0xd4c   :  { %8057 = vmatprep.subr.mxu0 %v9961_v1 }
 0xd4e   :  { %2855 = vrot.lane.b32.xlu0 %v2618_v24, %s8893_s26 }
 0xd52   :  { %v2528_v19 = vpop.f32.mrb[28].mxu0 }
 0xd53   :  { %v2529_v63 = vadd.f32 %v2528_v19, %v9426_v32  ;;  %v8035_v37 = vpop.f32.mrb[29].mxu0 }
 0xd55   :  { %v2532_v26 = vmul.f32 0.35355338, %v2529_v63 }
 0xd57   :  { %2853 = vrot.lane.b32.xlu0 %v2532_v26, %s8893_s26  ;;  %2697 = vrot.lane.b32.xlu1 %v2532_v26, %s8890_s23 }
 0xd58   :  { %8050 = vmatmul.mubr.msk.f32.vlgmr.msra.gmra.mrb[30].mxu0 %vm200_vm2, %v2532_v26 }
 0xd59   :  { %8059 = vmatprep.mubr.msk.f32.mxu0 %vm8885_vm0, %v9961_v1 }
 0xd5b   :  { %2951 = vrot.lane.b32.xlu0 %v2618_v24, %s8888_s20  ;;  %2775 = vrot.lane.b32.xlu1 %v2532_v26, %s8892_s25 }
 0xd5f   :  { %3257 = vrot.lane.b32.xlu0 %v2618_v24, %s8887_s19  ;;  %3028 = vrot.lane.b32.xlu1 %v2618_v24, %s8889_s22 }
 0xd63   :  { %3104 = vrot.lane.b32.xlu1 %v9065_v52, %s8897_s29  ;;  %3180 = vrot.lane.b32.xlu0 %v9075_v55, %s8897_s29 }
 0xd67   :  { %3411 = vrot.lane.b32.xlu1 %v2618_v24, %s8891_s24  ;;  %3487 = vrot.lane.b32.xlu0 %v9104_v16, %s8897_s29 }
 0xd6b   :  { %3333 = vrot.lane.b32.xlu1 %v9093_v62, %s8897_s29 }
 0xdbc   :  { %v2778_v27 = vpop.permute.xlu0 %2777  ;;  %v2700_v30 = vpop.permute.xlu1 %2699 }
 0xdbd   :  { %8053 = vmatpush3.xpose.msk.msra.mxu1 %vm200_vm2, %v2700_v30  ;;  %8058 = vmatpush3.xpose.msk.msra.mxu0 %vm200_vm2, %v2778_v27 }
 0xdbe   :  { %8062 = vmatprep.subr.mxu1 %v9961_v1  ;;  %8067 = vmatprep.subr.mxu0 %v9961_v1 }
 0xdc0   :  { %v2856_v52 = vpop.permute.xlu0 %2855 }
 0xdc9   :  { %v2854_v55 = vpop.permute.xlu0 %2853  ;;  %v2698_v9 = vpop.permute.xlu1 %2697 }
 0xdca   :  { %8055 = vmatmul.mubr.msk.f32.vlgmr.msra.gmra.mrb[30].mxu1 %vm200_vm2, %v2698_v9 }
 0xdcb   :  { %8063 = vmatpush3.xpose.msk.msra.mxu1 %vm200_vm2, %v2856_v52  ;;  %8064 = vmatprep.mubr.msk.f32.mxu1 %vm8885_vm0, %v9961_v1 }
 0xdcc   :  { %8072 = vmatprep.subr.mxu1 %v9961_v1 }
 0xdcd   :  { %v2952_v62 = vpop.permute.xlu0 %2951  ;;  %v2776_v16 = vpop.permute.xlu1 %2775 }
 0xdce   :  { %8060 = vmatmul.mubr.msk.f32.vlgmr.msra.gmra.mrb[32].mxu0 %vm200_vm2, %v2776_v16  ;;  %8065 = vmatmul.mubr.msk.f32.vlgmr.msra.gmra.mrb[32].mxu1 %vm200_vm2, %v2854_v55 }
 0xdcf   :  { %8068 = vmatpush3.msra.mxu0 %v2952_v62  ;;  %8069 = vmatprep.mubr.msk.f32.mxu0 %vm8885_vm0, %v9961_v1 }
 0xdd0   :  { %8074 = vmatprep.mubr.msk.f32.mxu1 %vm8885_vm0, %v9961_v1  ;;  %8077 = vmatprep.subr.mxu0 %v9961_v1 }
 0xdd1   :  { %v3029_v21 = vpop.permute.xlu1 %3028 }
 0xdd2   :  { %8073 = vmatpush3.msra.mxu1 %v3029_v21 }
 0xdd3   :  { %8082 = vmatprep.subr.mxu1 %v9961_v1 }
 0xe2b   :  { %v2693_v18 = vpop.f32.mrb[30].mxu0 }
 0xe2c   :  { %v8051_v2 = vpop.f32.mrb[31].mxu0 }
 0xe9d   :  { %v2771_v11 = vpop.f32.mrb[30].mxu1 }
 0xe9e   :  { %v2931_v31 = vmax.f32 %v2693_v18, %v2771_v11  ;;  %v8056_v24 = vpop.f32.mrb[31].mxu1 }
 0xea1   :  { %v2849_v25 = vpop.f32.mrb[32].mxu0  ;;  %v2927_v19 = vpop.f32.mrb[32].mxu1 }
 0xea2   :  { %v2932_v63 = vmax.f32 %v2931_v31, %v2849_v25  ;;  %v8061_v37 = vpop.f32.mrb[33].mxu0  ;;  %v8066_v26 = vpop.f32.mrb[33].mxu1 }
 0xea4   :  { %v2933_v27 = vmax.f32 %v2932_v63, %v2927_v19 }
 0xea6   :  { %v2934_v30 = vsub.f32 %v2693_v18, %v2933_v27  ;;  %v2937_v52 = vsub.f32 %v2771_v11, %v2933_v27  ;;  %v2940_v55 = vsub.f32 %v2849_v25, %v2933_v27  ;;  %v2943_v9 = vsub.f32 %v2927_v19, %v2933_v27  ;;  %v3258_v18 = vpop.permute.xlu0 %3257 }
 0xea8   :  { %v2935_v62 = vmul.f32 1.442695, %v2934_v30  ;;  %v2938_v16 = vmul.f32 1.442695, %v2937_v52  ;;  %v2941_v21 = vmul.f32 1.442695, %v2940_v55  ;;  %v9466_v52 = vpop.permute.xlu1 %3104 }
 0xea9   :  { %v2944_v54 = vmul.f32 1.442695, %v2943_v9 }
 0xeaa   :  { %8694 = vpow2.f32 %v2935_v62  ;;  %v9464_v30 = vpop.permute.xlu0 %3180 }
 0xeab   :  { %8696 = vpow2.f32 %v2938_v16  ;;  %v9965_v16 = vmov 0.0|0.0  }
 0xeac   :  { %8698 = vpow2.f32 %v2941_v21 }
 0xead   :  { %8700 = vpow2.f32 %v2944_v54 }
 0xeb4   :  { %v8695_v2 = vpop.eup %8694 }
 0xeb5   :  { %v8697_v24 = vpop.eup %8696 }
 0xeb6   :  { %v2946_v53 = vadd.f32 %v8697_v24, %v8695_v2  ;;  %v8699_v0 = vpop.eup %8698 }
 0xeb7   :  { %v8701_v37 = vpop.eup %8700 }
 0xeb8   :  { %v2947_v31 = vadd.f32 %v8699_v0, %v2946_v53 }
 0xeba   :  { %v2948_v26 = vadd.f32 %v8701_v37, %v2947_v31 }
 0xebc   :  { %8702 = vrcp.f32 %v2948_v26  ;;  %v9496_v26 = vpop.permute.xlu0 %3487 }
 0xec6   :  { %v8703_v11 = vpop.eup %8702 }
 0xec7   :  { %v2950_v25 = vmul.f32 %v8703_v11, %v8695_v2  ;;  %v3027_v19 = vmul.f32 %v8703_v11, %v8697_v24  ;;  %v3256_v63 = vmul.f32 %v8703_v11, %v8699_v0  ;;  %v3410_v27 = vmul.f32 %v8703_v11, %v8701_v37  ;;  %v3412_v0 = vpop.permute.xlu1 %3411 }
 0xec9   :  { %8070 = vmatmul.mubr.msk.f32.vlgmr.msra.gmra.mrb[34].mxu0 %vm200_vm2, %v2950_v25  ;;  %8075 = vmatmul.mubr.msk.f32.vlgmr.msra.gmra.mrb[34].mxu1 %vm200_vm2, %v3027_v19 }
 0xeca   :  { %8078 = vmatpush3.msra.mxu0 %v9466_v52  ;;  %8079 = vmatprep.mubr.msk.f32.mxu0 %vm8885_vm0, %v9961_v1 }
 0xecb   :  { %8083 = vmatpush3.msra.mxu1 %v9464_v30  ;;  %8084 = vmatprep.mubr.msk.f32.mxu1 %vm8885_vm0, %v9961_v1  ;;  %v9478_v53 = vpop.permute.xlu1 %3333 }
 0xecc   :  { %8087 = vmatprep.subr.mxu0 %v9961_v1  ;;  %8092 = vmatprep.subr.mxu1 %v9961_v1 }
 0xf9c   :  { %v3023_v54 = vpop.f32.mrb[34].mxu0  ;;  %v3100_v55 = vpop.f32.mrb[34].mxu1 }
 0xf9d   :  { %v8071_v9 = vpop.f32.mrb[35].mxu0  ;;  %v8076_v62 = vpop.f32.mrb[35].mxu1  ;;  %8080 = vmatmul.mubr.msk.f32.vlgmr.msra.gmra.mrb[36].mxu0 %vm200_vm2, %v3100_v55  ;;  %8085 = vmatmul.mubr.msk.f32.vlgmr.msra.gmra.mrb[36].mxu1 %vm200_vm2, %v3023_v54  ;;  %v7540_v54 = vld [vmem:[%s9954_s4 + $0x5] ss:$0 sm:$0xff] }
 0xf9e   :  { %8088 = vmatpush3.msra.mxu0 %v3258_v18  ;;  %8089 = vmatprep.mubr.msk.f32.mxu0 %vm8885_vm0, %v9961_v1 }
 0xf9f   :  { %8097 = vmatprep.subr.mxu0 %v9961_v1  ;;  %8093 = vmatpush3.msra.mxu1 %v9478_v53 }
 0xfa0   :  { %8094 = vmatprep.mubr.msk.f32.mxu1 %vm8885_vm0, %v9961_v1  ;;  %8102 = vmatprep.subr.mxu1 %v9961_v1 }
 0xfa1   :  { %8090 = vmatmul.mubr.msk.f32.vlgmr.msra.gmra.mrb[38].mxu0 %vm200_vm2, %v3256_v63 }
 0xfa2   :  { %8098 = vmatpush3.msra.mxu0 %v3412_v0  ;;  %8099 = vmatprep.mubr.msk.f32.mxu0 %vm8885_vm0, %v9961_v1 }
 0xfa3   :  { %8485 = vmatprep.subr.bf16.mxu0 %v9965_v16 }
 0xfa5   :  { %8100 = vmatmul.mubr.msk.f32.vlgmr.msra.gmra.mrb[40].mxu0 %vm200_vm2, %v3410_v27 }
 0xfa6   :  { %8115 = vmatprep.mubr.msk.f32.mxu0 %vm8885_vm0, %v9961_v1 }
0x1070   :  { %v3176_v21 = vpop.f32.mrb[36].mxu0  ;;  %v3252_v2 = vpop.f32.mrb[36].mxu1 }
0x1071   :  { %v3253_v24 = vadd.f32 %v3252_v2, %v3176_v21  ;;  %v8081_v31 = vpop.f32.mrb[37].mxu0  ;;  %v8086_v37 = vpop.f32.mrb[37].mxu1 }
0x1072   :  { %v8643_v37 = vpack.i.bf16 %v9154_v42, %v9152_v41  ;;  %v8648_v41 = vpack.i.bf16 %v9164_v45, %v9162_v44  ;;  %v8653_v42 = vpack.i.bf16 %v9172_v48, %v9170_v47  ;;  %v9967_v44 = vsub.s32 1, %v9174_v49 }
0x1073   :  { %v8663_v47 = vpack.i.bf16 %v9237_v38, %v9235_v36 }
0x1074   :  { %v3329_v18 = vpop.f32.mrb[38].mxu0 }
0x1075   :  { %v8091_v11 = vpop.f32.mrb[39].mxu0  ;;  %8095 = vmatmul.mubr.msk.f32.vlgmr.msra.gmra.mrb[38].mxu1 %vm200_vm2, %v3329_v18 }
0x1076   :  { %8103 = vmatpush3.msra.mxu1 %v9496_v26  ;;  %8104 = vmatprep.mubr.msk.f32.mxu1 %vm8885_vm0, %v9961_v1 }
0x1077   :  { %8491 = vmatprep.subr.bf16.mxu1 %v9965_v16 }
0x1078   :  { %v3483_v25 = vpop.f32.mrb[40].mxu0 }
0x1079   :  { %v8101_v19 = vpop.f32.mrb[41].mxu0  ;;  %8105 = vmatmul.mubr.msk.f32.vlgmr.msra.gmra.mrb[40].mxu1 %vm200_vm2, %v3483_v25 }
0x107a   :  { %8134 = vmatprep.mubr.msk.f32.mxu1 %vm8885_vm0, %v9961_v1 }
0x1148   :  { %v3405_v63 = vpop.f32.mrb[38].mxu1 }
0x1149   :  { %v3409_v27 = vadd.f32 %v3405_v63, %v3253_v24  ;;  %v8096_v0 = vpop.f32.mrb[39].mxu1  ;;  %v107_v63 = vld [vmem:[%s9954_s4 + $0x5] sm:$0x3] }
0x114a   :  { %v3601_v45 = vrot.slane %v107_v63, %v9967_v44 }
0x114c   :  { %v3559_v55 = vpop.f32.mrb[40].mxu1 }
0x114d   :  { %v3563_v9 = vadd.f32 %v3559_v55, %v3409_v27  ;;  %v8106_v62 = vpop.f32.mrb[41].mxu1  ;;  %v8658_v27 = vpack.i.bf16 %v9189_v57, %v9187_v56 }
0x114f   :  { %v3570_v21 = vadd.f32 %v7540_v54, %v3563_v9 }
0x1151   :  { %v3571_v2 = vadd.f32 %v3570_v21, %v9412_v20  ;;  %v8638_v20 = vpack.i.bf16 %v9144_v40, %v9142_v39  ;;  %v9966_v39 = vsub.s32 0, %v9174_v49 }
0x1153   :  { %v3572_v31 = vsel %vm122_vm1, %v3571_v2, 0.0  ;;  %v3597_v40 = vrot.slane %v107_v63, %v9966_v39 }
0x1154   :  { %3573 = vadd.xlane.f32.xlu1 %v3572_v31 }
0x1165   :  { %8644 = vrot.lane.b32.xlu1 %v8643_v37, %s8895_s28 }
0x1169   :  { %3585 = vrot.lane.b32.xlu1 %v7540_v54, %s8888_s20 }
0x116d   :  { %8649 = vrot.lane.b32.xlu1 %v8648_v41, %s8888_s20 }
0x1171   :  { %8659 = vrot.lane.b32.xlu1 %v8658_v27, %s8888_s20 }
0x1175   :  { %3620 = vrot.lane.b32.xlu1 %v3601_v45, %s8897_s29 }
0x11e1   :  { %v3574_v24 = vpop.xlane.xlu1 %3573 }
0x11e2   :  { %v3575_v18 = vmul.f32 0.03125, %v3574_v24 }
0x11e4   :  { %v3576_v11 = vsub.f32 %v3571_v2, %v3575_v18 }
0x11e5   :  { %v8645_v56 = vpop.permute.xlu1 %8644 }
0x11e6   :  { %v3577_v25 = vmul.f32 %v3576_v11, %v3576_v11  ;;  %v8647_v55 = vunpack.i.h.bf16 %v8645_v56  ;;  %v8646_v49 = vunpack.i.l.bf16 %v8645_v56 }
0x11e8   :  { %v3578_v19 = vsel %vm122_vm1, %v3577_v25, 0.0  ;;  %v9547_v36 = vpack.c.bf16 %v8647_v55, %v8646_v49 }
0x11e9   :  { %3579 = vadd.xlane.f32.xlu0 %v3578_v19  ;;  %v9541_v21 = vpop.permute.xlu1 %3585 }
0x11ed   :  { %v8650_v38 = vpop.permute.xlu1 %8649 }
0x11ee   :  { %v8652_v37 = vunpack.i.h.bf16 %v8650_v38  ;;  %v8651_v24 = vunpack.i.l.bf16 %v8650_v38 }
0x11f0   :  { %v9552_v25 = vpack.c.bf16 %v8652_v37, %v8651_v24 }
0x11f1   :  { %v8660_v41 = vpop.permute.xlu1 %8659 }
0x11f2   :  { %v8662_v27 = vunpack.i.h.bf16 %v8660_v41  ;;  %v8661_v39 = vunpack.i.l.bf16 %v8660_v41  ;;  %8493 = vmatpush3.bf16.msra.mxu1 %v9552_v25 }
0x11f3   :  { %8494 = vmatprep.subr.bf16.mxu1 %v9965_v16 }
0x11f5   :  { %v3621_v55 = vpop.permute.xlu1 %3620 }
0x11ff   :  { %8639 = vrot.lane.b32.xlu0 %v8638_v20, %s8895_s28 }
0x1203   :  { %3589 = vrot.lane.b32.xlu0 %v7540_v54, %s8895_s28 }
0x1207   :  { %8654 = vrot.lane.b32.xlu0 %v8653_v42, %s8888_s20 }
0x120b   :  { %3618 = vrot.lane.b32.xlu0 %v3597_v40, %s8897_s29 }
0x120f   :  { %8664 = vrot.lane.b32.xlu0 %v8663_v47, %s8888_s20  ;;  %v9560_v47 = vpack.c.bf16 %v8662_v27, %v8661_v39 }
0x1276   :  { %v3580_v48 = vpop.xlane.xlu0 %3579 }
0x1277   :  { %v3581_v57 = vmul.f32 0.03125, %v3580_v48 }
0x1279   :  { %v3582_v0 = vadd.f32 1e-05, %v3581_v57 }
0x127a   :  { %v8640_v54 = vpop.permute.xlu0 %8639 }
0x127b   :  { %8704 = vrsqrt.f32 %v3582_v0  ;;  %v8642_v9 = vunpack.i.h.bf16 %v8640_v54  ;;  %v8641_v62 = vunpack.i.l.bf16 %v8640_v54 }
0x127d   :  { %v9543_v2 = vpack.c.bf16 %v8642_v9, %v8641_v62 }
0x127e   :  { %v9545_v31 = vpop.permute.xlu0 %3589 }
0x127f   :  { %8487 = vmatpush3.bf16.msra.mxu0 %v9543_v2 }
0x1280   :  { %8488 = vmatprep.subr.bf16.mxu0 %v9965_v16 }
0x1282   :  { %v8655_v18 = vpop.permute.xlu0 %8654 }
0x1283   :  { %8490 = vmatpush3.bf16.msra.mxu0 %v9547_v36  ;;  %v8657_v19 = vunpack.i.h.bf16 %v8655_v18  ;;  %v8656_v20 = vunpack.i.l.bf16 %v8655_v18 }
0x1284   :  { %8503 = vmatprep.subr.bf16.mxu0 %v9965_v16 }
0x1285   :  { %v8705_v42 = vpop.eup %8704  ;;  %v9555_v63 = vpack.c.bf16 %v8657_v19, %v8656_v20 }
0x1286   :  { %v3584_v40 = vmul.f32 %v8705_v42, %v3576_v11  ;;  %v3619_v44 = vpop.permute.xlu0 %3618  ;;  %v7542_v11 = vld [vmem:[%s9954_s4 + $0x6] ss:$0 sm:$0xff] }
0x1287   :  { %8496 = vmatpush3.bf16.msra.mxu1 %v9555_v63  ;;  %3735 = vrot.lane.b32.xlu1 %v7542_v11, %s8888_s20  ;;  %v9579_v9 = vsel %vm122_vm1, %v3619_v44, %v3621_v55  ;;  %v112_v55 = vld [vmem:[#allocation7 + $0x98] sm:$0xff] }
0x1288   :  { %v3588_v45 = vmul.f32 %v9541_v21, %v3584_v40  ;;  %8497 = vmatprep.subr.bf16.mxu1 %v9965_v16 }
0x128a   :  { %v3592_v48 = vadd.f32 %v9545_v31, %v3588_v45  ;;  %v8665_v56 = vpop.permute.xlu0 %8664 }
0x128b   :  { %v8667_v57 = vunpack.i.h.bf16 %v8665_v56  ;;  %v8666_v0 = vunpack.i.l.bf16 %v8665_v56  ;;  %8499 = vmatpush3.bf16.msra.mxu1 %v9560_v47  ;;  %v109_v56 = vld [vmem:[#allocation7 + $0x20] sm:$0xff] }
0x128c   :  { %8116 = vmatmul.mubr.msk.f32.vlgmr.msra.gmra.mrb[42].mxu0 %vm122_vm1, %v3592_v48  ;;  %8500 = vmatprep.subr.bf16.mxu1 %v9965_v16 }
0x128d   :  { %v9566_v54 = vpack.c.bf16 %v8667_v57, %v8666_v0  ;;  %8145 = vmatprep.mubr.msk.f32.mxu0 %vm8885_vm0, %v9961_v1  ;;  %v110_v57 = vld [vmem:[#allocation7 + $0x48] sm:$0xff] }
0x128e   :  { %v9592_v0 = vpack.c.bf16 %v110_v57, %v109_v56 }
0x128f   :  { %8502 = vmatpush3.bf16.msra.mxu1 %v9566_v54 }
0x1290   :  { %8159 = vmatprep.subr.mxu1 %v9961_v1  ;;  %8505 = vmatpush3.bf16.msra.mxu0 %v9592_v0 }
0x1291   :  { %8506 = vmatprep.subr.bf16.mxu0 %v9965_v16 }
0x12f9   :  { %v9585_v24 = vpop.permute.xlu1 %3735 }
0x12fa   :  { %9968 = vst [vmem:[#allocation15_spill] sm:$0xff] %v9585_v24 }
0x135f   :  { %v3693_v62 = vpop.f32.mrb[42].mxu0 }
0x1360   :  { %v3694_v49 = vadd.f32 %v3693_v62, %v9579_v9  ;;  %v8117_v38 = vpop.f32.mrb[43].mxu0 }
0x1362   :  { %v3697_v37 = vmax.f32 %v3694_v49, 0.0 }
0x1364   :  { %8135 = vmatmul.mubr.msk.f32.vlgmr.msra.gmra.mrb[42].mxu1 %vm1244_vm3, %v3697_v37 }
0x1365   :  { %8161 = vmatprep.mubr.msk.f32.mxu1 %vm8885_vm0, %v9961_v1 }
0x1437   :  { %v3807_v18 = vpop.f32.mrb[42].mxu1 }
0x1438   :  { %v3808_v19 = vadd.f32 %v3807_v18, %v9585_v24  ;;  %v8136_v20 = vpop.f32.mrb[43].mxu1 }
0x143a   :  { %v3811_v41 = vadd.f32 %v3808_v19, %v3592_v48  ;;  %v111_v48 = vld [vmem:[#allocation7 + $0x70] sm:$0xff] }
0x143b   :  { %v9596_v62 = vpack.c.bf16 %v112_v55, %v111_v48 }
0x143c   :  { %v3812_v42 = vsel %vm122_vm1, %v3811_v41, 0.0 }
0x143d   :  { %3813 = vadd.xlane.f32.xlu0 %v3812_v42  ;;  %8508 = vmatpush3.bf16.msra.mxu0 %v9596_v62 }
0x143e   :  { %8509 = vmatprep.subr.bf16.mxu0 %v9965_v16 }
0x1453   :  { %3825 = vrot.lane.b32.xlu0 %v7542_v11, %s8895_s28 }
0x14ca   :  { %v3814_v27 = vpop.xlane.xlu0 %3813 }
0x14cb   :  { %v3815_v39 = vmul.f32 0.03125, %v3814_v27  ;;  %v9612_v27 = vld [vmem:[#allocation2 + $0x8] sm:$0xff] }
0x14cd   :  { %v3816_v40 = vsub.f32 %v3811_v41, %v3815_v39 }
0x14ce   :  { %v9600_v18 = vpop.permute.xlu0 %3825 }
0x14cf   :  { %v3817_v44 = vmul.f32 %v3816_v40, %v3816_v40  ;;  %9969 = vst [vmem:[#allocation16_spill] sm:$0xff] %v9600_v18 }
0x14d1   :  { %v3818_v45 = vsel %vm122_vm1, %v3817_v44, 0.0 }
0x14d2   :  { %3819 = vadd.xlane.f32.xlu1 %v3818_v45  ;;  %v8748_v45 = vld [vmem:[%s9954_s4] ss:$0 sm:$0xff] }
0x14e3   :  { %3829 = vrot.lane.b32.xlu1 %v7542_v11, %s8897_s29 }
0x155f   :  { %v3820_v49 = vpop.xlane.xlu1 %3819 }
0x1560   :  { %v3821_v38 = vmul.f32 0.03125, %v3820_v49 }
0x1562   :  { %v3822_v37 = vadd.f32 1e-05, %v3821_v38 }
0x1563   :  { %v9602_v20 = vpop.permute.xlu1 %3829 }
0x1564   :  { %8706 = vrsqrt.f32 %v3822_v37  ;;  %9970 = vst [vmem:[#allocation17_spill] sm:$0xff] %v9602_v20 }
0x156e   :  { %v8707_v11 = vpop.eup %8706 }
0x156f   :  { %v3824_v19 = vmul.f32 %v8707_v11, %v3816_v40 }
0x1571   :  { %v3828_v41 = vmul.f32 %v9600_v18, %v3824_v19 }
0x1573   :  { %v3832_v42 = vadd.f32 %v9602_v20, %v3828_v41 }
0x1575   :  { %8146 = vmatmul.mubr.msk.f32.vlgmr.msra.gmra.mrb[44].mxu0 %vm122_vm1, %v3832_v42 }
0x1576   :  { %8511 = vmatpush3.bf16.msra.mxu0 %v9010_v6  ;;  %8156 = vmatprep.mubr.msk.f32.mxu0 %vm8885_vm0, %v9961_v1  ;;  %v7544_v6 = vld [vmem:[%s9954_s4 + $0x7] ss:$0 sm:$0xff] }
0x1577   :  { %8512 = vmatprep.subr.bf16.mxu0 %v9965_v16 }
0x157a   :  { %8514 = vmatpush3.bf16.msra.mxu0 %v9015_v7 }
0x157b   :  { %8169 = vmatprep.subr.mxu0 %v9961_v1 }
0x157d   :  { %8157 = vmatmul.mubr.msk.f32.vlgmr.msra.gmra.mrb[46].mxu0 %vm122_vm1, %v9612_v27 }
0x157e   :  { %8171 = vmatprep.mubr.msk.f32.mxu0 %vm8885_vm0, %v9961_v1 }
0x1648   :  { %v3908_v39 = vpop.f32.mrb[44].mxu0 }
0x1649   :  { %v3909_v40 = vadd.f32 %v7544_v6, %v3908_v39  ;;  %v8147_v44 = vpop.f32.mrb[45].mxu0 }
0x164b   :  { %3913 = vst.msk [vmem:[#allocation10] sm:$0xff] %vm3912_vm4, %v3909_v40 }
0x1650   :  { %v3987_v7 = vpop.f32.mrb[46].mxu0 }
0x1651   :  { %v3988_v56 = vadd.f32 %v8748_v45, %v3987_v7  ;;  %v8158_v57 = vpop.f32.mrb[47].mxu0 }
0x1653   :  { %4072 = vrot.lane.b32.xlu1 %v3988_v56, %s8889_s22  ;;  %3993 = vrot.lane.b32.xlu0 %v3988_v56, %s8888_s20  ;;  %v3991_v48 = vmul.f32 0.35355338, %v3988_v56 }
0x1657   :  { %4150 = vrot.lane.b32.xlu0 %v3988_v56, %s8887_s19  ;;  %4070 = vrot.lane.b32.xlu1 %v3991_v48, %s8890_s23 }
0x165b   :  { %4228 = vrot.lane.b32.xlu0 %v3988_v56, %s8891_s24  ;;  %4148 = vrot.lane.b32.xlu1 %v3991_v48, %s8892_s25 }
0x165f   :  { %4226 = vrot.lane.b32.xlu0 %v3991_v48, %s8893_s26  ;;  %4401 = vrot.lane.b32.xlu1 %v3988_v56, %s8894_s27 }
0x1663   :  { %4324 = vrot.lane.b32.xlu0 %v3988_v56, %s8895_s28  ;;  %4624 = vrot.lane.b32.xlu1 %v3988_v56, %s8896_s0 }
0x1667   :  { %4775 = vrot.lane.b32.xlu0 %v3988_v56, %s8882_s21 }
0x16c5   :  { %v4073_v55 = vpop.permute.xlu1 %4072  ;;  %v3994_v49 = vpop.permute.xlu0 %3993 }
0x16c6   :  { %8160 = vmatpush3.xpose.msk.msra.mxu1 %vm200_vm2, %v3994_v49 }
0x16c7   :  { %8164 = vmatprep.subr.mxu1 %v9961_v1 }
0x16c9   :  { %v4151_v38 = vpop.permute.xlu0 %4150  ;;  %v4071_v37 = vpop.permute.xlu1 %4070  ;;  %8162 = vmatmul.mubr.msk.f32.vlgmr.msra.gmra.mrb[44].mxu1 %vm200_vm2, %v3991_v48 }
0x16ca   :  { %8165 = vmatpush3.xpose.msk.msra.mxu1 %vm200_vm2, %v4073_v55  ;;  %8170 = vmatpush3.xpose.msk.msra.mxu0 %vm200_vm2, %v4151_v38 }
0x16cb   :  { %8166 = vmatprep.mubr.msk.f32.mxu1 %vm8885_vm0, %v9961_v1  ;;  %8174 = vmatprep.subr.mxu1 %v9961_v1 }
0x16cc   :  { %8179 = vmatprep.subr.mxu0 %v9961_v1 }
0x16cd   :  { %v4229_v11 = vpop.permute.xlu0 %4228  ;;  %v4149_v19 = vpop.permute.xlu1 %4148  ;;  %8167 = vmatmul.mubr.msk.f32.vlgmr.msra.gmra.mrb[46].mxu1 %vm200_vm2, %v4071_v37 }
0x16ce   :  { %8172 = vmatmul.mubr.msk.f32.vlgmr.msra.gmra.mrb[48].mxu0 %vm200_vm2, %v4149_v19  ;;  %8175 = vmatpush3.xpose.msk.msra.mxu1 %vm200_vm2, %v4229_v11 }
0x16cf   :  { %8176 = vmatprep.mubr.msk.f32.mxu1 %vm8885_vm0, %v9961_v1  ;;  %8184 = vmatprep.subr.mxu1 %v9961_v1 }
0x16d0   :  { %8181 = vmatprep.mubr.msk.f32.mxu0 %vm8885_vm0, %v9961_v1 }
0x16d1   :  { %v4227_v41 = vpop.permute.xlu0 %4226  ;;  %v4402_v42 = vpop.permute.xlu1 %4401 }
0x16d2   :  { %8177 = vmatmul.mubr.msk.f32.vlgmr.msra.gmra.mrb[48].mxu1 %vm200_vm2, %v4227_v41 }
0x16d3   :  { %8185 = vmatpush3.msra.mxu1 %v4402_v42  ;;  %8186 = vmatprep.mubr.msk.f32.mxu1 %vm8885_vm0, %v9961_v1 }
0x16d4   :  { %8194 = vmatprep.subr.mxu1 %v9961_v1 }
0x16d5   :  { %v4325_v6 = vpop.permute.xlu0 %4324 }
0x16d6   :  { %8180 = vmatpush3.msra.mxu0 %v4325_v6 }
0x16d7   :  { %8189 = vmatprep.subr.mxu0 %v9961_v1 }
0x179c   :  { %v4066_v39 = vpop.f32.mrb[44].mxu1 }
0x179d   :  { %v8163_v40 = vpop.f32.mrb[45].mxu1 }
0x17a0   :  { %v4144_v44 = vpop.f32.mrb[46].mxu1 }
0x17a1   :  { %v4304_v7 = vmax.f32 %v4066_v39, %v4144_v44  ;;  %v8168_v45 = vpop.f32.mrb[47].mxu1  ;;  %v4222_v56 = vpop.f32.mrb[48].mxu0 }
0x17a2   :  { %v8173_v57 = vpop.f32.mrb[49].mxu0 }
0x17a3   :  { %v4305_v48 = vmax.f32 %v4304_v7, %v4222_v56 }
0x17a5   :  { %v4300_v55 = vpop.f32.mrb[48].mxu1 }
0x17a6   :  { %v4306_v49 = vmax.f32 %v4305_v48, %v4300_v55  ;;  %v8178_v38 = vpop.f32.mrb[49].mxu1 }
0x17a7   :  { %v8750_v38 = vld [vmem:[#allocation7 + $0x18] sm:$0xff] }
0x17a8   :  { %v4307_v37 = vsub.f32 %v4066_v39, %v4306_v49  ;;  %v4310_v11 = vsub.f32 %v4144_v44, %v4306_v49  ;;  %v4313_v19 = vsub.f32 %v4222_v56, %v4306_v49  ;;  %v4316_v41 = vsub.f32 %v4300_v55, %v4306_v49 }
0x17aa   :  { %v4308_v42 = vmul.f32 1.442695, %v4307_v37  ;;  %v4311_v20 = vmul.f32 1.442695, %v4310_v11  ;;  %v4314_v6 = vmul.f32 1.442695, %v4313_v19 }
0x17ab   :  { %v4317_v1 = vmul.f32 1.442695, %v4316_v41  ;;  %v8751_v41 = vld [vmem:[#allocation7 + $0x68] sm:$0xff] }
0x17ac   :  { %8708 = vpow2.f32 %v4308_v42  ;;  %v4776_v42 = vpop.permute.xlu0 %4775 }
0x17ad   :  { %8710 = vpow2.f32 %v4311_v20  ;;  %v8749_v20 = vld [vmem:[#allocation7 + $0x40] sm:$0xff] }
0x17ae   :  { %8712 = vpow2.f32 %v4314_v6 }
0x17af   :  { %8714 = vpow2.f32 %v4317_v1  ;;  %v9971_v1 = vmov 0.0  }
0x17b6   :  { %v8709_v40 = vpop.eup %8708 }
0x17b7   :  { %v8711_v45 = vpop.eup %8710 }
0x17b8   :  { %v4319_v18 = vadd.f32 %v8711_v45, %v8709_v40  ;;  %v8713_v57 = vpop.eup %8712 }
0x17b9   :  { %v8715_v24 = vpop.eup %8714 }
0x17ba   :  { %v4320_v7 = vadd.f32 %v8713_v57, %v4319_v18  ;;  %v4625_v18 = vpop.permute.xlu1 %4624 }
0x17bc   :  { %v4321_v48 = vadd.f32 %v8715_v24, %v4320_v7 }
0x17be   :  { %8716 = vrcp.f32 %v4321_v48 }
0x17c8   :  { %v8717_v39 = vpop.eup %8716 }
0x17c9   :  { %v4323_v44 = vmul.f32 %v8717_v39, %v8709_v40  ;;  %v4400_v56 = vmul.f32 %v8717_v39, %v8711_v45  ;;  %v4623_v55 = vmul.f32 %v8717_v39, %v8713_v57  ;;  %v4774_v49 = vmul.f32 %v8717_v39, %v8715_v24 }
0x17cb   :  { %8182 = vmatmul.mubr.msk.f32.vlgmr.msra.gmra.mrb[50].mxu0 %vm200_vm2, %v4323_v44  ;;  %8187 = vmatmul.mubr.msk.f32.vlgmr.msra.gmra.mrb[50].mxu1 %vm200_vm2, %v4400_v56  ;;  %v8752_v44 = vld [vmem:[#allocation7 + $0x90] sm:$0xff] }
0x17cc   :  { %8190 = vmatpush3.msra.mxu0 %v8749_v20  ;;  %8191 = vmatprep.mubr.msk.f32.mxu0 %vm8885_vm0, %v9971_v1 }
0x17cd   :  { %8195 = vmatpush3.msra.mxu1 %v8750_v38  ;;  %8196 = vmatprep.mubr.msk.f32.mxu1 %vm8885_vm0, %v9971_v1 }
0x17ce   :  { %8199 = vmatprep.subr.mxu0 %v9971_v1  ;;  %8204 = vmatprep.subr.mxu1 %v9971_v1 }
0x189e   :  { %v4396_v24 = vpop.f32.mrb[50].mxu0  ;;  %v4473_v37 = vpop.f32.mrb[50].mxu1 }
0x189f   :  { %v8183_v11 = vpop.f32.mrb[51].mxu0  ;;  %v8188_v19 = vpop.f32.mrb[51].mxu1  ;;  %8192 = vmatmul.mubr.msk.f32.vlgmr.msra.gmra.mrb[52].mxu0 %vm200_vm2, %v4473_v37  ;;  %8197 = vmatmul.mubr.msk.f32.vlgmr.msra.gmra.mrb[52].mxu1 %vm200_vm2, %v4396_v24 }
0x18a0   :  { %8200 = vmatpush3.msra.mxu0 %v4625_v18  ;;  %8201 = vmatprep.mubr.msk.f32.mxu0 %vm8885_vm0, %v9971_v1 }
0x18a1   :  { %8209 = vmatprep.subr.mxu0 %v9971_v1  ;;  %8205 = vmatpush3.msra.mxu1 %v8751_v41 }
0x18a2   :  { %8206 = vmatprep.mubr.msk.f32.mxu1 %vm8885_vm0, %v9971_v1  ;;  %8214 = vmatprep.subr.mxu1 %v9971_v1 }
0x18a3   :  { %8202 = vmatmul.mubr.msk.f32.vlgmr.msra.gmra.mrb[54].mxu0 %vm200_vm2, %v4623_v55 }
0x18a4   :  { %8210 = vmatpush3.msra.mxu0 %v4776_v42  ;;  %8211 = vmatprep.mubr.msk.f32.mxu0 %vm8885_vm0, %v9971_v1 }
0x18a5   :  { %8515 = vmatprep.subr.bf16.mxu0 %v9965_v16 }
0x18a7   :  { %8212 = vmatmul.mubr.msk.f32.vlgmr.msra.gmra.mrb[56].mxu0 %vm200_vm2, %v4774_v49 }
0x18a8   :  { %8517 = vmatpush3.bf16.msra.mxu0 %v9148_v5  ;;  %8227 = vmatprep.mubr.msk.f32.mxu0 %vm8885_vm0, %v9971_v1 }
0x18a9   :  { %8518 = vmatprep.subr.bf16.mxu0 %v9965_v16 }
0x18ac   :  { %8520 = vmatpush3.bf16.msra.mxu0 %v9158_v4 }
0x18ad   :  { %8533 = vmatprep.subr.bf16.mxu0 %v9965_v16 }
0x1972   :  { %v4546_v6 = vpop.f32.mrb[52].mxu0  ;;  %v4619_v40 = vpop.f32.mrb[52].mxu1 }
0x1973   :  { %v4620_v45 = vadd.f32 %v4619_v40, %v4546_v6  ;;  %v8193_v57 = vpop.f32.mrb[53].mxu0  ;;  %v8198_v7 = vpop.f32.mrb[53].mxu1 }
0x1974   :  { %v9718_v7 = vld [vmem:[#allocation5 + $0x8] sm:$0xff] }
0x1976   :  { %v4696_v48 = vpop.f32.mrb[54].mxu0 }
0x1977   :  { %v8203_v39 = vpop.f32.mrb[55].mxu0  ;;  %8207 = vmatmul.mubr.msk.f32.vlgmr.msra.gmra.mrb[54].mxu1 %vm200_vm2, %v4696_v48 }
0x1978   :  { %8215 = vmatpush3.msra.mxu1 %v8752_v44  ;;  %8216 = vmatprep.mubr.msk.f32.mxu1 %vm8885_vm0, %v9971_v1 }
0x1979   :  { %8521 = vmatprep.subr.bf16.mxu1 %v9965_v16 }
0x197a   :  { %v4847_v5 = vpop.f32.mrb[56].mxu0 }
0x197b   :  { %v8213_v4 = vpop.f32.mrb[57].mxu0  ;;  %8217 = vmatmul.mubr.msk.f32.vlgmr.msra.gmra.mrb[56].mxu1 %vm200_vm2, %v4847_v5 }
0x197c   :  { %8523 = vmatpush3.bf16.msra.mxu1 %v9168_v46  ;;  %8246 = vmatprep.mubr.msk.f32.mxu1 %vm8885_vm0, %v9971_v1 }
0x197d   :  { %8524 = vmatprep.subr.bf16.mxu1 %v9965_v16 }
0x1980   :  { %8526 = vmatpush3.bf16.msra.mxu1 %v9182_v51 }
0x1981   :  { %8527 = vmatprep.subr.bf16.mxu1 %v9965_v16 }
0x1984   :  { %8529 = vmatpush3.bf16.msra.mxu1 %v9198_v60 }
0x1985   :  { %8530 = vmatprep.subr.bf16.mxu1 %v9965_v16 }
0x1988   :  { %8532 = vmatpush3.bf16.msra.mxu1 %v9241_v43 }
0x1989   :  { %8265 = vmatprep.subr.mxu1 %v9971_v1 }
0x1a4a   :  { %v4769_v56 = vpop.f32.mrb[54].mxu1 }
0x1a4b   :  { %v4773_v55 = vadd.f32 %v4769_v56, %v4620_v45  ;;  %v8208_v46 = vpop.f32.mrb[55].mxu1 }
0x1a4e   :  { %v4920_v49 = vpop.f32.mrb[56].mxu1 }
0x1a4f   :  { %v4924_v20 = vadd.f32 %v4920_v49, %v4773_v55  ;;  %v8218_v38 = vpop.f32.mrb[57].mxu1 }
0x1a51   :  { %v4925_v18 = vadd.f32 %v4924_v20, %v9114_v23  ;;  %v8753_v23 = vld [vmem:[%s9954_s4 + $0x1] ss:$0 sm:$0xff] }
0x1a53   :  { %v4926_v51 = vadd.f32 %v4925_v18, %v9612_v27 }
0x1a55   :  { %v4927_v24 = vsel %vm122_vm1, %v4926_v51, 0.0 }
0x1a56   :  { %4928 = vadd.xlane.f32.xlu1 %v4927_v24  ;;  %v8754_v24 = vld [vmem:[%s9954_s4 + $0x2] ss:$0 sm:$0xff] }
0x1ae3   :  { %v4929_v60 = vpop.xlane.xlu1 %4928 }
0x1ae4   :  { %v4930_v37 = vmul.f32 0.03125, %v4929_v60 }
0x1ae6   :  { %v4931_v11 = vsub.f32 %v4926_v51, %v4930_v37 }
0x1ae8   :  { %v4932_v19 = vmul.f32 %v4931_v11, %v4931_v11 }
0x1aea   :  { %v4933_v43 = vsel %vm122_vm1, %v4932_v19, 0.0 }
0x1aeb   :  { %4934 = vadd.xlane.f32.xlu0 %v4933_v43 }
0x1b78   :  { %v4935_v41 = vpop.xlane.xlu0 %4934 }
0x1b79   :  { %v4936_v42 = vmul.f32 0.03125, %v4935_v41 }
0x1b7b   :  { %v4937_v6 = vadd.f32 1e-05, %v4936_v42 }
0x1b7d   :  { %8718 = vrsqrt.f32 %v4937_v6 }
0x1b87   :  { %v8719_v40 = vpop.eup %8718 }
0x1b88   :  { %v4939_v45 = vmul.f32 %v8719_v40, %v4931_v11 }
0x1b8a   :  { %v4940_v27 = vmul.f32 %v8753_v23, %v4939_v45 }
0x1b8c   :  { %v9709_v57 = vadd.f32 %v4940_v27, %v9207_v14 }
0x1b8e   :  { %8228 = vmatmul.mubr.msk.f32.vlgmr.msra.gmra.mrb[58].mxu0 %vm122_vm1, %v9709_v57 }
0x1b8f   :  { %8535 = vmatpush3.bf16.msra.mxu0 %v9217_v35  ;;  %8257 = vmatprep.mubr.msk.f32.mxu0 %vm8885_vm0, %v9971_v1 }
0x1b90   :  { %8536 = vmatprep.subr.bf16.mxu0 %v9965_v16 }
0x1b93   :  { %8538 = vmatpush3.bf16.msra.mxu0 %v9222_v3 }
0x1b94   :  { %8260 = vmatprep.subr.mxu0 %v9971_v1 }
0x1b96   :  { %8258 = vmatmul.mubr.msk.f32.vlgmr.msra.gmra.mrb[60].mxu0 %vm122_vm1, %v9718_v7 }
0x1b97   :  { %8262 = vmatprep.mubr.msk.f32.mxu0 %vm8885_vm0, %v9971_v1 }
0x1c61   :  { %v5011_v14 = vpop.f32.mrb[58].mxu0 }
0x1c62   :  { %v5012_v35 = vadd.f32 %v5011_v14, %v9245_v58  ;;  %v8229_v48 = vpop.f32.mrb[59].mxu0 }
0x1c64   :  { %v5015_v39 = vmax.f32 %v5012_v35, 0.0 }
0x1c66   :  { %8247 = vmatmul.mubr.msk.f32.vlgmr.msra.gmra.mrb[58].mxu1 %vm1244_vm3, %v5015_v39 }
0x1c67   :  { %8267 = vmatprep.mubr.msk.f32.mxu1 %vm8885_vm0, %v9971_v1 }
0x1c69   :  { %v5174_v3 = vpop.f32.mrb[60].mxu0 }
0x1c6a   :  { %v5175_v44 = vadd.f32 %v5174_v3, %v9250_v13  ;;  %v8259_v5 = vpop.f32.mrb[61].mxu0 }
0x1c6c   :  { %5259 = vrot.lane.b32.xlu1 %v5175_v44, %s8889_s22  ;;  %5180 = vrot.lane.b32.xlu0 %v5175_v44, %s8888_s20  ;;  %v5178_v4 = vmul.f32 0.35355338, %v5175_v44 }
0x1c70   :  { %5337 = vrot.lane.b32.xlu1 %v5175_v44, %s8887_s19  ;;  %5257 = vrot.lane.b32.xlu0 %v5178_v4, %s8890_s23 }
0x1c74   :  { %5415 = vrot.lane.b32.xlu1 %v5175_v44, %s8891_s24  ;;  %5335 = vrot.lane.b32.xlu0 %v5178_v4, %s8892_s25 }
0x1c78   :  { %5413 = vrot.lane.b32.xlu1 %v5178_v4, %s8893_s26  ;;  %5588 = vrot.lane.b32.xlu0 %v5175_v44, %s8894_s27 }
0x1c7c   :  { %5511 = vrot.lane.b32.xlu1 %v5175_v44, %s8895_s28  ;;  %5811 = vrot.lane.b32.xlu0 %v5175_v44, %s8896_s0 }
0x1c80   :  { %5962 = vrot.lane.b32.xlu1 %v5175_v44, %s8882_s21 }
0x1cde   :  { %v5260_v58 = vpop.permute.xlu1 %5259  ;;  %v5181_v13 = vpop.permute.xlu0 %5180 }
0x1cdf   :  { %8261 = vmatpush3.xpose.msk.msra.mxu0 %vm200_vm2, %v5181_v13  ;;  %8266 = vmatpush3.xpose.msk.msra.mxu1 %vm200_vm2, %v5260_v58 }
0x1ce0   :  { %8270 = vmatprep.subr.mxu0 %v9971_v1  ;;  %8275 = vmatprep.subr.mxu1 %v9971_v1 }
0x1ce2   :  { %v5338_v56 = vpop.permute.xlu1 %5337  ;;  %v5258_v55 = vpop.permute.xlu0 %5257  ;;  %8263 = vmatmul.mubr.msk.f32.vlgmr.msra.gmra.mrb[62].mxu0 %vm200_vm2, %v5178_v4 }
0x1ce3   :  { %8268 = vmatmul.mubr.msk.f32.vlgmr.msra.gmra.mrb[60].mxu1 %vm200_vm2, %v5258_v55  ;;  %8271 = vmatpush3.xpose.msk.msra.mxu0 %vm200_vm2, %v5338_v56 }
0x1ce4   :  { %8272 = vmatprep.mubr.msk.f32.mxu0 %vm8885_vm0, %v9971_v1  ;;  %8277 = vmatprep.mubr.msk.f32.mxu1 %vm8885_vm0, %v9971_v1 }
0x1ce5   :  { %8280 = vmatprep.subr.mxu0 %v9971_v1 }
0x1ce6   :  { %v5416_v46 = vpop.permute.xlu1 %5415  ;;  %v5336_v49 = vpop.permute.xlu0 %5335 }
0x1ce7   :  { %8273 = vmatmul.mubr.msk.f32.vlgmr.msra.gmra.mrb[64].mxu0 %vm200_vm2, %v5336_v49  ;;  %8276 = vmatpush3.xpose.msk.msra.mxu1 %vm200_vm2, %v5416_v46 }
0x1ce8   :  { %8285 = vmatprep.subr.mxu1 %v9971_v1  ;;  %8282 = vmatprep.mubr.msk.f32.mxu0 %vm8885_vm0, %v9971_v1 }
0x1cea   :  { %v5414_v20 = vpop.permute.xlu1 %5413  ;;  %v5589_v38 = vpop.permute.xlu0 %5588 }
0x1ceb   :  { %8278 = vmatmul.mubr.msk.f32.vlgmr.msra.gmra.mrb[62].mxu1 %vm200_vm2, %v5414_v20 }
0x1cec   :  { %8286 = vmatpush3.msra.mxu1 %v5589_v38  ;;  %8287 = vmatprep.mubr.msk.f32.mxu1 %vm8885_vm0, %v9971_v1 }
0x1ced   :  { %8295 = vmatprep.subr.mxu1 %v9971_v1 }
0x1cee   :  { %v5512_v18 = vpop.permute.xlu1 %5511  ;;  %v5812_v56 = vpop.permute.xlu0 %5811 }
0x1cef   :  { %8281 = vmatpush3.msra.mxu0 %v5512_v18 }
0x1cf0   :  { %8290 = vmatprep.subr.mxu0 %v9971_v1 }
0x1d39   :  { %v5085_v51 = vpop.f32.mrb[58].mxu1 }
0x1d3a   :  { %v5086_v60 = vadd.f32 %v8754_v24, %v5085_v51  ;;  %v8248_v37 = vpop.f32.mrb[59].mxu1 }
0x1d3c   :  { %v5089_v11 = vadd.f32 %v5086_v60, %v9709_v57 }
0x1d3e   :  { %v5090_v19 = vsel %vm122_vm1, %v5089_v11, 0.0 }
0x1d3f   :  { %5091 = vadd.xlane.f32.xlu0 %v5090_v19 }
0x1db5   :  { %v5253_v43 = vpop.f32.mrb[62].mxu0 }
0x1db6   :  { %v8264_v41 = vpop.f32.mrb[63].mxu0  ;;  %v5331_v42 = vpop.f32.mrb[60].mxu1 }
0x1db7   :  { %v5491_v6 = vmax.f32 %v5253_v43, %v5331_v42  ;;  %v8269_v40 = vpop.f32.mrb[61].mxu1 }
0x1dba   :  { %v5409_v45 = vpop.f32.mrb[64].mxu0 }
0x1dbb   :  { %v5492_v23 = vmax.f32 %v5491_v6, %v5409_v45  ;;  %v8274_v27 = vpop.f32.mrb[65].mxu0 }
0x1dbe   :  { %v5487_v14 = vpop.f32.mrb[62].mxu1 }
0x1dbf   :  { %v5493_v35 = vmax.f32 %v5492_v23, %v5487_v14  ;;  %v8279_v48 = vpop.f32.mrb[63].mxu1 }
0x1dc1   :  { %v5494_v39 = vsub.f32 %v5253_v43, %v5493_v35  ;;  %v5497_v3 = vsub.f32 %v5331_v42, %v5493_v35  ;;  %v5500_v44 = vsub.f32 %v5409_v45, %v5493_v35  ;;  %v5503_v5 = vsub.f32 %v5487_v14, %v5493_v35 }
0x1dc3   :  { %v5495_v4 = vmul.f32 1.442695, %v5494_v39  ;;  %v5498_v57 = vmul.f32 1.442695, %v5497_v3  ;;  %v5501_v58 = vmul.f32 1.442695, %v5500_v44 }
0x1dc4   :  { %v5504_v13 = vmul.f32 1.442695, %v5503_v5 }
0x1dc5   :  { %8720 = vpow2.f32 %v5495_v4 }
0x1dc6   :  { %8722 = vpow2.f32 %v5498_v57 }
0x1dc7   :  { %8724 = vpow2.f32 %v5501_v58 }
0x1dc8   :  { %8726 = vpow2.f32 %v5504_v13 }
0x1dcc   :  { %v5092_v55 = vpop.xlane.xlu0 %5091 }
0x1dcd   :  { %v5093_v46 = vmul.f32 0.03125, %v5092_v55 }
0x1dcf   :  { %v8721_v49 = vpop.eup %8720  ;;  %v5094_v20 = vsub.f32 %v5089_v11, %v5093_v46 }
0x1dd0   :  { %v8723_v38 = vpop.eup %8722 }
0x1dd1   :  { %v5506_v18 = vadd.f32 %v8723_v38, %v8721_v49  ;;  %v5095_v51 = vmul.f32 %v5094_v20, %v5094_v20  ;;  %v8725_v24 = vpop.eup %8724 }
0x1dd2   :  { %v8727_v19 = vpop.eup %8726 }
0x1dd3   :  { %v5507_v60 = vadd.f32 %v8725_v24, %v5506_v18  ;;  %v5096_v37 = vsel %vm122_vm1, %v5095_v51, 0.0 }
0x1dd4   :  { %5097 = vadd.xlane.f32.xlu0 %v5096_v37 }
0x1dd5   :  { %v5508_v43 = vadd.f32 %v8727_v19, %v5507_v60 }
0x1dd7   :  { %8728 = vrcp.f32 %v5508_v43 }
0x1de1   :  { %v8729_v41 = vpop.eup %8728 }
0x1de2   :  { %v5510_v42 = vmul.f32 %v8729_v41, %v8721_v49  ;;  %v5587_v6 = vmul.f32 %v8729_v41, %v8723_v38  ;;  %v5810_v40 = vmul.f32 %v8729_v41, %v8725_v24  ;;  %v5961_v45 = vmul.f32 %v8729_v41, %v8727_v19 }
0x1de4   :  { %8283 = vmatmul.mubr.msk.f32.vlgmr.msra.gmra.mrb[66].mxu0 %vm200_vm2, %v5510_v42  ;;  %8288 = vmatmul.mubr.msk.f32.vlgmr.msra.gmra.mrb[64].mxu1 %vm200_vm2, %v5587_v6 }
0x1de5   :  { %8291 = vmatpush3.msra.mxu0 %v9313_v50  ;;  %8296 = vmatpush3.msra.mxu1 %v9304_v22  ;;  %v5963_v22 = vpop.permute.xlu1 %5962 }
0x1de6   :  { %8292 = vmatprep.mubr.msk.f32.mxu0 %vm8885_vm0, %v9971_v1  ;;  %8297 = vmatprep.mubr.msk.f32.mxu1 %vm8885_vm0, %v9971_v1 }
0x1de7   :  { %8300 = vmatprep.subr.mxu0 %v9971_v1  ;;  %8305 = vmatprep.subr.mxu1 %v9971_v1 }
0x1e61   :  { %v5098_v50 = vpop.xlane.xlu0 %5097 }
0x1eb7   :  { %v5583_v11 = vpop.f32.mrb[66].mxu0  ;;  %v5660_v23 = vpop.f32.mrb[64].mxu1 }
0x1eb8   :  { %v8284_v27 = vpop.f32.mrb[67].mxu0  ;;  %v8289_v14 = vpop.f32.mrb[65].mxu1  ;;  %8293 = vmatmul.mubr.msk.f32.vlgmr.msra.gmra.mrb[68].mxu0 %vm200_vm2, %v5660_v23  ;;  %8298 = vmatmul.mubr.msk.f32.vlgmr.msra.gmra.mrb[66].mxu1 %vm200_vm2, %v5583_v11  ;;  %v8755_v11 = vld [vmem:[%s9954_s4 + $0x4] ss:$0 sm:$0xff] }
0x1eb9   :  { %8301 = vmatpush3.msra.mxu0 %v5812_v56  ;;  %8306 = vmatpush3.msra.mxu1 %v9325_v34  ;;  %v5099_v34 = vmul.f32 0.03125, %v5098_v50 }
0x1eba   :  { %8302 = vmatprep.mubr.msk.f32.mxu0 %vm8885_vm0, %v9971_v1  ;;  %8310 = vmatprep.subr.mxu0 %v9971_v1 }
0x1ebb   :  { %8307 = vmatprep.mubr.msk.f32.mxu1 %vm8885_vm0, %v9971_v1  ;;  %8315 = vmatprep.subr.mxu1 %v9971_v1  ;;  %v5100_v35 = vadd.f32 1e-05, %v5099_v34 }
0x1ebc   :  { %8303 = vmatmul.mubr.msk.f32.vlgmr.msra.gmra.mrb[70].mxu0 %vm200_vm2, %v5810_v40 }
0x1ebd   :  { %8311 = vmatpush3.msra.mxu0 %v5963_v22  ;;  %8312 = vmatprep.mubr.msk.f32.mxu0 %vm8885_vm0, %v9971_v1  ;;  %8730 = vrsqrt.f32 %v5100_v35 }
0x1ebe   :  { %8539 = vmatprep.subr.bf16.mxu0 %v9965_v16 }
0x1ec0   :  { %8313 = vmatmul.mubr.msk.f32.vlgmr.msra.gmra.mrb[72].mxu0 %vm200_vm2, %v5961_v45 }
0x1ec1   :  { %8541 = vmatpush3.bf16.msra.mxu0 %v9372_v8  ;;  %8328 = vmatprep.mubr.msk.f32.mxu0 %vm8885_vm0, %v9971_v1 }
0x1ec2   :  { %8542 = vmatprep.subr.bf16.mxu0 %v9965_v16 }
0x1ec5   :  { %8544 = vmatpush3.bf16.msra.mxu0 %v9399_v28 }
0x1ec6   :  { %8342 = vmatprep.subr.mxu0 %v9971_v1 }
0x1ec7   :  { %v8731_v4 = vpop.eup %8730 }
0x1ec8   :  { %v5102_v28 = vmul.f32 %v8731_v4, %v5094_v20 }
0x1eca   :  { %v5103_v56 = vmul.f32 %v5102_v28, %v9395_v29 }
0x1f8b   :  { %v5733_v48 = vpop.f32.mrb[68].mxu0  ;;  %v5806_v39 = vpop.f32.mrb[66].mxu1 }
0x1f8c   :  { %v5807_v3 = vadd.f32 %v5806_v39, %v5733_v48  ;;  %v8294_v44 = vpop.f32.mrb[69].mxu0  ;;  %v8299_v5 = vpop.f32.mrb[67].mxu1 }
0x1f8f   :  { %v5883_v8 = vpop.f32.mrb[70].mxu0 }
0x1f90   :  { %v8304_v57 = vpop.f32.mrb[71].mxu0  ;;  %8308 = vmatmul.mubr.msk.f32.vlgmr.msra.gmra.mrb[68].mxu1 %vm200_vm2, %v5883_v8 }
0x1f91   :  { %8316 = vmatpush3.msra.mxu1 %v9306_v59  ;;  %8317 = vmatprep.mubr.msk.f32.mxu1 %vm8885_vm0, %v9971_v1  ;;  %v5104_v59 = vadd.f32 %v5103_v56, %v9401_v10 }
0x1f92   :  { %8545 = vmatprep.subr.bf16.mxu1 %v9965_v16 }
0x1f93   :  { %v6034_v58 = vpop.f32.mrb[72].mxu0 }
0x1f94   :  { %v8314_v13 = vpop.f32.mrb[73].mxu0  ;;  %8318 = vmatmul.mubr.msk.f32.vlgmr.msra.gmra.mrb[70].mxu1 %vm200_vm2, %v6034_v58 }
0x1f95   :  { %8547 = vmatpush3.bf16.msra.mxu1 %v9376_v33  ;;  %8339 = vmatprep.mubr.msk.f32.mxu1 %vm8885_vm0, %v9971_v1 }
0x1f96   :  { %8548 = vmatprep.subr.bf16.mxu1 %v9965_v16 }
0x1f99   :  { %8550 = vmatpush3.bf16.msra.mxu1 %v9381_v61 }
0x1f9a   :  { %8347 = vmatprep.subr.mxu1 %v9971_v1 }
0x1f9c   :  { %8340 = vmatmul.mubr.msk.f32.vlgmr.msra.gmra.mrb[72].mxu1 %vm122_vm1, %v5104_v59 }
0x1f9d   :  { %8349 = vmatprep.mubr.msk.f32.mxu1 %vm8885_vm0, %v9971_v1 }
0x2063   :  { %v5956_v55 = vpop.f32.mrb[68].mxu1 }
0x2064   :  { %v5960_v33 = vadd.f32 %v5956_v55, %v5807_v3  ;;  %v8309_v46 = vpop.f32.mrb[69].mxu1 }
0x2067   :  { %v6107_v49 = vpop.f32.mrb[70].mxu1 }
0x2068   :  { %v6111_v20 = vadd.f32 %v6107_v49, %v5960_v33  ;;  %v8319_v38 = vpop.f32.mrb[71].mxu1 }
0x206a   :  { %v6112_v18 = vadd.f32 %v6111_v20, %v9358_v12 }
0x206c   :  { %v6113_v29 = vadd.f32 %v6112_v18, %v9718_v7 }
0x206e   :  { %v6114_v61 = vsel %vm122_vm1, %v6113_v29, 0.0 }
0x206f   :  { %v6272_v10 = vpop.f32.mrb[72].mxu1  ;;  %6115 = vadd.xlane.f32.xlu1 %v6114_v61 }
0x2070   :  { %v8341_v51 = vpop.f32.mrb[73].mxu1  ;;  %v6273_v24 = vadd.f32 %v6272_v10, %v9418_v17 }
0x2080   :  { %6354 = vrot.lane.b32.xlu1 %v6273_v24, %s8890_s23 }
0x2084   :  { %6510 = vrot.lane.b32.xlu1 %v6273_v24, %s8893_s26 }
0x20fc   :  { %v6116_v60 = vpop.xlane.xlu1 %6115 }
0x20fd   :  { %v6117_v37 = vmul.f32 0.03125, %v6116_v60 }
0x20ff   :  { %v6118_v19 = vsub.f32 %v6113_v29, %v6117_v37 }
0x2100   :  { %v6355_v43 = vpop.permute.xlu1 %6354 }
0x2101   :  { %8348 = vmatpush3.xpose.msk.msra.mxu1 %vm200_vm2, %v6355_v43  ;;  %v6119_v12 = vmul.f32 %v6118_v19, %v6118_v19 }
0x2102   :  { %8357 = vmatprep.subr.mxu1 %v9971_v1 }
0x2103   :  { %v6120_v7 = vsel %vm122_vm1, %v6119_v12, 0.0 }
0x2104   :  { %6121 = vadd.xlane.f32.xlu0 %v6120_v7 }
0x211a   :  { %6432 = vrot.lane.b32.xlu0 %v6273_v24, %s8892_s25 }
0x2191   :  { %v6122_v41 = vpop.xlane.xlu0 %6121 }
0x2192   :  { %v6123_v17 = vmul.f32 0.03125, %v6122_v41 }
0x2194   :  { %v6124_v42 = vadd.f32 1e-05, %v6123_v17 }
0x2195   :  { %v6433_v50 = vpop.permute.xlu0 %6432 }
0x2196   :  { %8732 = vrsqrt.f32 %v6124_v42 }
0x21a0   :  { %v8733_v6 = vpop.eup %8732 }
0x21a1   :  { %v6126_v40 = vmul.f32 %v8733_v6, %v6118_v19 }
0x21a3   :  { %v6127_v45 = vmul.f32 %v6126_v40, %v9409_v15 }
0x21a5   :  { %v9830_v23 = vadd.f32 %v8755_v11, %v6127_v45 }
0x21a7   :  { %8329 = vmatmul.mubr.msk.f32.vlgmr.msra.gmra.mrb[74].mxu0 %vm122_vm1, %v9830_v23 }
0x21a8   :  { %8343 = vmatpush3.xpose.msk.msra.mxu0 %vm200_vm2, %v6273_v24  ;;  %8344 = vmatprep.mubr.msk.f32.mxu0 %vm8885_vm0, %v9971_v1 }
0x21a9   :  { %8352 = vmatprep.subr.mxu0 %v9971_v1 }
0x227a   :  { %v6198_v27 = vpop.f32.mrb[74].mxu0 }
0x227b   :  { %v6199_v14 = vadd.f32 %v6198_v27, %v9426_v32  ;;  %v8330_v15 = vpop.f32.mrb[75].mxu0  ;;  %v6511_v32 = vpop.permute.xlu1 %6510 }
0x227d   :  { %v6202_v22 = vmul.f32 0.35355338, %v6199_v14 }
0x227f   :  { %6430 = vrot.lane.b32.xlu0 %v6202_v22, %s8892_s25  ;;  %6352 = vrot.lane.b32.xlu1 %v6202_v22, %s8890_s23 }
0x2280   :  { %8345 = vmatmul.mubr.msk.f32.vlgmr.msra.gmra.mrb[76].mxu0 %vm200_vm2, %v6202_v22 }
0x2281   :  { %8353 = vmatpush3.xpose.msk.msra.mxu0 %vm200_vm2, %v6433_v50  ;;  %8354 = vmatprep.mubr.msk.f32.mxu0 %vm8885_vm0, %v9971_v1 }
0x2282   :  { %8362 = vmatprep.subr.mxu0 %v9971_v1 }
0x2283   :  { %6683 = vrot.lane.b32.xlu0 %v6273_v24, %s8889_s22  ;;  %6508 = vrot.lane.b32.xlu1 %v6202_v22, %s8893_s26  ;;  %s8898_s22 = smov [#allocation10]  }
0x2284   :  { %s7467_s23 = sshll.u32 %s8898_s22, 4  ;;  %s7468_s23 = int_to_ptr.vmem [resolvable:$true] %s7467_s23 }
0x2285   :  { %s8846_s26 = scalar_lea.vmem %s7468_s23, 256  ;;  %p8851_p5 = scmp.lt.s32.totalorder %s7468_s23, %s7468_s23 }
0x2286   :  { %p8847_p4 = scmp.ne.s32.totalorder %s7468_s23, %s8846_s26  ;;  %p8852_p6 = scmp.lt.s32.totalorder %s8846_s26, %s8846_s26 }
0x2287   :  { %6906 = vrot.lane.b32.xlu0 %v6273_v24, %s8887_s19  ;;  %6606 = vrot.lane.b32.xlu1 %v6273_v24, %s8888_s20 }
0x2288   :  { %p8853_p7 = por %p8852_p6, %p8851_p5 }
0x228a   :  { %p8854_p8 = pnand %p8853_p7, %p8847_p4 }
0x228b   :  { %7057 = vrot.lane.b32.xlu1 %v6273_v24, %s8891_s24 }
0x22f1   :  { %v6431_v34 = vpop.permute.xlu0 %6430  ;;  %v6353_v35 = vpop.permute.xlu1 %6352 }
0x22f2   :  { %8350 = vmatmul.mubr.msk.f32.vlgmr.msra.gmra.mrb[74].mxu1 %vm200_vm2, %v6353_v35  ;;  %8355 = vmatmul.mubr.msk.f32.vlgmr.msra.gmra.mrb[78].mxu0 %vm200_vm2, %v6431_v34 }
0x22f3   :  { %8358 = vmatpush3.xpose.msk.msra.mxu1 %vm200_vm2, %v6511_v32  ;;  %8359 = vmatprep.mubr.msk.f32.mxu1 %vm8885_vm0, %v9971_v1 }
0x22f4   :  { %8367 = vmatprep.subr.mxu1 %v9971_v1  ;;  %8364 = vmatprep.mubr.msk.f32.mxu0 %vm8885_vm0, %v9971_v1 }
0x22f5   :  { %v6684_v48 = vpop.permute.xlu0 %6683  ;;  %v6509_v39 = vpop.permute.xlu1 %6508 }
0x22f6   :  { %8360 = vmatmul.mubr.msk.f32.vlgmr.msra.gmra.mrb[76].mxu1 %vm200_vm2, %v6509_v39 }
0x22f7   :  { %8368 = vmatpush3.msra.mxu1 %v6684_v48  ;;  %8369 = vmatprep.mubr.msk.f32.mxu1 %vm8885_vm0, %v9971_v1 }
0x22f8   :  { %8377 = vmatprep.subr.mxu1 %v9971_v1 }
0x22f9   :  { %v6607_v3 = vpop.permute.xlu1 %6606  ;;  %v6907_v6 = vpop.permute.xlu0 %6906 }
0x22fa   :  { %8363 = vmatpush3.msra.mxu0 %v6607_v3  ;;  %v8756_v3 = vld [vmem:[%s9954_s4 + $0x5] ss:$0 sm:$0xff] }
0x22fb   :  { %8372 = vmatprep.subr.mxu0 %v9971_v1 }
0x2353   :  { %v6348_v44 = vpop.f32.mrb[76].mxu0 }
0x2354   :  { %v8346_v5 = vpop.f32.mrb[77].mxu0 }
0x23c5   :  { %v6426_v4 = vpop.f32.mrb[74].mxu1  ;;  %v6504_v8 = vpop.f32.mrb[78].mxu0 }
0x23c6   :  { %v6586_v57 = vmax.f32 %v6348_v44, %v6426_v4  ;;  %v8351_v28 = vpop.f32.mrb[75].mxu1  ;;  %v8356_v58 = vpop.f32.mrb[79].mxu0 }
0x23c8   :  { %v6587_v13 = vmax.f32 %v6586_v57, %v6504_v8 }
0x23c9   :  { %v6582_v56 = vpop.f32.mrb[76].mxu1 }
0x23ca   :  { %v6588_v59 = vmax.f32 %v6587_v13, %v6582_v56  ;;  %v8361_v55 = vpop.f32.mrb[77].mxu1 }
0x23cc   :  { %v6589_v33 = vsub.f32 %v6348_v44, %v6588_v59  ;;  %v6592_v46 = vsub.f32 %v6426_v4, %v6588_v59  ;;  %v6595_v49 = vsub.f32 %v6504_v8, %v6588_v59  ;;  %v6598_v20 = vsub.f32 %v6582_v56, %v6588_v59 }
0x23ce   :  { %v6590_v38 = vmul.f32 1.442695, %v6589_v33  ;;  %v6593_v18 = vmul.f32 1.442695, %v6592_v46  ;;  %v6596_v29 = vmul.f32 1.442695, %v6595_v49 }
0x23cf   :  { %v6599_v61 = vmul.f32 1.442695, %v6598_v20 }
0x23d0   :  { %8734 = vpow2.f32 %v6590_v38 }
0x23d1   :  { %8736 = vpow2.f32 %v6593_v18 }
0x23d2   :  { %8738 = vpow2.f32 %v6596_v29 }
0x23d3   :  { %8740 = vpow2.f32 %v6599_v61 }
0x23da   :  { %v8735_v10 = vpop.eup %8734 }
0x23db   :  { %v8737_v51 = vpop.eup %8736 }
0x23dc   :  { %v6601_v24 = vadd.f32 %v8737_v51, %v8735_v10  ;;  %v8739_v60 = vpop.eup %8738 }
0x23dd   :  { %v8741_v19 = vpop.eup %8740 }
0x23de   :  { %v6602_v37 = vadd.f32 %v8739_v60, %v6601_v24 }
0x23e0   :  { %v6603_v43 = vadd.f32 %v8741_v19, %v6602_v37 }
0x23e2   :  { %8742 = vrcp.f32 %v6603_v43 }
0x23ec   :  { %v8743_v12 = vpop.eup %8742 }
0x23ed   :  { %v6605_v7 = vmul.f32 %v8743_v12, %v8735_v10  ;;  %v6682_v41 = vmul.f32 %v8743_v12, %v8737_v51  ;;  %v6905_v17 = vmul.f32 %v8743_v12, %v8739_v60  ;;  %v7056_v42 = vmul.f32 %v8743_v12, %v8741_v19  ;;  %v9973_v19 = vld [vmem:[#allocation16_spill] sm:$0xff]  ;;  %v9974_v12 = vld [vmem:[#allocation17_spill] sm:$0xff] }
0x23ef   :  { %8365 = vmatmul.mubr.msk.f32.vlgmr.msra.gmra.mrb[80].mxu0 %vm200_vm2, %v6605_v7  ;;  %8370 = vmatmul.mubr.msk.f32.vlgmr.msra.gmra.mrb[78].mxu1 %vm200_vm2, %v6682_v41 }
0x23f0   :  { %8373 = vmatpush3.msra.mxu0 %v9466_v52  ;;  %8378 = vmatpush3.msra.mxu1 %v9464_v30  ;;  %v7058_v30 = vpop.permute.xlu1 %7057 }
0x23f1   :  { %8374 = vmatprep.mubr.msk.f32.mxu0 %vm8885_vm0, %v9971_v1  ;;  %8379 = vmatprep.mubr.msk.f32.mxu1 %vm8885_vm0, %v9971_v1 }
0x23f2   :  { %8382 = vmatprep.subr.mxu0 %v9971_v1  ;;  %8387 = vmatprep.subr.mxu1 %v9971_v1 }
0x24c2   :  { %v6678_v40 = vpop.f32.mrb[80].mxu0  ;;  %v6755_v45 = vpop.f32.mrb[78].mxu1 }
0x24c3   :  { %v8366_v11 = vpop.f32.mrb[81].mxu0  ;;  %v8371_v27 = vpop.f32.mrb[79].mxu1  ;;  %8375 = vmatmul.mubr.msk.f32.vlgmr.msra.gmra.mrb[82].mxu0 %vm200_vm2, %v6755_v45  ;;  %8380 = vmatmul.mubr.msk.f32.vlgmr.msra.gmra.mrb[80].mxu1 %vm200_vm2, %v6678_v40 }
0x24c4   :  { %8383 = vmatpush3.msra.mxu0 %v6907_v6  ;;  %8388 = vmatpush3.msra.mxu1 %v9478_v53 }
0x24c5   :  { %8384 = vmatprep.mubr.msk.f32.mxu0 %vm8885_vm0, %v9971_v1  ;;  %8392 = vmatprep.subr.mxu0 %v9971_v1 }
0x24c6   :  { %8389 = vmatprep.mubr.msk.f32.mxu1 %vm8885_vm0, %v9971_v1  ;;  %8397 = vmatprep.subr.mxu1 %v9971_v1 }
0x24c7   :  { %8385 = vmatmul.mubr.msk.f32.vlgmr.msra.gmra.mrb[84].mxu0 %vm200_vm2, %v6905_v17  ;;  %v8757_v17 = vld [vmem:[%s9954_s4 + $0x7] ss:$0 sm:$0xff] }
0x24c8   :  { %8393 = vmatpush3.msra.mxu0 %v7058_v30  ;;  %8394 = vmatprep.mubr.msk.f32.mxu0 %vm8885_vm0, %v9971_v1 }
0x24c9   :  { %8551 = vmatprep.subr.bf16.mxu0 %v9965_v16 }
0x24cb   :  { %8395 = vmatmul.mubr.msk.f32.vlgmr.msra.gmra.mrb[86].mxu0 %vm200_vm2, %v7056_v42 }
0x24cc   :  { %8553 = vmatpush3.bf16.msra.mxu0 %v9543_v2  ;;  %8410 = vmatprep.mubr.msk.f32.mxu0 %vm8885_vm0, %v9971_v1 }
0x24cd   :  { %8554 = vmatprep.subr.bf16.mxu0 %v9965_v16 }
0x24d0   :  { %8556 = vmatpush3.bf16.msra.mxu0 %v9547_v36 }
0x24d1   :  { %8569 = vmatprep.subr.bf16.mxu0 %v9965_v16 }
0x2596   :  { %v6828_v52 = vpop.f32.mrb[82].mxu0  ;;  %v6901_v53 = vpop.f32.mrb[80].mxu1 }
0x2597   :  { %v6902_v14 = vadd.f32 %v6901_v53, %v6828_v52  ;;  %v8376_v15 = vpop.f32.mrb[83].mxu0  ;;  %v8381_v22 = vpop.f32.mrb[81].mxu1 }
0x259a   :  { %v6978_v50 = vpop.f32.mrb[84].mxu0 }
0x259b   :  { %v8386_v32 = vpop.f32.mrb[85].mxu0  ;;  %8390 = vmatmul.mubr.msk.f32.vlgmr.msra.gmra.mrb[82].mxu1 %vm200_vm2, %v6978_v50 }
0x259c   :  { %8398 = vmatpush3.msra.mxu1 %v9496_v26  ;;  %8399 = vmatprep.mubr.msk.f32.mxu1 %vm8885_vm0, %v9971_v1 }
0x259d   :  { %8557 = vmatprep.subr.bf16.mxu1 %v9965_v16 }
0x259e   :  { %v7129_v2 = vpop.f32.mrb[86].mxu0 }
0x259f   :  { %v8396_v36 = vpop.f32.mrb[87].mxu0  ;;  %8400 = vmatmul.mubr.msk.f32.vlgmr.msra.gmra.mrb[84].mxu1 %vm200_vm2, %v7129_v2 }
0x25a0   :  { %8559 = vmatpush3.bf16.msra.mxu1 %v9552_v25  ;;  %8429 = vmatprep.mubr.msk.f32.mxu1 %vm8885_vm0, %v9971_v1 }
0x25a1   :  { %8560 = vmatprep.subr.bf16.mxu1 %v9965_v16 }
0x25a4   :  { %8562 = vmatpush3.bf16.msra.mxu1 %v9555_v63 }
0x25a5   :  { %8563 = vmatprep.subr.bf16.mxu1 %v9965_v16 }
0x25a8   :  { %8565 = vmatpush3.bf16.msra.mxu1 %v9560_v47 }
0x25a9   :  { %8566 = vmatprep.subr.bf16.mxu1 %v9965_v16 }
0x25ac   :  { %8568 = vmatpush3.bf16.msra.mxu1 %v9566_v54 }
0x266e   :  { %v7051_v26 = vpop.f32.mrb[82].mxu1 }
0x266f   :  { %v7055_v34 = vadd.f32 %v7051_v26, %v6902_v14  ;;  %v8391_v35 = vpop.f32.mrb[83].mxu1 }
0x2672   :  { %v7202_v48 = vpop.f32.mrb[84].mxu1 }
0x2673   :  { %v7206_v25 = vadd.f32 %v7202_v48, %v7055_v34  ;;  %v8401_v39 = vpop.f32.mrb[85].mxu1 }
0x2675   :  { %v7207_v44 = vadd.f32 %v8756_v3, %v7206_v25 }
0x2677   :  { %v7208_v63 = vadd.f32 %v7207_v44, %v9830_v23 }
0x2679   :  { %v7209_v5 = vsel %vm122_vm1, %v7208_v63, 0.0 }
0x267a   :  { %7210 = vadd.xlane.f32.xlu0 %v7209_v5 }
0x2707   :  { %v7211_v47 = vpop.xlane.xlu0 %7210 }
0x2708   :  { %v7212_v4 = vmul.f32 0.03125, %v7211_v47 }
0x270a   :  { %v7213_v8 = vsub.f32 %v7208_v63, %v7212_v4 }
0x270c   :  { %v7214_v54 = vmul.f32 %v7213_v8, %v7213_v8 }
0x270e   :  { %v7215_v57 = vsel %vm122_vm1, %v7214_v54, 0.0 }
0x270f   :  { %7216 = vadd.xlane.f32.xlu1 %v7215_v57 }
0x279c   :  { %v7217_v28 = vpop.xlane.xlu1 %7216 }
0x279d   :  { %v7218_v58 = vmul.f32 0.03125, %v7217_v28 }
0x279f   :  { %v7219_v13 = vadd.f32 1e-05, %v7218_v58 }
0x27a1   :  { %8744 = vrsqrt.f32 %v7219_v13 }
0x27ab   :  { %v8745_v56 = vpop.eup %8744 }
0x27ac   :  { %v7221_v59 = vmul.f32 %v8745_v56, %v7213_v8 }
0x27ae   :  { %v7222_v55 = vmul.f32 %v7221_v59, %v9541_v21 }
0x27b0   :  { %v7223_v23 = vadd.f32 %v7222_v55, %v9545_v31  ;;  %v9972_v31 = vld [vmem:[#allocation15_spill] sm:$0xff] }
0x27b2   :  { %8411 = vmatmul.mubr.msk.f32.vlgmr.msra.gmra.mrb[88].mxu0 %vm122_vm1, %v7223_v23 }
0x27b3   :  { %8571 = vmatpush3.bf16.msra.mxu0 %v9592_v0  ;;  %8440 = vmatprep.mubr.msk.f32.mxu0 %vm8885_vm0, %v9971_v1 }
0x27b4   :  { %8572 = vmatprep.subr.bf16.mxu0 %v9965_v16 }
0x27b7   :  { %8574 = vmatpush3.bf16.msra.mxu0 %v9596_v62 }
0x2885   :  { %v7293_v33 = vpop.f32.mrb[88].mxu0 }
0x2886   :  { %v7294_v46 = vadd.f32 %v7293_v33, %v9579_v9  ;;  %v8412_v49 = vpop.f32.mrb[89].mxu0 }
0x2888   :  { %v7297_v20 = vmax.f32 %v7294_v46, 0.0 }
0x288a   :  { %8430 = vmatmul.mubr.msk.f32.vlgmr.msra.gmra.mrb[86].mxu1 %vm1244_vm3, %v7297_v20 }
0x295d   :  { %v7367_v21 = vpop.f32.mrb[86].mxu1 }
0x295e   :  { %v7368_v38 = vadd.f32 %v7367_v21, %v9972_v31  ;;  %v8431_v18 = vpop.f32.mrb[87].mxu1 }
0x2960   :  { %v7371_v29 = vadd.f32 %v7368_v38, %v7223_v23 }
0x2962   :  { %v7372_v0 = vsel %vm122_vm1, %v7371_v29, 0.0 }
0x2963   :  { %7373 = vadd.xlane.f32.xlu0 %v7372_v0 }
0x29f0   :  { %v7374_v1 = vpop.xlane.xlu0 %7373 }
0x29f1   :  { %v7375_v61 = vmul.f32 0.03125, %v7374_v1 }
0x29f3   :  { %v7376_v16 = vsub.f32 %v7371_v29, %v7375_v61 }
0x29f5   :  { %v7377_v10 = vmul.f32 %v7376_v16, %v7376_v16 }
0x29f7   :  { %v7378_v62 = vsel %vm122_vm1, %v7377_v10, 0.0 }
0x29f8   :  { %7379 = vadd.xlane.f32.xlu0 %v7378_v62 }
0x2a85   :  { %v7380_v9 = vpop.xlane.xlu0 %7379 }
0x2a86   :  { %v7381_v51 = vmul.f32 0.03125, %v7380_v9 }
0x2a88   :  { %v7382_v24 = vadd.f32 1e-05, %v7381_v51 }
0x2a8a   :  { %8746 = vrsqrt.f32 %v7382_v24 }
0x2a94   :  { %v8747_v60 = vpop.eup %8746 }
0x2a95   :  { %v7384_v37 = vmul.f32 %v8747_v60, %v7376_v16 }
0x2a97   :  { %v7385_v43 = vmul.f32 %v7384_v37, %v9973_v19 }
0x2a99   :  { %v7386_v7 = vadd.f32 %v7385_v43, %v9974_v12 }
0x2a9b   :  { %8441 = vmatmul.mubr.msk.f32.vlgmr.msra.gmra.mrb[90].mxu0 %vm122_vm1, %v7386_v7 }
0x2b6e   :  { %v7456_v41 = vpop.f32.mrb[90].mxu0 }
0x2b6f   :  { %v7457_v42 = vadd.f32 %v8757_v17, %v7456_v41  ;;  %v8442_v6 = vpop.f32.mrb[91].mxu0 }
0x2b71   :  { %7461 = vst.msk [vmem:[#allocation10 + $0x8] sm:$0xff] %vm3912_vm4, %v7457_v42 }
0x2b72   :  { %8857 = shalt.err (!%p8854_p8)
}
0x2b73   :  { %s8858_s15 = scalar_lea.hbm %s9955_s5, 256 }
0x2b74   :  { %p8859_p9 = scmp.ne.s32.totalorder %s9955_s5, %s8858_s15  ;;  %p8862_p10 = scmp.lt.u32.totalorder %s8858_s15, %s9955_s5 }
0x2b76   :  { %p8864_p11 = pnand %p8862_p10, %p8859_p9 }
0x2b78   :  { %8867 = shalt.err (!%p8864_p11)
}
0x2b79   :  { %7473 = dma.vmem_to_hbm [thread:$0]  %s7468_s23, 256, %s9955_s5, [#allocation4], %s8878_s30, %s8878_s30, %s8879_s6  }
0x2b7a   :  { %8874 = dma.done.wait [#allocation4], 256  }
0x2b7b   :  { %8875 = vsyncadd [#allocation4], 4294967040 }
0x2b7c   :  { %7477 = vsyncpa [#allocation3], 1 }
0x2b7d   :  { %7478 = vsyncpa [#allocation6], 1 }
0x2b7e   :  { %7479 = vsyncpa [#allocation9], 1 }
0x2b7f   :  { %7480 = vsyncpa [#allocation4], 1 }

</bundles_post_ra>
